<compile_context>
chip_gen: v5e
topology: v5e:2x2
jax: 0.10.0
libtpu: 0.0.40
codegen_flags: <defaults>
</compile_context>

<pallas_src>
import functools

import jax
import jax.numpy as jnp
from jax.experimental import pallas as pl
from jax.experimental.pallas import tpu as pltpu

FT_IN = 768
FT_OUT = 32
HIDDEN = 32


def teras_kernel(
    feat_ref,   # [2, bm, 768] bf16  -- stacked (stm, non-stm) feature tile
    ftw_ref,    # [768, 32]    bf16  -- shared feature-transformer weight
    ftb_ref,    # [1, 32]      f32
    w1t_ref,    # [32, 32]     f32   -- top half of hidden1 weight (stm branch)
    w1b_ref,    # [32, 32]     f32   -- bottom half (non-stm branch)
    b1_ref,     # [1, 32]      f32
    w2_ref,     # [32, 32]     f32
    b2_ref,     # [1, 32]      f32
    wo_t_ref,   # [1, 32]      f32   -- output weight, pre-transposed
    bo_ref,     # [1, 1]       f32
    out_ref,    # [1, bm]      f32   -- lane-dense output row for this tile
):
    bm = feat_ref.shape[1]

    # One fused feature-transformer matmul for both perspectives:
    # bf16 x bf16 on the MXU, f32 accumulation.  Collapsing (2, bm) -> (2*bm)
    # only merges leading dims (lane layout untouched).
    flat = feat_ref[...].reshape(2 * bm, FT_IN)
    ft = jnp.dot(flat, ftw_ref[...],
                 preferred_element_type=jnp.float32) + ftb_ref[...]
    ft = jnp.clip(ft, 0.0, 1.0)                       # clamp(cat(s, n), 0, 1)
    s = ft[:bm, :]
    n = ft[bm:, :]

    # hidden1 with the concat folded into a split matmul (all f32, tiny).
    h1 = (jnp.dot(s, w1t_ref[...], preferred_element_type=jnp.float32)
          + jnp.dot(n, w1b_ref[...], preferred_element_type=jnp.float32)
          + b1_ref[...])
    h1 = jnp.clip(h1, 0.0, 1.0)

    h2 = jnp.dot(h1, w2_ref[...], preferred_element_type=jnp.float32) + b2_ref[...]
    h2 = jnp.clip(h2, 0.0, 1.0)

    # Final 32->1 layer folded into the lane-dense output write:
    #   logits[1, bm] = wo_t[1, 32] @ h2[bm, 32]^T
    logits = jax.lax.dot_general(
        wo_t_ref[...], h2,
        dimension_numbers=(((1,), (1,)), ((), ())),
        preferred_element_type=jnp.float32) + bo_ref[...]
    out_ref[...] = jax.nn.sigmoid(logits)


@functools.partial(jax.jit, static_argnames=("bm",))
def teras_forward(features, params, *, bm=1024):
    """Fused TerasNN forward.

    features: [2, B, 768] stacked (stm, non_stm) binary board features
              (bf16 preferred; f32 is cast — exact for {0,1} features).
    Returns [B, 1] f32 win probabilities.
    """
    assert features.ndim == 3 and features.shape[0] == 2 and features.shape[2] == FT_IN
    B = features.shape[1]

    # Ship features as bf16 (exact for binary NNUE features): halves HBM traffic
    # and lets the MXU run its native bf16 path.
    if features.dtype != jnp.bfloat16:
        features = features.astype(jnp.bfloat16)

    ftw, ftb, w1t, w1b, b1, w2, b2, wo_t, bo = params
    ftw_bf16 = ftw.astype(jnp.bfloat16)   # cast once in the wrapper (tiny)

    # ---- batch-tile selection -------------------------------------------------
    bm = min(bm, B)
    assert B % bm == 0, f"batch {B} must be divisible by tile {bm}"
    # Prefer an even parallel grid (>= 2 tiles) so v7x's two TensorCores balance.
    if B // bm == 1 and B % 2 == 0 and (B // 2) % 128 == 0:
        bm = B // 2
    elif (B // bm) % 2 == 1 and (B // bm) > 1 and bm % 256 == 0:
        bm //= 2
    # Lane-dense output block: minor dim must be a multiple of 128 or the full dim.
    assert bm % 128 == 0 or bm == B, "bm must be a multiple of 128 (or equal B)"
    grid = (B // bm,)

    # ---- VMEM budget: double-buffered stacked feature block + small extras -----
    feat_block_bytes = 2 * bm * FT_IN * features.dtype.itemsize
    vmem_limit = int(min(48 << 20, max(32 << 20, 3 * feat_block_bytes + (8 << 20))))

    # Advisory cost estimate so XLA schedules around this mem-bound custom call.
    flops_per_row = 2 * (2 * FT_IN * FT_OUT + 2 * FT_OUT * HIDDEN
                         + HIDDEN * HIDDEN + HIDDEN)
    small = (ftb, w1t, w1b, b1, w2, b2, wo_t, bo)
    weight_bytes = (int(ftw_bf16.size) * ftw_bf16.dtype.itemsize
                    + sum(int(p.size) * p.dtype.itemsize for p in small))
    cost = pl.CostEstimate(
        flops=B * flops_per_row,
        transcendentals=B,  # sigmoid
        bytes_accessed=int(features.size) * features.dtype.itemsize
                       + weight_bytes + B * 4)

    # Constant-index blocks for the small weights/biases.  (pl.Buffered(1) would
    # shave ~100-200 KiB of double-buffer VMEM here; omitted as negligible.)
    def const_spec(arr):
        return pl.BlockSpec(arr.shape, lambda i, _nd=arr.ndim: (0,) * _nd)

    out_row = pl.pallas_call(
        teras_kernel,
        out_shape=jax.ShapeDtypeStruct((1, B), jnp.float32),
        grid_spec=pltpu.PrefetchScalarGridSpec(
            num_scalar_prefetch=0,
            grid=grid,
            in_specs=[
                pl.BlockSpec((2, bm, FT_IN), lambda i: (0, i, 0)),  # features
                const_spec(ftw_bf16), const_spec(ftb),
                const_spec(w1t), const_spec(w1b), const_spec(b1),
                const_spec(w2), const_spec(b2),
                const_spec(wo_t), const_spec(bo),
            ],
            out_specs=pl.BlockSpec((1, bm), lambda i: (0, i)),
        ),
        compiler_params=pltpu.CompilerParams(
            dimension_semantics=("parallel",),
            vmem_limit_bytes=vmem_limit),
        cost_estimate=cost,
    )(features, ftw_bf16, ftb, w1t, w1b, b1, w2, b2, wo_t, bo)

    # (1, B) row-major -> (B, 1): pure layout plumbing outside the kernel.
    return out_row.reshape(B, 1)


def init_params(key):
    """PyTorch-Linear-style init (uniform(-1/sqrt(in), 1/sqrt(in))).

    Weights are stored transposed ([in, out]) vs nn.Linear; hidden1 is pre-split
    into stm / non-stm blocks; the output layer is stored as a [1, 32] row."""
    def linear(k, fan_in, fan_out):
        kw, kb = jax.random.split(k)
        bound = 1.0 / (fan_in ** 0.5)
        w = jax.random.uniform(kw, (fan_in, fan_out), jnp.float32, -bound, bound)
        b = jax.random.uniform(kb, (1, fan_out), jnp.float32, -bound, bound)
        return w, b

    k_ft, k_h1, k_h2, k_out = jax.random.split(key, 4)
    ftw, ftb = linear(k_ft, FT_IN, FT_OUT)          # shared ft layer
    w1, b1 = linear(k_h1, FT_OUT * 2, HIDDEN)       # hidden1: [64, 32]
    w2, b2 = linear(k_h2, HIDDEN, HIDDEN)           # hidden2: [32, 32]
    wo, bo = linear(k_out, HIDDEN, 1)               # out: [32, 1]

    w1t = w1[:FT_OUT, :]
    w1b = w1[FT_OUT:, :]
    wo_t = wo.T                                     # [1, 32]
    return (ftw, ftb, w1t, w1b, b1, w2, b2, wo_t, bo)


def reference_forward(features, params):
    """Pure-JAX reference matching the kernel's bf16 feature-transformer numerics."""
    ftw, ftb, w1t, w1b, b1, w2, b2, wo_t, bo = params
    ftw = ftw.astype(jnp.bfloat16).astype(jnp.float32)
    stm = features[0].astype(jnp.bfloat16).astype(jnp.float32)
    nstm = features[1].astype(jnp.bfloat16).astype(jnp.float32)
    s = stm @ ftw + ftb
    n = nstm @ ftw + ftb
    h = jnp.clip(jnp.concatenate([s, n], axis=1), 0.0, 1.0)
    w1 = jnp.concatenate([w1t, w1b], axis=0)
    h = jnp.clip(h @ w1 + b1, 0.0, 1.0)
    h = jnp.clip(h @ w2 + b2, 0.0, 1.0)
    return jax.nn.sigmoid(h @ wo_t.T + bo)


if __name__ == "__main__":
    key = jax.random.PRNGKey(0)
    k_p, k_f = jax.random.split(key)

    B = 512  # small demo batch; auto-tiled into two 256-row tiles (even grid)
    params = init_params(k_p)

    # Stacked (stm, non_stm) sparse {0,1} board features; bf16 is exact for 0/1.
    features = jax.random.bernoulli(k_f, 0.05, (2, B, FT_IN)).astype(jnp.bfloat16)

    out = teras_forward(features, params)
    out = jax.block_until_ready(out)

    ref = reference_forward(features, params)
    assert out.shape == (B, 1)
    assert jnp.allclose(out, ref, atol=1e-4, rtol=1e-4), (
        float(jnp.max(jnp.abs(out - ref))))

    print("KERNEL_OK")
</pallas_src>

<mosaic_0001>
module attributes {stable_mosaic.version = 11 : i64} {
  func.func @teras_kernel(%arg0: i32, %arg1: memref<2x256x768xbf16, #tpu.memory_space<vmem>>, %arg2: memref<768x32xbf16, #tpu.memory_space<vmem>>, %arg3: memref<1x32xf32, #tpu.memory_space<vmem>>, %arg4: memref<32x32xf32, #tpu.memory_space<vmem>>, %arg5: memref<32x32xf32, #tpu.memory_space<vmem>>, %arg6: memref<1x32xf32, #tpu.memory_space<vmem>>, %arg7: memref<32x32xf32, #tpu.memory_space<vmem>>, %arg8: memref<1x32xf32, #tpu.memory_space<vmem>>, %arg9: memref<1x32xf32, #tpu.memory_space<vmem>>, %arg10: memref<1x1xf32, #tpu.memory_space<vmem>>, %arg11: memref<1x256xf32, #tpu.memory_space<vmem>>) attributes {dimension_semantics = [#tpu.dimension_semantics<parallel>], iteration_bounds = array<i64: 2>, scalar_prefetch = 0 : i64, scratch_operands = 0 : i64, tpu.core_type = #tpu.core_type<tc>, window_params = [{transform_indices = @transform_0, window_bounds = array<i64: 2, 256, 768>}, {pipeline_mode = #tpu.pipeline_mode<synchronous>, transform_indices = @transform_1, window_bounds = array<i64: 768, 32>}, {pipeline_mode = #tpu.pipeline_mode<synchronous>, transform_indices = @transform_2, window_bounds = array<i64: 1, 32>}, {pipeline_mode = #tpu.pipeline_mode<synchronous>, transform_indices = @transform_3, window_bounds = array<i64: 32, 32>}, {pipeline_mode = #tpu.pipeline_mode<synchronous>, transform_indices = @transform_4, window_bounds = array<i64: 32, 32>}, {pipeline_mode = #tpu.pipeline_mode<synchronous>, transform_indices = @transform_5, window_bounds = array<i64: 1, 32>}, {pipeline_mode = #tpu.pipeline_mode<synchronous>, transform_indices = @transform_6, window_bounds = array<i64: 32, 32>}, {pipeline_mode = #tpu.pipeline_mode<synchronous>, transform_indices = @transform_7, window_bounds = array<i64: 1, 32>}, {pipeline_mode = #tpu.pipeline_mode<synchronous>, transform_indices = @transform_8, window_bounds = array<i64: 1, 32>}, {pipeline_mode = #tpu.pipeline_mode<synchronous>, transform_indices = @transform_9, window_bounds = array<i64: 1, 1>}, {transform_indices = @transform_10, window_bounds = array<i64: 1, 256>}]} {
    %c0 = arith.constant 0 : index
    %c0_0 = arith.constant 0 : index
    %c0_1 = arith.constant 0 : index
    %0 = vector.load %arg1[%c0, %c0_0, %c0_1] : memref<2x256x768xbf16, #tpu.memory_space<vmem>>, vector<2x256x768xbf16>
    %1 = vector.shape_cast %0 : vector<2x256x768xbf16> to vector<512x768xbf16>
    %c0_2 = arith.constant 0 : index
    %c0_3 = arith.constant 0 : index
    %2 = vector.load %arg2[%c0_2, %c0_3] : memref<768x32xbf16, #tpu.memory_space<vmem>>, vector<768x32xbf16>
    %cst = arith.constant dense<0.000000e+00> : vector<512x32xf32>
    %3 = tpu.matmul %1, %2, %cst {dimension_numbers = #tpu.dot_dimension_numbers<[1], [0], [0], [1], [0, 0, 1, 1], [], []>} : vector<512x768xbf16>, vector<768x32xbf16>, vector<512x32xf32> -> vector<512x32xf32>
    %c0_4 = arith.constant 0 : index
    %c0_5 = arith.constant 0 : index
    %4 = vector.load %arg3[%c0_4, %c0_5] : memref<1x32xf32, #tpu.memory_space<vmem>>, vector<1x32xf32>
    %5 = vector.broadcast %4 : vector<1x32xf32> to vector<512x32xf32>
    %6 = arith.addf %3, %5 : vector<512x32xf32>
    %cst_6 = arith.constant 0.000000e+00 : f32
    %cst_7 = arith.constant 1.000000e+00 : f32
    %7 = vector.broadcast %cst_6 : f32 to vector<512x32xf32>
    %8 = arith.maximumf %7, %6 : vector<512x32xf32>
    %9 = vector.broadcast %cst_7 : f32 to vector<512x32xf32>
    %10 = arith.minimumf %9, %8 : vector<512x32xf32>
    %11 = vector.extract_strided_slice %10 {offsets = [0, 0], sizes = [256, 32], strides = [1, 1]} : vector<512x32xf32> to vector<256x32xf32>
    %12 = vector.extract_strided_slice %10 {offsets = [256, 0], sizes = [256, 32], strides = [1, 1]} : vector<512x32xf32> to vector<256x32xf32>
    %c0_8 = arith.constant 0 : index
    %c0_9 = arith.constant 0 : index
    %13 = vector.load %arg4[%c0_8, %c0_9] : memref<32x32xf32, #tpu.memory_space<vmem>>, vector<32x32xf32>
    %cst_10 = arith.constant dense<0.000000e+00> : vector<256x32xf32>
    %14 = tpu.matmul %11, %13, %cst_10 {dimension_numbers = #tpu.dot_dimension_numbers<[1], [0], [0], [1], [0, 0, 1, 1], [], []>} : vector<256x32xf32>, vector<32x32xf32>, vector<256x32xf32> -> vector<256x32xf32>
    %c0_11 = arith.constant 0 : index
    %c0_12 = arith.constant 0 : index
    %15 = vector.load %arg5[%c0_11, %c0_12] : memref<32x32xf32, #tpu.memory_space<vmem>>, vector<32x32xf32>
    %cst_13 = arith.constant dense<0.000000e+00> : vector<256x32xf32>
    %16 = tpu.matmul %12, %15, %cst_13 {dimension_numbers = #tpu.dot_dimension_numbers<[1], [0], [0], [1], [0, 0, 1, 1], [], []>} : vector<256x32xf32>, vector<32x32xf32>, vector<256x32xf32> -> vector<256x32xf32>
    %17 = arith.addf %14, %16 : vector<256x32xf32>
    %c0_14 = arith.constant 0 : index
    %c0_15 = arith.constant 0 : index
    %18 = vector.load %arg6[%c0_14, %c0_15] : memref<1x32xf32, #tpu.memory_space<vmem>>, vector<1x32xf32>
    %19 = vector.broadcast %18 : vector<1x32xf32> to vector<256x32xf32>
    %20 = arith.addf %17, %19 : vector<256x32xf32>
    %cst_16 = arith.constant 0.000000e+00 : f32
    %cst_17 = arith.constant 1.000000e+00 : f32
    %21 = vector.broadcast %cst_16 : f32 to vector<256x32xf32>
    %22 = arith.maximumf %21, %20 : vector<256x32xf32>
    %23 = vector.broadcast %cst_17 : f32 to vector<256x32xf32>
    %24 = arith.minimumf %23, %22 : vector<256x32xf32>
    %c0_18 = arith.constant 0 : index
    %c0_19 = arith.constant 0 : index
    %25 = vector.load %arg7[%c0_18, %c0_19] : memref<32x32xf32, #tpu.memory_space<vmem>>, vector<32x32xf32>
    %cst_20 = arith.constant dense<0.000000e+00> : vector<256x32xf32>
    %26 = tpu.matmul %24, %25, %cst_20 {dimension_numbers = #tpu.dot_dimension_numbers<[1], [0], [0], [1], [0, 0, 1, 1], [], []>} : vector<256x32xf32>, vector<32x32xf32>, vector<256x32xf32> -> vector<256x32xf32>
    %c0_21 = arith.constant 0 : index
    %c0_22 = arith.constant 0 : index
    %27 = vector.load %arg8[%c0_21, %c0_22] : memref<1x32xf32, #tpu.memory_space<vmem>>, vector<1x32xf32>
    %28 = vector.broadcast %27 : vector<1x32xf32> to vector<256x32xf32>
    %29 = arith.addf %26, %28 : vector<256x32xf32>
    %cst_23 = arith.constant 0.000000e+00 : f32
    %cst_24 = arith.constant 1.000000e+00 : f32
    %30 = vector.broadcast %cst_23 : f32 to vector<256x32xf32>
    %31 = arith.maximumf %30, %29 : vector<256x32xf32>
    %32 = vector.broadcast %cst_24 : f32 to vector<256x32xf32>
    %33 = arith.minimumf %32, %31 : vector<256x32xf32>
    %c0_25 = arith.constant 0 : index
    %c0_26 = arith.constant 0 : index
    %34 = vector.load %arg9[%c0_25, %c0_26] : memref<1x32xf32, #tpu.memory_space<vmem>>, vector<1x32xf32>
    %cst_27 = arith.constant dense<0.000000e+00> : vector<1x256xf32>
    %35 = tpu.matmul %34, %33, %cst_27 {dimension_numbers = #tpu.dot_dimension_numbers<[1], [1], [0], [0], [0, 0, 1, 0], [], []>} : vector<1x32xf32>, vector<256x32xf32>, vector<1x256xf32> -> vector<1x256xf32>
    %c0_28 = arith.constant 0 : index
    %c0_29 = arith.constant 0 : index
    %36 = vector.load %arg10[%c0_28, %c0_29] : memref<1x1xf32, #tpu.memory_space<vmem>>, vector<1x1xf32>
    %37 = vector.broadcast %36 : vector<1x1xf32> to vector<1x256xf32>
    %38 = arith.addf %35, %37 : vector<1x256xf32>
    %39 = arith.negf %38 : vector<1x256xf32>
    %40 = math.exp %39 : vector<1x256xf32>
    %cst_30 = arith.constant 1.000000e+00 : f32
    %41 = vector.broadcast %cst_30 : f32 to vector<1x256xf32>
    %42 = arith.addf %41, %40 : vector<1x256xf32>
    %43 = arith.divf %41, %42 : vector<1x256xf32>
    %c0_31 = arith.constant 0 : index
    %c0_32 = arith.constant 0 : index
    %44 = vector.load %arg11[%c0_31, %c0_32] : memref<1x256xf32, #tpu.memory_space<vmem>>, vector<1x256xf32>
    tpu.vector_store %arg11[%c0_31, %c0_32], %43 {strides = array<i32>} : memref<1x256xf32, #tpu.memory_space<vmem>>, vector<1x256xf32>,
    return
  }
  func.func @transform_0(%arg0: i32) -> (i32, i32, i32) {
    %c0_i32 = arith.constant 0 : i32
    %c0_i32_0 = arith.constant 0 : i32
    %c0_i32_1 = arith.constant 0 : i32
    return %c0_i32, %arg0, %c0_i32_0 : i32, i32, i32
  }
  func.func @transform_1(%arg0: i32) -> (i32, i32) {
    %c0_i32 = arith.constant 0 : i32
    %c0_i32_0 = arith.constant 0 : i32
    %c0_i32_1 = arith.constant 0 : i32
    return %c0_i32, %c0_i32_0 : i32, i32
  }
  func.func @transform_2(%arg0: i32) -> (i32, i32) {
    %c0_i32 = arith.constant 0 : i32
    %c0_i32_0 = arith.constant 0 : i32
    %c0_i32_1 = arith.constant 0 : i32
    return %c0_i32, %c0_i32_0 : i32, i32
  }
  func.func @transform_3(%arg0: i32) -> (i32, i32) {
    %c0_i32 = arith.constant 0 : i32
    %c0_i32_0 = arith.constant 0 : i32
    %c0_i32_1 = arith.constant 0 : i32
    return %c0_i32, %c0_i32_0 : i32, i32
  }
  func.func @transform_4(%arg0: i32) -> (i32, i32) {
    %c0_i32 = arith.constant 0 : i32
    %c0_i32_0 = arith.constant 0 : i32
    %c0_i32_1 = arith.constant 0 : i32
    return %c0_i32, %c0_i32_0 : i32, i32
  }
  func.func @transform_5(%arg0: i32) -> (i32, i32) {
    %c0_i32 = arith.constant 0 : i32
    %c0_i32_0 = arith.constant 0 : i32
    %c0_i32_1 = arith.constant 0 : i32
    return %c0_i32, %c0_i32_0 : i32, i32
  }
  func.func @transform_6(%arg0: i32) -> (i32, i32) {
    %c0_i32 = arith.constant 0 : i32
    %c0_i32_0 = arith.constant 0 : i32
    %c0_i32_1 = arith.constant 0 : i32
    return %c0_i32, %c0_i32_0 : i32, i32
  }
  func.func @transform_7(%arg0: i32) -> (i32, i32) {
    %c0_i32 = arith.constant 0 : i32
    %c0_i32_0 = arith.constant 0 : i32
    %c0_i32_1 = arith.constant 0 : i32
    return %c0_i32, %c0_i32_0 : i32, i32
  }
  func.func @transform_8(%arg0: i32) -> (i32, i32) {
    %c0_i32 = arith.constant 0 : i32
    %c0_i32_0 = arith.constant 0 : i32
    %c0_i32_1 = arith.constant 0 : i32
    return %c0_i32, %c0_i32_0 : i32, i32
  }
  func.func @transform_9(%arg0: i32) -> (i32, i32) {
    %c0_i32 = arith.constant 0 : i32
    %c0_i32_0 = arith.constant 0 : i32
    %c0_i32_1 = arith.constant 0 : i32
    return %c0_i32, %c0_i32_0 : i32, i32
  }
  func.func @transform_10(%arg0: i32) -> (i32, i32) {
    %c0_i32 = arith.constant 0 : i32
    %c0_i32_0 = arith.constant 0 : i32
    return %c0_i32, %arg0 : i32, i32
  }
}

</mosaic_0001>

<bundles_post_ra>
// kernel: teras_forward.1
= control target key start
LH: loop header
LB: loop body
LE: loop exit
PB: predicated region body
PF: predicated region fallthrough
CT: control target
= control target key end

     0   :  { %s7896_s0 = inlined_call_operand.hbm [shape: bf16[2,512,768], index: 0, kind: input, shape index: {}]   ;;  %s7897_s1 = inlined_call_operand.vmem [shape: bf16[768,32], index: 1, kind: input, shape index: {}]   ;;  %s7898_s2 = inlined_call_operand.hbm [shape: f32[1,32], index: 2, kind: input, shape index: {}]   ;;  %s7899_s3 = inlined_call_operand.hbm [shape: f32[32,32], index: 3, kind: input, shape index: {}]   ;;  %s7900_s4 = inlined_call_operand.hbm [shape: f32[32,32], index: 4, kind: input, shape index: {}]   ;;  %s7901_s5 = inlined_call_operand.hbm [shape: f32[1,32], index: 5, kind: input, shape index: {}]   ;;  %s7902_s6 = inlined_call_operand.hbm [shape: f32[32,32], index: 6, kind: input, shape index: {}]   ;;  %s7903_s7 = inlined_call_operand.hbm [shape: f32[1,32], index: 7, kind: input, shape index: {}]   ;;  %s7904_s8 = inlined_call_operand.hbm [shape: f32[1,32], index: 8, kind: input, shape index: {}]   ;;  %s7905_s9 = inlined_call_operand.<no memory space> [shape: f32[1,1], index: 9, kind: input, shape index: {}]   ;;  %s7906_s10 = inlined_call_operand.hbm [shape: f32[1,512], index: 10, kind: output, shape index: {}]  }
   0x1   :  { %7911 = sst [smem:[#allocation56_spill]] %s7898_s2  ;;  %v15_v0 = vstv %s7905_s9 }
   0x2   :  { %7912 = sst [smem:[#allocation57_spill]] %s7900_s4  ;;  %16 = vst [vmem:[#allocation2] sm:$0x1] %v15_v0 }
   0x3   :  { %7913 = sst [smem:[#allocation58_spill]] %s7902_s6 }
   0x4   :  { %17 = vsyncpa [#allocation4], 0 }
   0x5   :  { %19 = vsyncpa [#allocation4 + $0x1], 0 }
   0x6   :  { %20 = vsyncpa [#allocation7], 0 }
   0x7   :  { %21 = vsyncpa [#allocation10], 0 }
   0x8   :  { %22 = vsyncpa [#allocation13], 0 }
   0x9   :  { %23 = vsyncpa [#allocation16], 0 }
   0xa   :  { %24 = vsyncpa [#allocation5], 0 }
   0xb   :  { %26 = vsyncpa [#allocation5 + $0x1], 0  ;;  %s6249_s15 = smov 0   ;;  %s6251_s16 = smov 0  }
   0xc   :  { %s6253_s17 = smov 0   ;;  %s6255_s18 = smov 0  }
   0xd LB: > { %7914 = sst [smem:[#allocation27_spill]] %s6161_s15  ;;  %s6270_s9 = sadd.s32 4294967295, %s6173_s18   ;;  %s6173_s18 = sphi %s6255_s18, %s7981_s18   ;;  %s6169_s17 = sphi %s6253_s17, %s7985_s17   ;;  %s6165_s16 = sphi %s6251_s16, %s7984_s16   ;;  %s6161_s15 = sphi %s6249_s15, %s7983_s15  }
   0xe   : > { %s4357_s19 = sadd.s32 4294967294, %s6173_s18   ;;  %s6274_s20 = sadd.s32 1, %s6173_s18  }
   0xf   : > { %7915 = sst [smem:[#allocation28_spill]] %s6274_s20  ;;  %s39_s21 = sadd.s32 1, %s6169_s17 }
  0x10   : > { %s36_s22 = ssub.s32 %s6173_s18, %s6274_s20  ;;  %p46_p0 = scmp.ne.s32.totalorder %s6169_s17, %s6165_s16 }
  0x11   : > { %p37_p1 = scmp.eq.s32.totalorder %s36_s22, 0  ;;  %p47_p2 = scmp.eq.s32.totalorder %s6173_s18, 0 }
  0x12   : > { %p52_p3 = scmp.ne.s32.totalorder %s6165_s16, %s6161_s15  ;;  %p53_p4 = scmp.eq.s32.totalorder %s6270_s9, 0 }
  0x13   : > { %s6286_s23 = scalar_select %p37_p1, %s6169_s17, %s39_s21  }
  0x14   : > { %p6288_p5 = por %p47_p2, %p46_p0  ;;  %p6294_p6 = por %p53_p4, %p52_p3 }
  0x15   : > { %7916 = sst [smem:[#allocation29_spill]] %s6286_s23  ;;  %p265_p7 = scmp.eq.s32.totalorder %s6270_s9, 1 }
  0x16   : > { %p271_p8 = scmp.eq.s32.totalorder %s4357_s19, 1  ;;  %p4358_p9 = scmp.ge.s32.totalorder %s6173_s18, 1 }
  0x17   : > { %p278_p10 = scmp.lt.s32.totalorder %s6173_s18, 3  ;;  %p6301_p11 = por %p265_p7, %p46_p0 }
  0x18   : > { %p6305_p12 = por %p271_p8, %p52_p3  ;;  %s7923_s2 = sld [smem:[#allocation56_spill]] }
  0x19   : > { %p6309_p13 = pnand %p4358_p9, %p278_p10  ;;  %s6175_s12 = smov [#allocation6]  }
  0x1a   : > { %s7920_s27 = scalar_select %p6305_p12, 1, 0 }
  0x1b   : > { %p5779_p1 = pneg %p6309_p13  ;;  %s295_s13 = sshll.u32 %s6175_s12, 4  ;;  %s296_s13 = int_to_ptr.vmem [resolvable:$true] %s295_s13 }
  0x1c   : > { %7921 = sst [smem:[#allocation30_spill]] %s7920_s27  ;;  %s6177_s20 = smov 128  }
  0x1d   : > { %p6320_p0 = pnand %p5779_p1, %p53_p4  ;;  %s7925_s4 = sld [smem:[#allocation57_spill]] }
  0x1e   : > { %s293_s11 = sshll.u32 %s7923_s2, 4  ;;  %s7926_s6 = sld [smem:[#allocation58_spill]]  ;;  %s294_s11 = int_to_ptr.hbm [resolvable:$true] %s293_s11 }
  0x1f   : > { %5782 = dma.hbm_to_vmem [thread:$0]  (!%p6320_p0), %s294_s11, 16, %s296_s13, [#allocation7]  }
  0x20   : > { %s6176_s2 = smov [#allocation9]   ;;  %s6178_s27 = smov 8  }
  0x21   : > { %s320_s23 = sshll.u32 %s6176_s2, 4  ;;  %s6179_s19 = smov [#allocation12]   ;;  %s321_s23 = int_to_ptr.vmem [resolvable:$true] %s320_s23 }
  0x22   : > { %s346_s21 = sshll.u32 %s6179_s19, 4  ;;  %s304_s11 = sshll.u32 %s7899_s3, 4  ;;  %s347_s21 = int_to_ptr.vmem [resolvable:$true] %s346_s21  ;;  %s305_s11 = int_to_ptr.hbm [resolvable:$true] %s304_s11 }
  0x23   : > { %s318_s22 = sshll.u32 %s7925_s4, 4  ;;  %s333_s29 = sshll.u32 %s7901_s5, 4  ;;  %s319_s22 = int_to_ptr.hbm [resolvable:$true] %s318_s22  ;;  %s334_s29 = int_to_ptr.hbm [resolvable:$true] %s333_s29 }
  0x24   : > { %s344_s12 = sshll.u32 %s7926_s6, 4  ;;  %s6180_s30 = smov [#allocation8]   ;;  %s345_s12 = int_to_ptr.hbm [resolvable:$true] %s344_s12 }
  0x25   : > { %5788 = dma.hbm_to_vmem [thread:$0]  (!%p6320_p0), %s319_s22, 512, %s321_s23, [#allocation10], %s6177_s20, %s6177_s20, %s6178_s27  }
  0x26   : > { %5794 = dma.hbm_to_vmem [thread:$0]  (!%p6320_p0), %s345_s12, 512, %s347_s21, [#allocation13], %s6177_s20, %s6177_s20, %s6178_s27  }
  0x27   : > { %s306_s6 = sshll.u32 %s6180_s30, 4  ;;  %s6181_s23 = smov [#allocation11]   ;;  %s307_s6 = int_to_ptr.vmem [resolvable:$true] %s306_s6 }
  0x28   : > { %5785 = dma.hbm_to_vmem [thread:$0]  (!%p6320_p0), %s305_s11, 512, %s307_s6, [#allocation7], %s6177_s20, %s6177_s20, %s6178_s27  }
  0x29   : > { %s335_s4 = sshll.u32 %s6181_s23, 4  ;;  %s359_s19 = sshll.u32 %s7903_s7, 4  ;;  %s336_s4 = int_to_ptr.vmem [resolvable:$true] %s335_s4  ;;  %s360_s19 = int_to_ptr.hbm [resolvable:$true] %s359_s19 }
  0x2a   : > { %5791 = dma.hbm_to_vmem [thread:$0]  (!%p6320_p0), %s334_s29, 16, %s336_s4, [#allocation10]  }
  0x2b   : > { %s371_s13 = sshll.u32 %s7904_s8, 4  ;;  %s6182_s2 = smov [#allocation14]   ;;  %s372_s13 = int_to_ptr.hbm [resolvable:$true] %s371_s13 }
  0x2c   : > { %s361_s30 = sshll.u32 %s6182_s2, 4  ;;  %s6183_s6 = smov [#allocation15]   ;;  %s362_s30 = int_to_ptr.vmem [resolvable:$true] %s361_s30 }
  0x2d   : > { %5797 = dma.hbm_to_vmem [thread:$0]  (!%p6320_p0), %s360_s19, 16, %s362_s30, [#allocation13]  }
  0x2e   : > { %s373_s20 = sshll.u32 %s6183_s6, 4  ;;  %p4366_p2 = scmp.ge.s32.totalorder %s6173_s18, 2  ;;  %s374_s20 = int_to_ptr.vmem [resolvable:$true] %s373_s20 }
  0x2f   : > { %5800 = dma.hbm_to_vmem [thread:$0]  (!%p6320_p0), %s372_s13, 16, %s374_s20, [#allocation16]  }
  0x30   : > { %383 = sbr.rel (%p4366_p2) target bundleno = 68 (0x44), region = 52 }
  0x35   : > { %s387_s27 = sand.u32 1, %s6169_s17   ;;  %s5738_s11 = smul.u32 768, %s6173_s18 }
  0x36   : > { %s5737_s29 = smul.u32 1536, %s387_s27  ;;  %s6184_s13 = smov 24576  }
  0x37   : > { %s397_s14 = scalar_lea.hbm %s7896_s0, %s5738_s11  ;;  %5755 = sst [smem:[#allocation19]] (%p6288_p5), %s6184_s13 }
  0x38   : > { %s410_s15 = sshll.u32 %s397_s14, 4  ;;  %s391_s19 = scalar_lea.vmem [#allocation3], %s5737_s29  ;;  %s411_s15 = int_to_ptr.hbm [resolvable:$true] %s410_s15 }
  0x39   : > { %s5754_s22 = scalar_select %p6288_p5, [#allocation0], [#allocation20] }
  0x3a   : > { %s412_s12 = sshll.u32 %s391_s19, 4  ;;  %s6185_s2 = smov 12288   ;;  %s413_s12 = int_to_ptr.vmem [resolvable:$true] %s412_s12 }
  0x3b   : > { %s402_s21 = sld [smem:[%s5754_s22]]   ;;  %s6186_s30 = smov 32  }
  0x3c   : > { %5756 = sst [smem:[#allocation19 + $0x1]] (%p6288_p5), %s6185_s2  ;;  %s6187_s6 = smov 384  }
  0x3d   : > { %5757 = sst [smem:[#allocation19 + $0x2]] (%p6288_p5), %s6186_s30  ;;  %s6188_s11 = smov 24  }
  0x3e   : > { %5758 = sst [smem:[#allocation19 + $0x3]] (%p6288_p5), %s6187_s6  ;;  %s388_s23 = scalar_lea.sflag [#allocation4], %s387_s27 }
  0x3f   : > { %5759 = sst [smem:[#allocation19 + $0x4]] (%p6288_p5), %s6187_s6  ;;  %s6189_s4 = smov [#allocation18]  }
  0x40   : > { %5760 = sst [smem:[#allocation19 + $0x5]] (%p6288_p5), %s6188_s11 }
  0x41   : > { %s4370_s20 = sshll.u32 %s402_s21, 26 }
  0x42   : > { %s4371_s29 = sadd.s32 134217728, %s4370_s20 }
  0x43   : > { %5761 = dma.general (%p6288_p5), %s411_s15, 24576, %s413_s12, %s388_s23, %s6189_s4, [#allocation19], %s4371_s29, 0  }
  0x44 PF: > { %437 = sbr.rel (%p6309_p13) target bundleno = 2001 (0x7d1), region = 60 }
  0x49   : > { %s6383_s14 = sand.u32 1, %s6165_s16  }
  0x4a   : > { %s5739_s22 = smul.u32 1536, %s6383_s14  ;;  %s440_s19 = scalar_lea.sflag [#allocation4], %s6383_s14 }
  0x4c   : > { %s6387_s21 = scalar_lea.vmem [#allocation3], %s5739_s22 }
  0x4d   : > { %6136 = dma.done.wait (%p6294_p6), %s440_s19, 24576  }
  0x4e   : > { %6138 = vsyncadd (%p6294_p6), %s440_s19, 4294942720 }
  0x4f   : > { %6140 = dma.done.wait (%p53_p4), [#allocation7], 528  }
  0x50   : > { %6142 = vsyncadd (%p53_p4), [#allocation7], 4294966768 }
  0x51   : > { %6144 = dma.done.wait (%p53_p4), [#allocation10], 528  }
  0x52   : > { %6146 = vsyncadd (%p53_p4), [#allocation10], 4294966768 }
  0x53   : > { %6148 = dma.done.wait (%p53_p4), [#allocation13], 528  }
  0x54   : > { %6150 = vsyncadd (%p53_p4), [#allocation13], 4294966768 }
  0x55   : > { %6152 = dma.done.wait (%p53_p4), [#allocation16], 16  }
  0x56   : > { %6154 = vsyncadd (%p53_p4), [#allocation16], 4294967280  ;;  %v5676_v1 = vld [vmem:[%s7897_s1 + $0x38] sm:$0xff]  ;;  %v5675_v4 = vld [vmem:[%s7897_s1 + $0x30] sm:$0xff]  ;;  %vm3208_vm0 = vcmask 261120   ;;  %s5474_s11 = sshll.u32 %s6270_s9, 1 }
  0x57   : > { %v6415_v2 = vld [vmem:[%s7897_s1 + $0x78] sm:$0xff]  ;;  %2058 = vmatpush.bf16.msra.mxu0 %v5676_v1  ;;  %5717 = vmatpush.bf16.msra.mxu3 %v5676_v1  ;;  %v6427_v5 = vld [vmem:[%s7897_s1 + $0x70] sm:$0xff]  ;;  %v5674_v7 = vld [vmem:[%s7897_s1 + $0x28] sm:$0xff]  ;;  %s4215_s4 = scalar_lea.hbm %s7906_s10, %s5474_s11  ;;  %vm4196_vm9 = vcmask 1040384   ;;  %s4205_s24 = scalar_lea.sflag [#allocation5], %s6383_s14 }
  0x58   : > { %v5692_v3 = vld [vmem:[%s7897_s1 + $0xb8] sm:$0xff]  ;;  %2227 = vmatpush.bf16.msra.mxu1 %v6415_v2  ;;  %v5691_v6 = vld [vmem:[%s7897_s1 + $0xb0] sm:$0xff]  ;;  %v5682_v8 = vld [vmem:[%s7897_s1 + $0x68] sm:$0xff]  ;;  %s4219_s19 = sshll.u32 %s4215_s4, 4  ;;  %s6111_s12 = scalar_lea.hbm %s7906_s10, 4  ;;  %s4220_s19 = int_to_ptr.hbm [resolvable:$true] %s4219_s19 }
  0x59   : > { %2396 = vmatpush.bf16.msra.mxu2 %v5692_v3  ;;  %v5690_v9 = vld [vmem:[%s7897_s1 + $0xa8] sm:$0xff]  ;;  %v5673_v10 = vld [vmem:[%s7897_s1 + $0x20] sm:$0xff]  ;;  %v5672_v13 = vld [vmem:[%s7897_s1 + $0x18] sm:$0xff]  ;;  %s6105_s25 = sshra.s32 %s4220_s19, 4  ;;  %s6106_s25 = int_to_ptr.hbm [resolvable:$true] %s6105_s25 }
  0x5a   : > { %v5681_v11 = vld [vmem:[%s7897_s1 + $0x60] sm:$0xff]  ;;  %v5680_v14 = vld [vmem:[%s7897_s1 + $0x58] sm:$0xff]  ;;  %v5671_v16 = vld [vmem:[%s7897_s1 + $0x10] sm:$0xff]  ;;  %s6107_s28 = scalar_lea.hbm %s6106_s25, 2  ;;  %p6112_p6 = scmp.lt.s32.totalorder %s6106_s25, %s7906_s10 }
  0x5b   : > { %2059 = vmatpush.bf16.msra.mxu0 %v5675_v4  ;;  %5718 = vmatpush.bf16.msra.mxu3 %v5675_v4  ;;  %v5689_v12 = vld [vmem:[%s7897_s1 + $0xa0] sm:$0xff]  ;;  %v5688_v15 = vld [vmem:[%s7897_s1 + $0x98] sm:$0xff]  ;;  %v5679_v17 = vld [vmem:[%s7897_s1 + $0x50] sm:$0xff]  ;;  %p6108_p3 = scmp.ne.s32.totalorder %s6106_s25, %s6107_s28  ;;  %p6113_p7 = scmp.lt.s32.totalorder %s6111_s12, %s6107_s28 }
  0x5c   : > { %2228 = vmatpush.bf16.msra.mxu1 %v6427_v5  ;;  %v5687_v18 = vld [vmem:[%s7897_s1 + $0x90] sm:$0xff]  ;;  %v5670_v19 = vld [vmem:[%s7897_s1 + $0x8] sm:$0xff]  ;;  %v5669_v22 = vld [vmem:[%s7897_s1] sm:$0xff] }
  0x5d   : > { %2397 = vmatpush.bf16.msra.mxu2 %v5691_v6  ;;  %v5678_v20 = vld [vmem:[%s7897_s1 + $0x48] sm:$0xff]  ;;  %v5677_v23 = vld [vmem:[%s7897_s1 + $0x40] sm:$0xff]  ;;  %v5480_v26 = vld [vmem:[%s6387_s21 + $0x14] sm:$0xf0]  ;;  %p6109_p4 = pnand %p6108_p3, %p6301_p11  ;;  %p6114_p8 = por %p6113_p7, %p6112_p6 }
  0x5e   : > { %v5686_v21 = vld [vmem:[%s7897_s1 + $0x88] sm:$0xff]  ;;  %v5685_v24 = vld [vmem:[%s7897_s1 + $0x80] sm:$0xff]  ;;  %v5660_v28 = vld [vmem:[%s6387_s21 + $0x5b4] sm:$0xf0] }
  0x5f   : > { %2060 = vmatpush.bf16.msra.mxu0 %v5674_v7  ;;  %5719 = vmatpush.bf16.msra.mxu3 %v5674_v7  ;;  %v4383_v25 = vld [vmem:[%s6387_s21] sm:$0xf]  ;;  %v5477_v29 = vld [vmem:[%s6387_s21 + $0x4] sm:$0xf]  ;;  %v4385_v30 = vld [vmem:[%s6387_s21 + $0x18] sm:$0xf0]  ;;  %p6110_p5 = pneg %p6109_p4 }
  0x60   : > { %2229 = vmatpush.bf16.msra.mxu1 %v5682_v8  ;;  %v5103_v27 = vld [vmem:[%s6387_s21 + $0x5a0] sm:$0xf]  ;;  %v4391_v31 = vld [vmem:[%s6387_s21 + $0x8] sm:$0xf]  ;;  %v4384_v33 = vor.u32 %v5480_v26, %v4383_v25  ;;  %v4388_v35 = vor.u32 %v5477_v29, %v4385_v30  ;;  %v4407_v37 = vld [vmem:[%s6387_s21 + $0x30] sm:$0xf] }
  0x61   : > { %2398 = vmatpush.bf16.msra.mxu2 %v5690_v9  ;;  %v5481_v32 = vld [vmem:[%s6387_s21 + $0x1c] sm:$0xf0]  ;;  %v5104_v34 = vor.u32 %v5660_v28, %v5103_v27  ;;  %v5486_v38 = vld [vmem:[%s6387_s21 + $0x44] sm:$0xf0]  ;;  %v5127_v39 = vld [vmem:[%s6387_s21 + $0x5d0] sm:$0xf]  ;;  %p6115_p9 = pnand %p6114_p8, %p6110_p5 }
  0x62   : > { %v4392_v36 = vor.u32 %v5481_v32, %v4391_v31  ;;  %v5666_v40 = vld [vmem:[%s6387_s21 + $0x5e4] sm:$0xf0]  ;;  %v5483_v41 = vld [vmem:[%s6387_s21 + $0x34] sm:$0xf]  ;;  %v4409_v42 = vld [vmem:[%s6387_s21 + $0x48] sm:$0xf0]  ;;  %v4408_v45 = vor.u32 %v5486_v38, %v4407_v37 }
  0x63   : > { %2061 = vmatpush.bf16.msra.mxu0 %v5673_v10  ;;  %5720 = vmatpush.bf16.msra.mxu3 %v5673_v10  ;;  %v4415_v43 = vld [vmem:[%s6387_s21 + $0x38] sm:$0xf]  ;;  %v5487_v44 = vld [vmem:[%s6387_s21 + $0x4c] sm:$0xf0]  ;;  %v5128_v46 = vor.u32 %v5666_v40, %v5127_v39  ;;  %v4412_v47 = vor.u32 %v5483_v41, %v4409_v42  ;;  %v4431_v49 = vld [vmem:[%s6387_s21 + $0x60] sm:$0xf] }
  0x64   : > { %2230 = vmatpush.bf16.msra.mxu1 %v5681_v11  ;;  %v4416_v48 = vor.u32 %v5487_v44, %v4415_v43  ;;  %v5492_v50 = vld [vmem:[%s6387_s21 + $0x74] sm:$0xf0]  ;;  %v5489_v52 = vld [vmem:[%s6387_s21 + $0x64] sm:$0xf]  ;;  %v5105_v54 = vld [vmem:[%s6387_s21 + $0x5b8] sm:$0xf0] }
  0x65   : > { %2399 = vmatpush.bf16.msra.mxu2 %v5689_v12  ;;  %v5700_v51 = vld [vmem:[%s7897_s1 + $0xf8] sm:$0xff]  ;;  %v5657_v53 = vld [vmem:[%s6387_s21 + $0x5a4] sm:$0xf]  ;;  %v4439_v56 = vld [vmem:[%s6387_s21 + $0x68] sm:$0xf]  ;;  %v4432_v58 = vor.u32 %v5492_v50, %v4431_v49 }
  0x66   : > { %v4433_v55 = vld [vmem:[%s6387_s21 + $0x78] sm:$0xf0]  ;;  %v5493_v57 = vld [vmem:[%s6387_s21 + $0x7c] sm:$0xf0]  ;;  %v5108_v59 = vor.u32 %v5657_v53, %v5105_v54  ;;  %v5699_v62 = vld [vmem:[%s7897_s1 + $0xf0] sm:$0xff] }
  0x67   : > { %2062 = vmatpush.bf16.msra.mxu0 %v5672_v13  ;;  %5721 = vmatpush.bf16.msra.mxu3 %v5672_v13  ;;  %v4436_v60 = vor.u32 %v5489_v52, %v4433_v55  ;;  %v4440_v61 = vor.u32 %v5493_v57, %v4439_v56  ;;  %v5708_v63 = vld [vmem:[%s7897_s1 + $0x138] sm:$0xff]  ;;  %v5698_v1 = vld [vmem:[%s7897_s1 + $0xe8] sm:$0xff]  ;;  %v4455_v3 = vld [vmem:[%s6387_s21 + $0x90] sm:$0xf] }
  0x68   : > { %2231 = vmatpush.bf16.msra.mxu1 %v5680_v14  ;;  %v5716_v0 = vld [vmem:[%s7897_s1 + $0x178] sm:$0xff]  ;;  %v5498_v4 = vld [vmem:[%s6387_s21 + $0xa4] sm:$0xf0]  ;;  %v4457_v6 = vld [vmem:[%s6387_s21 + $0xa8] sm:$0xf0] }
  0x69   : > { %2400 = vmatpush.bf16.msra.mxu2 %v5688_v15  ;;  %v5663_v7 = vld [vmem:[%s6387_s21 + $0x5d4] sm:$0xf]  ;;  %v4463_v9 = vld [vmem:[%s6387_s21 + $0x98] sm:$0xf]  ;;  %v5499_v10 = vld [vmem:[%s6387_s21 + $0xac] sm:$0xf0]  ;;  %v4456_v12 = vor.u32 %v5498_v4, %v4455_v3 }
  0x6a   : > { %v4464_v15 = vor.u32 %v5499_v10, %v4463_v9  ;;  %v4487_v25 = vld [vmem:[%s6387_s21 + $0xc8] sm:$0xf]  ;;  %v5505_v26 = vld [vmem:[%s6387_s21 + $0xdc] sm:$0xf0]  ;;  %v4503_v31 = vld [vmem:[%s6387_s21 + $0xf0] sm:$0xf] }
  0x6b   : > { %2063 = vmatpush.bf16.msra.mxu0 %v5671_v16  ;;  %5722 = vmatpush.bf16.msra.mxu3 %v5671_v16  ;;  %v5695_v16 = vld [vmem:[%s7897_s1 + $0xd0] sm:$0xff]  ;;  %v4488_v30 = vor.u32 %v5505_v26, %v4487_v25  ;;  %v5510_v32 = vld [vmem:[%s6387_s21 + $0x104] sm:$0xf0]  ;;  %v4511_v37 = vld [vmem:[%s6387_s21 + $0xf8] sm:$0xf] }
  0x6c   : > { %2232 = vmatpush.bf16.msra.mxu1 %v5679_v17  ;;  %v5511_v38 = vld [vmem:[%s6387_s21 + $0x10c] sm:$0xf0]  ;;  %v4504_v39 = vor.u32 %v5510_v32, %v4503_v31  ;;  %v4527_v43 = vld [vmem:[%s6387_s21 + $0x120] sm:$0xf]  ;;  %v5516_v44 = vld [vmem:[%s6387_s21 + $0x134] sm:$0xf0] }
  0x6d   : > { %2401 = vmatpush.bf16.msra.mxu2 %v5687_v18  ;;  %v5693_v18 = vld [vmem:[%s7897_s1 + $0xc0] sm:$0xff]  ;;  %v4512_v42 = vor.u32 %v5511_v38, %v4511_v37  ;;  %v4535_v49 = vld [vmem:[%s6387_s21 + $0x128] sm:$0xf]  ;;  %v4551_v55 = vld [vmem:[%s6387_s21 + $0x150] sm:$0xf] }
  0x6e   : > { %v5517_v50 = vld [vmem:[%s6387_s21 + $0x13c] sm:$0xf0]  ;;  %v5522_v56 = vld [vmem:[%s6387_s21 + $0x164] sm:$0xf0]  ;;  %v5707_v57 = vld [vmem:[%s7897_s1 + $0x130] sm:$0xff] }
  0x6f   : > { %2064 = vmatpush.bf16.msra.mxu0 %v5670_v19  ;;  %5723 = vmatpush.bf16.msra.mxu3 %v5670_v19  ;;  %v4479_v19 = vld [vmem:[%s6387_s21 + $0xc0] sm:$0xf]  ;;  %v4536_v54 = vor.u32 %v5517_v50, %v4535_v49  ;;  %v5502_v9 = vld [vmem:[%s6387_s21 + $0xcc] sm:$0xf]  ;;  %v4489_v10 = vld [vmem:[%s6387_s21 + $0xe0] sm:$0xf0] }
  0x70   : > { %2233 = vmatpush.bf16.msra.mxu1 %v5678_v20  ;;  %v5531_v31 = vld [vmem:[%s6387_s21 + $0x1b4] sm:$0xf]  ;;  %v5508_v32 = vld [vmem:[%s6387_s21 + $0xfc] sm:$0xf] }
  0x71   : > { %2402 = vmatpush.bf16.msra.mxu2 %v5686_v21  ;;  %v5501_v21 = vld [vmem:[%s6387_s21 + $0xc4] sm:$0xf] }
  0x73   : > { %2065 = vmatpush.bf16.msra.mxu0 %v5669_v22  ;;  %5724 = vmatpush.bf16.msra.mxu3 %v5669_v22  ;;  %v5478_v22 = vld [vmem:[%s6387_s21 + $0xc] sm:$0xf] }
  0x74   : > { %2234 = vmatpush.bf16.msra.mxu1 %v5677_v23 }
  0x75   : > { %2403 = vmatpush.bf16.msra.mxu2 %v5685_v24  ;;  %v4481_v24 = vld [vmem:[%s6387_s21 + $0xd8] sm:$0xf0] }
  0x76   : > { %2066 = vmatmul.bf16.vlgmr.msra.gmra.mxu0 %v4384_v33  ;;  %2216 = vmatmul.bf16.vlgmr.msra.gmra.mxu3 %v5104_v34  ;;  %v4484_v29 = vor.u32 %v5501_v21, %v4481_v24  ;;  %v5507_v33 = vld [vmem:[%s6387_s21 + $0xf4] sm:$0xf]  ;;  %v5484_v34 = vld [vmem:[%s6387_s21 + $0x3c] sm:$0xf] }
  0x77   : > { %5725 = vmatpush.bf16.msrb.mxu3 %v6415_v2  ;;  %2235 = vmatmul.bf16.vlgmr.msra.gmra.mxu1 %v4388_v35  ;;  %v5697_v2 = vld [vmem:[%s7897_s1 + $0xe0] sm:$0xff]  ;;  %v4417_v35 = vld [vmem:[%s6387_s21 + $0x50] sm:$0xf0] }
  0x78   : > { %2404 = vmatmul.bf16.vlgmr.msra.gmra.mxu2 %v4392_v36  ;;  %2734 = vmatpush.bf16.msrb.mxu0 %v5708_v63  ;;  %v4505_v36 = vld [vmem:[%s6387_s21 + $0x108] sm:$0xf0]  ;;  %v4420_v40 = vor.u32 %v5484_v34, %v4417_v35  ;;  %v4559_v63 = vld [vmem:[%s6387_s21 + $0x158] sm:$0xf] }
  0x79   : > { %2903 = vmatpush.bf16.msrb.mxu1 %v5716_v0  ;;  %v4508_v41 = vor.u32 %v5507_v33, %v4505_v36  ;;  %v5523_v0 = vld [vmem:[%s6387_s21 + $0x16c] sm:$0xf0]  ;;  %v4513_v33 = vld [vmem:[%s6387_s21 + $0x110] sm:$0xf0]  ;;  %v4601_v34 = vld [vmem:[%s6387_s21 + $0x1c8] sm:$0xf0] }
  0x7a   : > { %v4560_v4 = vor.u32 %v5523_v0, %v4559_v63  ;;  %v4607_v35 = vld [vmem:[%s6387_s21 + $0x1b8] sm:$0xf]  ;;  %v5535_v36 = vld [vmem:[%s6387_s21 + $0x1cc] sm:$0xf0] }
  0x7b   : > { %5726 = vmatpush.bf16.msrb.mxu3 %v6427_v5  ;;  %v5495_v5 = vld [vmem:[%s6387_s21 + $0x94] sm:$0xf] }
  0x7c   : > { %2735 = vmatpush.bf16.msrb.mxu0 %v5707_v57  ;;  %v5537_v57 = vld [vmem:[%s6387_s21 + $0x1e4] sm:$0xf] }
  0x7f   : > { %5727 = vmatpush.bf16.msrb.mxu3 %v5682_v8  ;;  %v5129_v8 = vld [vmem:[%s6387_s21 + $0x5e8] sm:$0xf0] }
  0x80   : > { %v5132_v13 = vor.u32 %v5663_v7, %v5129_v8  ;;  %v5528_v7 = vld [vmem:[%s6387_s21 + $0x194] sm:$0xf0]  ;;  %v5525_v8 = vld [vmem:[%s6387_s21 + $0x184] sm:$0xf] }
  0x83   : > { %5728 = vmatpush.bf16.msrb.mxu3 %v5681_v11  ;;  %v5696_v11 = vld [vmem:[%s7897_s1 + $0xd8] sm:$0xff] }
  0x86   : > { %2071 = vmatmul.bf16.gmra.mxu0 %v4408_v45  ;;  %2221 = vmatmul.bf16.gmra.mxu3 %v5128_v46  ;;  %v5513_v45 = vld [vmem:[%s6387_s21 + $0x124] sm:$0xf]  ;;  %v5490_v46 = vld [vmem:[%s6387_s21 + $0x6c] sm:$0xf] }
  0x87   : > { %5729 = vmatpush.bf16.msrb.mxu3 %v5680_v14  ;;  %2240 = vmatmul.bf16.gmra.mxu1 %v4412_v47  ;;  %v4460_v14 = vor.u32 %v5495_v5, %v4457_v6  ;;  %v4441_v47 = vld [vmem:[%s6387_s21 + $0x80] sm:$0xf0]  ;;  %v6589_v5 = vld [vmem:[#allocation6] ss:$0 sm:$0xff] }
  0x88   : > { %2409 = vmatmul.bf16.gmra.mxu2 %v4416_v48  ;;  %v4529_v48 = vld [vmem:[%s6387_s21 + $0x138] sm:$0xf0]  ;;  %v4444_v52 = vor.u32 %v5490_v46, %v4441_v47  ;;  %v4575_v6 = vld [vmem:[%s6387_s21 + $0x180] sm:$0xf] }
  0x89   : > { %v4532_v53 = vor.u32 %v5513_v45, %v4529_v48 }
  0x8b   : > { %5730 = vmatpush.bf16.msrb.mxu3 %v5679_v17  ;;  %v5694_v17 = vld [vmem:[%s7897_s1 + $0xc8] sm:$0xff] }
  0x8f   : > { %5731 = vmatpush.bf16.msrb.mxu3 %v5678_v20  ;;  %v5504_v20 = vld [vmem:[%s6387_s21 + $0xd4] sm:$0xf0] }
  0x90   : > { %v4480_v27 = vor.u32 %v5504_v20, %v4479_v19 }
  0x93   : > { %5732 = vmatpush.bf16.msrb.mxu3 %v5677_v23  ;;  %v4393_v23 = vld [vmem:[%s6387_s21 + $0x20] sm:$0xf0] }
  0x94   : > { %v4396_v28 = vor.u32 %v5478_v22, %v4393_v23 }
  0x96   : > { %2076 = vmatmul.bf16.gmra.mxu0 %v4432_v58  ;;  %2385 = vmatmul.bf16.vlgmr.msrb.gmra.mxu3 %v5108_v59  ;;  %v5715_v58 = vld [vmem:[%s7897_s1 + $0x170] sm:$0xff] }
  0x97   : > { %2565 = vmatpush.bf16.msra.mxu3 %v5700_v51  ;;  %2245 = vmatmul.bf16.gmra.mxu1 %v4436_v60  ;;  %v4528_v51 = vor.u32 %v5516_v44, %v4527_v43  ;;  %v5519_v59 = vld [vmem:[%s6387_s21 + $0x154] sm:$0xf]  ;;  %v5496_v60 = vld [vmem:[%s6387_s21 + $0x9c] sm:$0xf]  ;;  %v4604_v43 = vor.u32 %v5531_v31, %v4601_v34  ;;  %v4608_v44 = vor.u32 %v5535_v36, %v4607_v35  ;;  %v5547_v31 = vld [vmem:[%s6387_s21 + $0x22c] sm:$0xf0] }
  0x98   : > { %2414 = vmatmul.bf16.gmra.mxu2 %v4440_v61  ;;  %v4465_v61 = vld [vmem:[%s6387_s21 + $0xb0] sm:$0xf0]  ;;  %2904 = vmatpush.bf16.msrb.mxu1 %v5715_v58  ;;  %v5514_v58 = vld [vmem:[%s6387_s21 + $0x12c] sm:$0xf] }
  0x9b   : > { %2566 = vmatpush.bf16.msra.mxu3 %v5699_v62  ;;  %v4553_v62 = vld [vmem:[%s6387_s21 + $0x168] sm:$0xf0] }
  0x9c   : > { %v4556_v3 = vor.u32 %v5519_v59, %v4553_v62  ;;  %v4537_v59 = vld [vmem:[%s6387_s21 + $0x140] sm:$0xf0]  ;;  %v5541_v62 = vld [vmem:[%s6387_s21 + $0x1fc] sm:$0xf0] }
  0x9f   : > { %2567 = vmatpush.bf16.msra.mxu3 %v5698_v1  ;;  %v4552_v1 = vor.u32 %v5522_v56, %v4551_v55  ;;  %v4623_v55 = vld [vmem:[%s6387_s21 + $0x1e0] sm:$0xf]  ;;  %v5540_v56 = vld [vmem:[%s6387_s21 + $0x1f4] sm:$0xf0] }
  0xa3   : > { %2568 = vmatpush.bf16.msra.mxu3 %v5697_v2  ;;  %v4468_v2 = vor.u32 %v5496_v60, %v4465_v61  ;;  %v4625_v60 = vld [vmem:[%s6387_s21 + $0x1f8] sm:$0xf0]  ;;  %v4631_v61 = vld [vmem:[%s6387_s21 + $0x1e8] sm:$0xf] }
  0xa6   : > { %2081 = vmatmul.bf16.gmra.mxu0 %v4456_v12  ;;  %2390 = vmatmul.bf16.gmra.mxu3 %v5132_v13  ;;  %v4583_v12 = vld [vmem:[%s6387_s21 + $0x188] sm:$0xf]  ;;  %v5529_v13 = vld [vmem:[%s6387_s21 + $0x19c] sm:$0xf0] }
  0xa7   : > { %2569 = vmatpush.bf16.msra.mxu3 %v5696_v11  ;;  %2250 = vmatmul.bf16.gmra.mxu1 %v4460_v14  ;;  %v4577_v11 = vld [vmem:[%s6387_s21 + $0x198] sm:$0xf0]  ;;  %v4576_v14 = vor.u32 %v5528_v7, %v4575_v6  ;;  %v4628_v6 = vor.u32 %v5537_v57, %v4625_v60  ;;  %v4632_v7 = vor.u32 %v5541_v62, %v4631_v61  ;;  %v5552_v57 = vld [vmem:[%s6387_s21 + $0x254] sm:$0xf0]  ;;  %v4585_v60 = vld [vmem:[%s6387_s21 + $0x1a0] sm:$0xf0] }
  0xa8   : > { %2419 = vmatmul.bf16.gmra.mxu2 %v4464_v15  ;;  %v4492_v15 = vor.u32 %v5502_v9, %v4489_v10  ;;  %v4673_v61 = vld [vmem:[%s6387_s21 + $0x258] sm:$0xf0]  ;;  %v4679_v62 = vld [vmem:[%s6387_s21 + $0x248] sm:$0xf] }
  0xab   : > { %2570 = vmatpush.bf16.msra.mxu3 %v5695_v16 }
  0xaf   : > { %2571 = vmatpush.bf16.msra.mxu3 %v5694_v17  ;;  %v4580_v17 = vor.u32 %v5525_v8, %v4577_v11 }
  0xb3   : > { %2572 = vmatpush.bf16.msra.mxu3 %v5693_v18  ;;  %v4584_v18 = vor.u32 %v5529_v13, %v4583_v12  ;;  %v5706_v12 = vld [vmem:[%s7897_s1 + $0x128] sm:$0xff] }
  0xb4   : > { %2736 = vmatpush.bf16.msrb.mxu0 %v5706_v12 }
  0xb6   : > { %2086 = vmatmul.bf16.gmra.mxu0 %v4480_v27  ;;  %2573 = vmatmul.bf16.vlgmr.msra.gmra.mxu3 %v4396_v28 }
  0xb7   : > { %2255 = vmatmul.bf16.gmra.mxu1 %v4484_v29  ;;  %v4599_v29 = vld [vmem:[%s6387_s21 + $0x1b0] sm:$0xf] }
  0xb8   : > { %2424 = vmatmul.bf16.gmra.mxu2 %v4488_v30  ;;  %v5534_v30 = vld [vmem:[%s6387_s21 + $0x1c4] sm:$0xf0] }
  0xc6   : > { %2091 = vmatmul.bf16.gmra.mxu0 %v4504_v39  ;;  %2578 = vmatmul.bf16.gmra.mxu3 %v4420_v40  ;;  %v4600_v39 = vor.u32 %v5534_v30, %v4599_v29  ;;  %v4516_v40 = vor.u32 %v5508_v32, %v4513_v33  ;;  %v4649_v29 = vld [vmem:[%s6387_s21 + $0x228] sm:$0xf0]  ;;  %v4655_v30 = vld [vmem:[%s6387_s21 + $0x218] sm:$0xf] }
  0xc7   : > { %2260 = vmatmul.bf16.gmra.mxu1 %v4508_v41 }
  0xc8   : > { %2429 = vmatmul.bf16.gmra.mxu2 %v4512_v42 }
  0xd6   : > { %2096 = vmatmul.bf16.gmra.mxu0 %v4528_v51  ;;  %2583 = vmatmul.bf16.gmra.mxu3 %v4444_v52 }
  0xd7   : > { %2265 = vmatmul.bf16.gmra.mxu1 %v4532_v53 }
  0xd8   : > { %2434 = vmatmul.bf16.gmra.mxu2 %v4536_v54 }
  0xe6   : > { %2101 = vmatmul.bf16.gmra.mxu0 %v4552_v1  ;;  %2588 = vmatmul.bf16.gmra.mxu3 %v4468_v2  ;;  %v4624_v1 = vor.u32 %v5540_v56, %v4623_v55  ;;  %v4540_v2 = vor.u32 %v5514_v58, %v4537_v59  ;;  %v4671_v56 = vld [vmem:[%s6387_s21 + $0x240] sm:$0xf]  ;;  %v5549_v58 = vld [vmem:[%s6387_s21 + $0x244] sm:$0xf]  ;;  %v5526_v59 = vld [vmem:[%s6387_s21 + $0x18c] sm:$0xf] }
  0xe7   : > { %2270 = vmatmul.bf16.gmra.mxu1 %v4556_v3 }
  0xe8   : > { %2439 = vmatmul.bf16.gmra.mxu2 %v4560_v4 }
  0xf3   : > { %v2067_v16 = vpop.f32.mrf.mxu0 }
  0xf4   : > { %v2068_v19 = vadd.f32 %v6589_v5, %v2067_v16  ;;  %v2236_v20 = vpop.f32.mrf.mxu1 }
  0xf6   : > { %v2237_v21 = vadd.f32 %v2236_v20, %v2068_v19  ;;  %2106 = vmatmul.bf16.gmra.mxu0 %v4576_v14  ;;  %2593 = vmatmul.bf16.gmra.mxu3 %v4492_v15 }
  0xf7   : > { %2275 = vmatmul.bf16.gmra.mxu1 %v4580_v17 }
  0xf8   : > { %2444 = vmatmul.bf16.gmra.mxu2 %v4584_v18  ;;  %v5714_v18 = vld [vmem:[%s7897_s1 + $0x168] sm:$0xff] }
  0xf9   : > { %v2217_v22 = vpop.f32.mrf.mxu3  ;;  %2905 = vmatpush.bf16.msrb.mxu1 %v5714_v18 }
  0xfa   : > { %v2218_v10 = vadd.f32 %v6589_v5, %v2217_v22 }
  0xfb   : > { %v2405_v23 = vpop.f32.mrf.mxu2  ;;  %v2069_v25 = vpop.f32.mrf.mxu0 }
  0xfc   : > { %v6600_v24 = vadd.f32 %v2405_v23, %v2237_v21  ;;  %v2070_v26 = vadd.f32 %v6589_v5, %v2069_v25  ;;  %v2238_v27 = vpop.f32.mrf.mxu1  ;;  %v4647_v23 = vld [vmem:[%s6387_s21 + $0x210] sm:$0xf]  ;;  %v5546_v25 = vld [vmem:[%s6387_s21 + $0x224] sm:$0xf0] }
  0xfd   : > { %v4648_v35 = vor.u32 %v5546_v25, %v4647_v23  ;;  %v4695_v25 = vld [vmem:[%s6387_s21 + $0x270] sm:$0xf] }
  0xfe   : > { %v2239_v28 = vadd.f32 %v2238_v27, %v2070_v26  ;;  %v5543_v26 = vld [vmem:[%s6387_s21 + $0x214] sm:$0xf]  ;;  %v5520_v27 = vld [vmem:[%s6387_s21 + $0x15c] sm:$0xf] }
 0x101   : > { %v2219_v37 = vpop.f32.mrf.mxu3 }
 0x102   : > { %v2220_v21 = vadd.f32 %v6589_v5, %v2219_v37  ;;  %v4656_v37 = vor.u32 %v5547_v31, %v4655_v30  ;;  %v4697_v30 = vld [vmem:[%s6387_s21 + $0x288] sm:$0xf0]  ;;  %v4703_v31 = vld [vmem:[%s6387_s21 + $0x278] sm:$0xf] }
 0x103   : > { %v2407_v38 = vpop.f32.mrf.mxu2  ;;  %v2072_v42 = vpop.f32.mrf.mxu0 }
 0x104   : > { %v6611_v41 = vadd.f32 %v2407_v38, %v2239_v28  ;;  %v2073_v45 = vadd.f32 %v6589_v5, %v2072_v42  ;;  %v2241_v46 = vpop.f32.mrf.mxu1  ;;  %v4561_v28 = vld [vmem:[%s6387_s21 + $0x170] sm:$0xf0] }
 0x105   : > { %v4564_v36 = vor.u32 %v5520_v27, %v4561_v28  ;;  %v5555_v27 = vld [vmem:[%s6387_s21 + $0x274] sm:$0xf]  ;;  %v5532_v28 = vld [vmem:[%s6387_s21 + $0x1bc] sm:$0xf] }
 0x106   : > { %v2242_v47 = vadd.f32 %v2241_v46, %v2073_v45  ;;  %2111 = vmatmul.bf16.gmra.mxu0 %v4600_v39  ;;  %2598 = vmatmul.bf16.gmra.mxu3 %v4516_v40  ;;  %v4652_v40 = vor.u32 %v5543_v26, %v4649_v29  ;;  %v5558_v26 = vld [vmem:[%s6387_s21 + $0x284] sm:$0xf0]  ;;  %v4609_v29 = vld [vmem:[%s6387_s21 + $0x1d0] sm:$0xf0] }
 0x107   : > { %2280 = vmatmul.bf16.gmra.mxu1 %v4604_v43 }
 0x108   : > { %2449 = vmatmul.bf16.gmra.mxu2 %v4608_v44 }
 0x109   : > { %v6614_v48 = vpop.f32.mrf.mxu3 }
 0x10a   : > { %v2223_v44 = vadd.f32 %v6589_v5, %v6614_v48 }
 0x10b   : > { %v2410_v49 = vpop.f32.mrf.mxu2  ;;  %v2074_v51 = vpop.f32.mrf.mxu0 }
 0x10c   : > { %v6616_v50 = vadd.f32 %v2410_v49, %v2242_v47  ;;  %v2075_v52 = vadd.f32 %v6589_v5, %v2074_v51  ;;  %v2243_v53 = vpop.f32.mrf.mxu1 }
 0x10e   : > { %v2244_v54 = vadd.f32 %v2243_v53, %v2075_v52 }
 0x111   : > { %v2224_v63 = vpop.f32.mrf.mxu3 }
 0x113   : > { %v2412_v0 = vpop.f32.mrf.mxu2  ;;  %v2077_v4 = vpop.f32.mrf.mxu0 }
 0x114   : > { %v6627_v3 = vadd.f32 %v2412_v0, %v2244_v54  ;;  %v2078_v8 = vadd.f32 %v6589_v5, %v2077_v4  ;;  %v2246_v9 = vpop.f32.mrf.mxu1  ;;  %v2225_v54 = vadd.f32 %v6589_v5, %v2224_v63  ;;  %v5553_v0 = vld [vmem:[%s6387_s21 + $0x25c] sm:$0xf0] }
 0x115   : > { %v4680_v63 = vor.u32 %v5553_v0, %v4679_v62  ;;  %v4721_v62 = vld [vmem:[%s6387_s21 + $0x2b8] sm:$0xf0]  ;;  %v4727_v0 = vld [vmem:[%s6387_s21 + $0x2a8] sm:$0xf] }
 0x116   : > { %v2247_v11 = vadd.f32 %v2246_v9, %v2078_v8  ;;  %2116 = vmatmul.bf16.gmra.mxu0 %v4624_v1  ;;  %2603 = vmatmul.bf16.gmra.mxu3 %v4540_v2 }
 0x117   : > { %2285 = vmatmul.bf16.gmra.mxu1 %v4628_v6  ;;  %v4672_v6 = vor.u32 %v5552_v57, %v4671_v56  ;;  %v4719_v57 = vld [vmem:[%s6387_s21 + $0x2a0] sm:$0xf] }
 0x118   : > { %2454 = vmatmul.bf16.gmra.mxu2 %v4632_v7  ;;  %v4588_v7 = vor.u32 %v5526_v59, %v4585_v60  ;;  %v5561_v59 = vld [vmem:[%s6387_s21 + $0x2a4] sm:$0xf]  ;;  %v5538_v60 = vld [vmem:[%s6387_s21 + $0x1ec] sm:$0xf] }
 0x119   : > { %v2386_v13 = vpop.f32.mrf.mxu3 }
 0x11a   : > { %v6634_v14 = vadd.f32 %v2386_v13, %v2218_v10  ;;  %v4676_v10 = vor.u32 %v5549_v58, %v4673_v61  ;;  %v5564_v58 = vld [vmem:[%s6387_s21 + $0x2b4] sm:$0xf0]  ;;  %v4633_v61 = vld [vmem:[%s6387_s21 + $0x200] sm:$0xf0] }
 0x11b   : > { %v2415_v15 = vpop.f32.mrf.mxu2  ;;  %v2079_v17 = vpop.f32.mrf.mxu0 }
 0x11c   : > { %7927 = vst [vmem:[#allocation31_spill] sm:$0xff] %v6634_v14  ;;  %v6636_v16 = vadd.f32 %v2415_v15, %v2247_v11  ;;  %v2080_v19 = vadd.f32 %v6589_v5, %v2079_v17  ;;  %v2248_v20 = vpop.f32.mrf.mxu1 }
 0x11e   : > { %v2249_v22 = vadd.f32 %v2248_v20, %v2080_v19 }
 0x121   : > { %v2388_v32 = vpop.f32.mrf.mxu3 }
 0x122   : > { %v6651_v33 = vadd.f32 %v2388_v32, %v2220_v21  ;;  %v5559_v32 = vld [vmem:[%s6387_s21 + $0x28c] sm:$0xf0] }
 0x123   : > { %v2417_v34 = vpop.f32.mrf.mxu2  ;;  %v2082_v39 = vpop.f32.mrf.mxu0 }
 0x124   : > { %7928 = vst [vmem:[#allocation32_spill] sm:$0xff] %v6651_v33  ;;  %v6653_v38 = vadd.f32 %v2417_v34, %v2249_v22  ;;  %v2083_v42 = vadd.f32 %v6589_v5, %v2082_v39  ;;  %v2251_v43 = vpop.f32.mrf.mxu1  ;;  %v4612_v39 = vor.u32 %v5532_v28, %v4609_v29 }
 0x126   : > { %v2252_v45 = vadd.f32 %v2251_v43, %v2083_v42  ;;  %2121 = vmatmul.bf16.gmra.mxu0 %v4648_v35  ;;  %2608 = vmatmul.bf16.gmra.mxu3 %v4564_v36  ;;  %v4696_v36 = vor.u32 %v5558_v26, %v4695_v25  ;;  %v4700_v42 = vor.u32 %v5555_v27, %v4697_v30  ;;  %v4743_v30 = vld [vmem:[%s6387_s21 + $0x2d0] sm:$0xf] }
 0x127   : > { %2290 = vmatmul.bf16.gmra.mxu1 %v4652_v40  ;;  %v4704_v43 = vor.u32 %v5559_v32, %v4703_v31  ;;  %v5570_v31 = vld [vmem:[%s6387_s21 + $0x2e4] sm:$0xf0]  ;;  %v5567_v32 = vld [vmem:[%s6387_s21 + $0x2d4] sm:$0xf] }
 0x128   : > { %2459 = vmatmul.bf16.gmra.mxu2 %v4656_v37 }
 0x129   : > { %v2391_v46 = vpop.f32.mrf.mxu3 }
 0x12a   : > { %v6658_v47 = vadd.f32 %v2391_v46, %v2223_v44 }
 0x12b   : > { %v2420_v49 = vpop.f32.mrf.mxu2  ;;  %v2084_v52 = vpop.f32.mrf.mxu0 }
 0x12c   : > { %7929 = vst [vmem:[#allocation33_spill] sm:$0xff] %v6658_v47  ;;  %v6660_v51 = vadd.f32 %v2420_v49, %v2252_v45  ;;  %v2085_v48 = vadd.f32 %v6589_v5, %v2084_v52  ;;  %v2253_v53 = vpop.f32.mrf.mxu1 }
 0x12e   : > { %v2254_v55 = vadd.f32 %v2253_v53, %v2085_v48 }
 0x131   : > { %v2393_v1 = vpop.f32.mrf.mxu3 }
 0x132   : > { %v6672_v2 = vadd.f32 %v2393_v1, %v2225_v54  ;;  %v5565_v1 = vld [vmem:[%s6387_s21 + $0x2bc] sm:$0xf0] }
 0x133   : > { %v2422_v4 = vpop.f32.mrf.mxu2  ;;  %v2087_v9 = vpop.f32.mrf.mxu0 }
 0x134   : > { %7930 = vst [vmem:[#allocation34_spill] sm:$0xff] %v6672_v2  ;;  %v6674_v8 = vadd.f32 %v2422_v4, %v2254_v55  ;;  %v2088_v11 = vadd.f32 %v6589_v5, %v2087_v9  ;;  %v2256_v12 = vpop.f32.mrf.mxu1  ;;  %v4636_v9 = vor.u32 %v5538_v60, %v4633_v61 }
 0x136   : > { %v2257_v13 = vadd.f32 %v2256_v12, %v2088_v11  ;;  %2126 = vmatmul.bf16.gmra.mxu0 %v4672_v6  ;;  %2613 = vmatmul.bf16.gmra.mxu3 %v4588_v7  ;;  %v4720_v7 = vor.u32 %v5564_v58, %v4719_v57  ;;  %v4724_v11 = vor.u32 %v5561_v59, %v4721_v62 }
 0x137   : > { %2295 = vmatmul.bf16.gmra.mxu1 %v4676_v10  ;;  %v4728_v12 = vor.u32 %v5565_v1, %v4727_v0  ;;  %v4767_v1 = vld [vmem:[%s6387_s21 + $0x300] sm:$0xf] }
 0x138   : > { %2464 = vmatmul.bf16.gmra.mxu2 %v4680_v63 }
 0x139   : > { %v2574_v15 = vpop.f32.mrf.mxu3 }
 0x13a   : > { %v6678_v18 = vadd.f32 %v2574_v15, %v6600_v24 }
 0x13b   : > { %v2425_v17 = vpop.f32.mrf.mxu2  ;;  %v2089_v20 = vpop.f32.mrf.mxu0 }
 0x13c   : > { %v6680_v19 = vadd.f32 %v2425_v17, %v2257_v13  ;;  %v2090_v21 = vadd.f32 %v6589_v5, %v2089_v20  ;;  %v2258_v22 = vpop.f32.mrf.mxu1  ;;  %v5713_v20 = vld [vmem:[%s7897_s1 + $0x160] sm:$0xff] }
 0x13d   : > { %2906 = vmatpush.bf16.msrb.mxu1 %v5713_v20 }
 0x13e   : > { %v2259_v23 = vadd.f32 %v2258_v22, %v2090_v21 }
 0x141   : > { %v2576_v34 = vpop.f32.mrf.mxu3 }
 0x142   : > { %v6692_v24 = vadd.f32 %v2576_v34, %v6611_v41  ;;  %v5544_v34 = vld [vmem:[%s6387_s21 + $0x21c] sm:$0xf] }
 0x143   : > { %v2427_v35 = vpop.f32.mrf.mxu2  ;;  %v2092_v37 = vpop.f32.mrf.mxu0 }
 0x144   : > { %v6694_v40 = vadd.f32 %v2427_v35, %v2259_v23  ;;  %v2093_v44 = vadd.f32 %v6589_v5, %v2092_v37  ;;  %v2261_v45 = vpop.f32.mrf.mxu1  ;;  %v4657_v35 = vld [vmem:[%s6387_s21 + $0x230] sm:$0xf0]  ;;  %v5571_v37 = vld [vmem:[%s6387_s21 + $0x2ec] sm:$0xf0] }
 0x146   : > { %v2262_v46 = vadd.f32 %v2261_v45, %v2093_v44  ;;  %2131 = vmatmul.bf16.gmra.mxu0 %v4696_v36  ;;  %2618 = vmatmul.bf16.gmra.mxu3 %v4612_v39  ;;  %v4745_v36 = vld [vmem:[%s6387_s21 + $0x2e8] sm:$0xf0]  ;;  %v4751_v39 = vld [vmem:[%s6387_s21 + $0x2d8] sm:$0xf]  ;;  %v4744_v44 = vor.u32 %v5570_v31, %v4743_v30  ;;  %v4660_v45 = vor.u32 %v5544_v34, %v4657_v35 }
 0x147   : > { %2300 = vmatmul.bf16.gmra.mxu1 %v4700_v42 }
 0x148   : > { %2469 = vmatmul.bf16.gmra.mxu2 %v4704_v43 }
 0x149   : > { %v2579_v41 = vpop.f32.mrf.mxu3 }
 0x14a   : > { %v6698_v52 = vadd.f32 %v2579_v41, %v6616_v50 }
 0x14b   : > { %v2430_v49 = vpop.f32.mrf.mxu2  ;;  %v2094_v53 = vpop.f32.mrf.mxu0 }
 0x14c   : > { %v6700_v48 = vadd.f32 %v2430_v49, %v2262_v46  ;;  %v2095_v54 = vadd.f32 %v6589_v5, %v2094_v53  ;;  %v2263_v55 = vpop.f32.mrf.mxu1  ;;  %v4748_v49 = vor.u32 %v5567_v32, %v4745_v36  ;;  %v4752_v53 = vor.u32 %v5571_v37, %v4751_v39  ;;  %v4791_v37 = vld [vmem:[%s6387_s21 + $0x330] sm:$0xf] }
 0x14e   : > { %v2264_v56 = vadd.f32 %v2263_v55, %v2095_v54 }
 0x151   : > { %v2581_v4 = vpop.f32.mrf.mxu3 }
 0x152   : > { %v6712_v50 = vadd.f32 %v2581_v4, %v6627_v3  ;;  %v5705_v3 = vld [vmem:[%s7897_s1 + $0x120] sm:$0xff]  ;;  %v5576_v4 = vld [vmem:[%s6387_s21 + $0x314] sm:$0xf0] }
 0x153   : > { %v2432_v6 = vpop.f32.mrf.mxu2  ;;  %v2097_v63 = vpop.f32.mrf.mxu0  ;;  %2737 = vmatpush.bf16.msrb.mxu0 %v5705_v3 }
 0x154   : > { %v6714_v10 = vadd.f32 %v2432_v6, %v2264_v56  ;;  %v2098_v13 = vadd.f32 %v6589_v5, %v2097_v63  ;;  %v2266_v15 = vpop.f32.mrf.mxu1  ;;  %v5573_v6 = vld [vmem:[%s6387_s21 + $0x304] sm:$0xf]  ;;  %v4769_v63 = vld [vmem:[%s6387_s21 + $0x318] sm:$0xf0] }
 0x156   : > { %v2267_v17 = vadd.f32 %v2266_v15, %v2098_v13  ;;  %2136 = vmatmul.bf16.gmra.mxu0 %v4720_v7  ;;  %2623 = vmatmul.bf16.gmra.mxu3 %v4636_v9  ;;  %v5550_v7 = vld [vmem:[%s6387_s21 + $0x24c] sm:$0xf]  ;;  %v4681_v9 = vld [vmem:[%s6387_s21 + $0x260] sm:$0xf0] }
 0x157   : > { %2305 = vmatmul.bf16.gmra.mxu1 %v4724_v11  ;;  %v4775_v11 = vld [vmem:[%s6387_s21 + $0x308] sm:$0xf]  ;;  %v4684_v3 = vor.u32 %v5550_v7, %v4681_v9 }
 0x158   : > { %2474 = vmatmul.bf16.gmra.mxu2 %v4728_v12  ;;  %v5577_v12 = vld [vmem:[%s6387_s21 + $0x31c] sm:$0xf0] }
 0x159   : > { %v2584_v21 = vpop.f32.mrf.mxu3 }
 0x15a   : > { %v6724_v23 = vadd.f32 %v2584_v21, %v6636_v16 }
 0x15b   : > { %v2435_v22 = vpop.f32.mrf.mxu2  ;;  %v2099_v26 = vpop.f32.mrf.mxu0 }
 0x15c   : > { %v6726_v25 = vadd.f32 %v2435_v22, %v2267_v17  ;;  %v2100_v27 = vadd.f32 %v6589_v5, %v2099_v26  ;;  %v2268_v28 = vpop.f32.mrf.mxu1  ;;  %v4768_v17 = vor.u32 %v5576_v4, %v4767_v1  ;;  %v4772_v22 = vor.u32 %v5573_v6, %v4769_v63 }
 0x15d   : > { %v4776_v26 = vor.u32 %v5577_v12, %v4775_v11 }
 0x15e   : > { %v2269_v29 = vadd.f32 %v2268_v28, %v2100_v27 }
 0x161   : > { %v2586_v42 = vpop.f32.mrf.mxu3 }
 0x162   : > { %v6738_v16 = vadd.f32 %v2586_v42, %v6653_v38  ;;  %v5582_v42 = vld [vmem:[%s6387_s21 + $0x344] sm:$0xf0] }
 0x163   : > { %v2437_v43 = vpop.f32.mrf.mxu2  ;;  %v2102_v41 = vpop.f32.mrf.mxu0 }
 0x164   : > { %v6740_v46 = vadd.f32 %v2437_v43, %v2269_v29  ;;  %v2103_v54 = vadd.f32 %v6589_v5, %v2102_v41  ;;  %v2271_v55 = vpop.f32.mrf.mxu1  ;;  %v5579_v43 = vld [vmem:[%s6387_s21 + $0x334] sm:$0xf]  ;;  %v4793_v41 = vld [vmem:[%s6387_s21 + $0x348] sm:$0xf0] }
 0x166   : > { %v2272_v56 = vadd.f32 %v2271_v55, %v2103_v54  ;;  %2141 = vmatmul.bf16.gmra.mxu0 %v4744_v44  ;;  %2628 = vmatmul.bf16.gmra.mxu3 %v4660_v45  ;;  %v5556_v44 = vld [vmem:[%s6387_s21 + $0x27c] sm:$0xf]  ;;  %v4705_v45 = vld [vmem:[%s6387_s21 + $0x290] sm:$0xf0] }
 0x167   : > { %2310 = vmatmul.bf16.gmra.mxu1 %v4748_v49  ;;  %v4799_v49 = vld [vmem:[%s6387_s21 + $0x338] sm:$0xf] }
 0x168   : > { %2479 = vmatmul.bf16.gmra.mxu2 %v4752_v53  ;;  %v5583_v53 = vld [vmem:[%s6387_s21 + $0x34c] sm:$0xf0] }
 0x169   : > { %v2589_v38 = vpop.f32.mrf.mxu3 }
 0x16a   : > { %v6744_v58 = vadd.f32 %v2589_v38, %v6660_v51  ;;  %v4708_v38 = vor.u32 %v5556_v44, %v4705_v45 }
 0x16b   : > { %v2440_v57 = vpop.f32.mrf.mxu2  ;;  %v2104_v60 = vpop.f32.mrf.mxu0 }
 0x16c   : > { %v6746_v59 = vadd.f32 %v2440_v57, %v2272_v56  ;;  %v2105_v61 = vadd.f32 %v6589_v5, %v2104_v60  ;;  %v2273_v62 = vpop.f32.mrf.mxu1  ;;  %v4792_v56 = vor.u32 %v5582_v42, %v4791_v37 }
 0x16e   : > { %v2274_v0 = vadd.f32 %v2273_v62, %v2105_v61  ;;  %v4796_v61 = vor.u32 %v5579_v43, %v4793_v41  ;;  %v4800_v62 = vor.u32 %v5583_v53, %v4799_v49  ;;  %v5712_v43 = vld [vmem:[%s7897_s1 + $0x158] sm:$0xff] }
 0x16f   : > { %2907 = vmatpush.bf16.msrb.mxu1 %v5712_v43  ;;  %v5600_v43 = vld [vmem:[%s6387_s21 + $0x3d4] sm:$0xf0] }
 0x171   : > { %v2591_v13 = vpop.f32.mrf.mxu3 }
 0x172   : > { %v6758_v51 = vadd.f32 %v2591_v13, %v6674_v8 }
 0x173   : > { %v2442_v15 = vpop.f32.mrf.mxu2  ;;  %v2107_v21 = vpop.f32.mrf.mxu0 }
 0x174   : > { %v6760_v20 = vadd.f32 %v2442_v15, %v2274_v0  ;;  %v2108_v27 = vadd.f32 %v6589_v5, %v2107_v21  ;;  %v2276_v28 = vpop.f32.mrf.mxu1  ;;  %v4815_v15 = vld [vmem:[%s6387_s21 + $0x360] sm:$0xf]  ;;  %v5585_v21 = vld [vmem:[%s6387_s21 + $0x364] sm:$0xf] }
 0x176   : > { %v2277_v29 = vadd.f32 %v2276_v28, %v2108_v27  ;;  %2146 = vmatmul.bf16.gmra.mxu0 %v4768_v17  ;;  %2633 = vmatmul.bf16.gmra.mxu3 %v4684_v3  ;;  %v5588_v17 = vld [vmem:[%s6387_s21 + $0x374] sm:$0xf0]  ;;  %v4817_v27 = vld [vmem:[%s6387_s21 + $0x378] sm:$0xf0]  ;;  %v4823_v28 = vld [vmem:[%s6387_s21 + $0x368] sm:$0xf] }
 0x177   : > { %2315 = vmatmul.bf16.gmra.mxu1 %v4772_v22  ;;  %v5704_v3 = vld [vmem:[%s7897_s1 + $0x118] sm:$0xff]  ;;  %v5562_v22 = vld [vmem:[%s6387_s21 + $0x2ac] sm:$0xf]  ;;  %v4820_v37 = vor.u32 %v5585_v21, %v4817_v27 }
 0x178   : > { %2484 = vmatmul.bf16.gmra.mxu2 %v4776_v26  ;;  %v4729_v26 = vld [vmem:[%s6387_s21 + $0x2c0] sm:$0xf0]  ;;  %2738 = vmatpush.bf16.msrb.mxu0 %v5704_v3 }
 0x179   : > { %v2594_v8 = vpop.f32.mrf.mxu3 }
 0x17a   : > { %v6764_v31 = vadd.f32 %v2594_v8, %v6680_v19 }
 0x17b   : > { %v2445_v30 = vpop.f32.mrf.mxu2  ;;  %v2109_v34 = vpop.f32.mrf.mxu0 }
 0x17c   : > { %v6766_v32 = vadd.f32 %v2445_v30, %v2277_v29  ;;  %v2110_v35 = vadd.f32 %v6589_v5, %v2109_v34  ;;  %v2278_v36 = vpop.f32.mrf.mxu1  ;;  %v4816_v34 = vor.u32 %v5588_v17, %v4815_v15 }
 0x17e   : > { %v2279_v39 = vadd.f32 %v2278_v36, %v2110_v35  ;;  %v4732_v35 = vor.u32 %v5562_v22, %v4729_v26 }
 0x181   : > { %v2596_v54 = vpop.f32.mrf.mxu3 }
 0x182   : > { %v6778_v19 = vadd.f32 %v2596_v54, %v6694_v40 }
 0x183   : > { %v2447_v55 = vpop.f32.mrf.mxu2  ;;  %v2112_v60 = vpop.f32.mrf.mxu0 }
 0x184   : > { %v6780_v57 = vadd.f32 %v2447_v55, %v2279_v39  ;;  %v2113_v0 = vadd.f32 %v6589_v5, %v2112_v60  ;;  %v2281_v1 = vpop.f32.mrf.mxu1 }
 0x186   : > { %v2282_v4 = vadd.f32 %v2281_v1, %v2113_v0  ;;  %2151 = vmatmul.bf16.gmra.mxu0 %v4792_v56  ;;  %2638 = vmatmul.bf16.gmra.mxu3 %v4708_v38  ;;  %v5591_v0 = vld [vmem:[%s6387_s21 + $0x394] sm:$0xf]  ;;  %v5568_v1 = vld [vmem:[%s6387_s21 + $0x2dc] sm:$0xf] }
 0x187   : > { %2320 = vmatmul.bf16.gmra.mxu1 %v4796_v61  ;;  %v4839_v61 = vld [vmem:[%s6387_s21 + $0x390] sm:$0xf] }
 0x188   : > { %2489 = vmatmul.bf16.gmra.mxu2 %v4800_v62  ;;  %v5594_v62 = vld [vmem:[%s6387_s21 + $0x3a4] sm:$0xf0] }
 0x189   : > { %v2599_v40 = vpop.f32.mrf.mxu3 }
 0x18a   : > { %v6784_v7 = vadd.f32 %v2599_v40, %v6700_v48  ;;  %v5589_v48 = vld [vmem:[%s6387_s21 + $0x37c] sm:$0xf0]  ;;  %v4841_v40 = vld [vmem:[%s6387_s21 + $0x3a8] sm:$0xf0] }
 0x18b   : > { %v2450_v6 = vpop.f32.mrf.mxu2  ;;  %v2114_v63 = vpop.f32.mrf.mxu0  ;;  %v4824_v42 = vor.u32 %v5589_v48, %v4823_v28  ;;  %v4844_v21 = vor.u32 %v5591_v0, %v4841_v40 }
 0x18c   : > { %v6786_v9 = vadd.f32 %v2450_v6, %v2282_v4  ;;  %v2115_v11 = vadd.f32 %v6589_v5, %v2114_v63  ;;  %v2283_v12 = vpop.f32.mrf.mxu1  ;;  %v4753_v4 = vld [vmem:[%s6387_s21 + $0x2f0] sm:$0xf0]  ;;  %v4847_v6 = vld [vmem:[%s6387_s21 + $0x398] sm:$0xf]  ;;  %v5595_v63 = vld [vmem:[%s6387_s21 + $0x3ac] sm:$0xf0] }
 0x18d   : > { %v4756_v15 = vor.u32 %v5568_v1, %v4753_v4  ;;  %v4848_v22 = vor.u32 %v5595_v63, %v4847_v6 }
 0x18e   : > { %v2284_v13 = vadd.f32 %v2283_v12, %v2115_v11 }
 0x191   : > { %v2601_v29 = vpop.f32.mrf.mxu3 }
 0x192   : > { %v6801_v30 = vadd.f32 %v2601_v29, %v6714_v10 }
 0x193   : > { %v2452_v8 = vpop.f32.mrf.mxu2  ;;  %v2117_v39 = vpop.f32.mrf.mxu0 }
 0x194   : > { %v6803_v36 = vadd.f32 %v2452_v8, %v2284_v13  ;;  %v2118_v44 = vadd.f32 %v6589_v5, %v2117_v39  ;;  %v2286_v45 = vpop.f32.mrf.mxu1  ;;  %v4840_v13 = vor.u32 %v5594_v62, %v4839_v61 }
 0x196   : > { %v2287_v10 = vadd.f32 %v2286_v45, %v2118_v44  ;;  %2156 = vmatmul.bf16.gmra.mxu0 %v4816_v34  ;;  %2643 = vmatmul.bf16.gmra.mxu3 %v4732_v35  ;;  %v5597_v44 = vld [vmem:[%s6387_s21 + $0x3c4] sm:$0xf]  ;;  %v5574_v45 = vld [vmem:[%s6387_s21 + $0x30c] sm:$0xf] }
 0x197   : > { %2325 = vmatmul.bf16.gmra.mxu1 %v4820_v37 }
 0x198   : > { %2494 = vmatmul.bf16.gmra.mxu2 %v4824_v42  ;;  %v4863_v42 = vld [vmem:[%s6387_s21 + $0x3c0] sm:$0xf] }
 0x199   : > { %v2604_v41 = vpop.f32.mrf.mxu3 }
 0x19a   : > { %v6810_v53 = vadd.f32 %v2604_v41, %v6726_v25  ;;  %v4865_v41 = vld [vmem:[%s6387_s21 + $0x3d8] sm:$0xf0] }
 0x19b   : > { %v2455_v49 = vpop.f32.mrf.mxu2  ;;  %v2119_v55 = vpop.f32.mrf.mxu0  ;;  %v4868_v1 = vor.u32 %v5597_v44, %v4865_v41 }
 0x19c   : > { %v6812_v54 = vadd.f32 %v2455_v49, %v2287_v10  ;;  %v2120_v56 = vadd.f32 %v6589_v5, %v2119_v55  ;;  %v2288_v38 = vpop.f32.mrf.mxu1  ;;  %v4777_v10 = vld [vmem:[%s6387_s21 + $0x320] sm:$0xf0]  ;;  %v4871_v49 = vld [vmem:[%s6387_s21 + $0x3c8] sm:$0xf]  ;;  %v5601_v55 = vld [vmem:[%s6387_s21 + $0x3dc] sm:$0xf0] }
 0x19d   : > { %v4780_v61 = vor.u32 %v5574_v45, %v4777_v10  ;;  %v4872_v4 = vor.u32 %v5601_v55, %v4871_v49 }
 0x19e   : > { %v2289_v60 = vadd.f32 %v2288_v38, %v2120_v56 }
 0x1a1   : > { %v2606_v11 = vpop.f32.mrf.mxu3 }
 0x1a2   : > { %v6824_v25 = vadd.f32 %v2606_v11, %v6740_v46 }
 0x1a3   : > { %v2457_v12 = vpop.f32.mrf.mxu2  ;;  %v2122_v3 = vpop.f32.mrf.mxu0 }
 0x1a4   : > { %v6826_v17 = vadd.f32 %v2457_v12, %v2289_v60  ;;  %v2123_v26 = vadd.f32 %v6589_v5, %v2122_v3  ;;  %v2291_v27 = vpop.f32.mrf.mxu1  ;;  %v4864_v60 = vor.u32 %v5600_v43, %v4863_v42 }
 0x1a6   : > { %v2292_v28 = vadd.f32 %v2291_v27, %v2123_v26  ;;  %2161 = vmatmul.bf16.gmra.mxu0 %v4840_v13  ;;  %2648 = vmatmul.bf16.gmra.mxu3 %v4756_v15  ;;  %v4887_v26 = vld [vmem:[%s6387_s21 + $0x3f0] sm:$0xf]  ;;  %v5606_v27 = vld [vmem:[%s6387_s21 + $0x404] sm:$0xf0] }
 0x1a7   : > { %2330 = vmatmul.bf16.gmra.mxu1 %v4844_v21  ;;  %v4888_v43 = vor.u32 %v5606_v27, %v4887_v26  ;;  %v4919_v26 = vld [vmem:[%s6387_s21 + $0x428] sm:$0xf]  ;;  %v5613_v27 = vld [vmem:[%s6387_s21 + $0x43c] sm:$0xf0] }
 0x1a8   : > { %2499 = vmatmul.bf16.gmra.mxu2 %v4848_v22 }
 0x1a9   : > { %v2609_v46 = vpop.f32.mrf.mxu3 }
 0x1aa   : > { %v6830_v29 = vadd.f32 %v2609_v46, %v6746_v59  ;;  %v5580_v46 = vld [vmem:[%s6387_s21 + $0x33c] sm:$0xf] }
 0x1ab   : > { %v2460_v48 = vpop.f32.mrf.mxu2  ;;  %v2124_v34 = vpop.f32.mrf.mxu0 }
 0x1ac   : > { %v6832_v8 = vadd.f32 %v2460_v48, %v2292_v28  ;;  %v2125_v35 = vadd.f32 %v6589_v5, %v2124_v34  ;;  %v2293_v39 = vpop.f32.mrf.mxu1  ;;  %v5603_v28 = vld [vmem:[%s6387_s21 + $0x3f4] sm:$0xf]  ;;  %v4889_v34 = vld [vmem:[%s6387_s21 + $0x408] sm:$0xf0] }
 0x1ad   : > { %v4801_v48 = vld [vmem:[%s6387_s21 + $0x350] sm:$0xf0]  ;;  %v4892_v41 = vor.u32 %v5603_v28, %v4889_v34 }
 0x1ae   : > { %v2294_v37 = vadd.f32 %v2293_v39, %v2125_v35  ;;  %v4895_v35 = vld [vmem:[%s6387_s21 + $0x3f8] sm:$0xf]  ;;  %v5607_v39 = vld [vmem:[%s6387_s21 + $0x40c] sm:$0xf0]  ;;  %v4804_v44 = vor.u32 %v5580_v46, %v4801_v48 }
 0x1af   : > { %v4896_v49 = vor.u32 %v5607_v39, %v4895_v35 }
 0x1b1   : > { %v2611_v56 = vpop.f32.mrf.mxu3 }
 0x1b2   : > { %v6844_v59 = vadd.f32 %v2611_v56, %v6760_v20 }
 0x1b3   : > { %v2462_v38 = vpop.f32.mrf.mxu2  ;;  %v2127_v0 = vpop.f32.mrf.mxu0 }
 0x1b4   : > { %v6846_v62 = vadd.f32 %v2462_v38, %v2294_v37  ;;  %v2128_v40 = vadd.f32 %v6589_v5, %v2127_v0  ;;  %v2296_v6 = vpop.f32.mrf.mxu1 }
 0x1b6   : > { %v2297_v63 = vadd.f32 %v2296_v6, %v2128_v40  ;;  %2166 = vmatmul.bf16.gmra.mxu0 %v4864_v60  ;;  %2653 = vmatmul.bf16.gmra.mxu3 %v4780_v61  ;;  %v4911_v6 = vld [vmem:[%s6387_s21 + $0x420] sm:$0xf] }
 0x1b7   : > { %2335 = vmatmul.bf16.gmra.mxu1 %v4868_v1 }
 0x1b8   : > { %2504 = vmatmul.bf16.gmra.mxu2 %v4872_v4 }
 0x1b9   : > { %v2614_v20 = vpop.f32.mrf.mxu3 }
 0x1ba   : > { %v6850_v12 = vadd.f32 %v2614_v20, %v6766_v32  ;;  %v5612_v20 = vld [vmem:[%s6387_s21 + $0x434] sm:$0xf0] }
 0x1bb   : > { %v2465_v11 = vpop.f32.mrf.mxu2  ;;  %v2129_v15 = vpop.f32.mrf.mxu0  ;;  %v4912_v34 = vor.u32 %v5612_v20, %v4911_v6  ;;  %v5615_v6 = vld [vmem:[%s6387_s21 + $0x454] sm:$0xf] }
 0x1bc   : > { %v6852_v13 = vadd.f32 %v2465_v11, %v2297_v63  ;;  %v2130_v3 = vadd.f32 %v6589_v5, %v2129_v15  ;;  %v2298_v21 = vpop.f32.mrf.mxu1  ;;  %v5703_v11 = vld [vmem:[%s7897_s1 + $0x110] sm:$0xff] }
 0x1bd   : > { %v5711_v15 = vld [vmem:[%s7897_s1 + $0x150] sm:$0xff]  ;;  %2739 = vmatpush.bf16.msrb.mxu0 %v5703_v11 }
 0x1be   : > { %v2299_v22 = vadd.f32 %v2298_v21, %v2130_v3  ;;  %v5609_v3 = vld [vmem:[%s6387_s21 + $0x424] sm:$0xf]  ;;  %2908 = vmatpush.bf16.msrb.mxu1 %v5711_v15  ;;  %v4849_v20 = vld [vmem:[%s6387_s21 + $0x3b0] sm:$0xf0]  ;;  %v4937_v11 = vld [vmem:[%s6387_s21 + $0x468] sm:$0xf0] }
 0x1bf   : > { %v4825_v21 = vld [vmem:[%s6387_s21 + $0x380] sm:$0xf0]  ;;  %v4943_v15 = vld [vmem:[%s6387_s21 + $0x458] sm:$0xf] }
 0x1c1   : > { %v2616_v37 = vpop.f32.mrf.mxu3 }
 0x1c2   : > { %v6864_v32 = vadd.f32 %v2616_v37, %v6780_v57 }
 0x1c3   : > { %v2467_v42 = vpop.f32.mrf.mxu2  ;;  %v2132_v10 = vpop.f32.mrf.mxu0 }
 0x1c4   : > { %v6866_v45 = vadd.f32 %v2467_v42, %v2299_v22  ;;  %v2133_v55 = vadd.f32 %v6589_v5, %v2132_v10  ;;  %v2301_v56 = vpop.f32.mrf.mxu1  ;;  %v4913_v22 = vld [vmem:[%s6387_s21 + $0x438] sm:$0xf0] }
 0x1c5   : > { %v4916_v42 = vor.u32 %v5609_v3, %v4913_v22  ;;  %v5619_v3 = vld [vmem:[%s6387_s21 + $0x46c] sm:$0xf0] }
 0x1c6   : > { %v2302_v38 = vadd.f32 %v2301_v56, %v2133_v55  ;;  %2171 = vmatmul.bf16.gmra.mxu0 %v4888_v43  ;;  %2658 = vmatmul.bf16.gmra.mxu3 %v4804_v44  ;;  %v4920_v43 = vor.u32 %v5613_v27, %v4919_v26 }
 0x1c7   : > { %2340 = vmatmul.bf16.gmra.mxu1 %v4892_v41 }
 0x1c8   : > { %2509 = vmatmul.bf16.gmra.mxu2 %v4896_v49 }
 0x1c9   : > { %v2619_v57 = vpop.f32.mrf.mxu3 }
 0x1ca   : > { %v6870_v61 = vadd.f32 %v2619_v57, %v6786_v9  ;;  %v5586_v9 = vld [vmem:[%s6387_s21 + $0x36c] sm:$0xf] }
 0x1cb   : > { %v2470_v60 = vpop.f32.mrf.mxu2  ;;  %v2134_v1 = vpop.f32.mrf.mxu0  ;;  %v4828_v35 = vor.u32 %v5586_v9, %v4825_v21 }
 0x1cc   : > { %v6872_v0 = vadd.f32 %v2470_v60, %v2302_v38  ;;  %v2135_v4 = vadd.f32 %v6589_v5, %v2134_v1  ;;  %v2303_v40 = vpop.f32.mrf.mxu1 }
 0x1ce   : > { %v2304_v63 = vadd.f32 %v2303_v40, %v2135_v4  ;;  %v4935_v4 = vld [vmem:[%s6387_s21 + $0x450] sm:$0xf]  ;;  %v5618_v40 = vld [vmem:[%s6387_s21 + $0x464] sm:$0xf0] }
 0x1cf   : > { %v4936_v22 = vor.u32 %v5618_v40, %v4935_v4  ;;  %v5598_v4 = vld [vmem:[%s6387_s21 + $0x3cc] sm:$0xf]  ;;  %v4873_v40 = vld [vmem:[%s6387_s21 + $0x3e0] sm:$0xf0] }
 0x1d1   : > { %v2621_v28 = vpop.f32.mrf.mxu3 }
 0x1d2   : > { %v6890_v48 = vadd.f32 %v2621_v28, %v6803_v36 }
 0x1d3   : > { %v2472_v46 = vpop.f32.mrf.mxu2  ;;  %v2137_v37 = vpop.f32.mrf.mxu0 }
 0x1d4   : > { %v6892_v39 = vadd.f32 %v2472_v46, %v2304_v63  ;;  %v2138_v44 = vadd.f32 %v6589_v5, %v2137_v37  ;;  %v2306_v10 = vpop.f32.mrf.mxu1  ;;  %v5592_v63 = vld [vmem:[%s6387_s21 + $0x39c] sm:$0xf]  ;;  %v4940_v46 = vor.u32 %v5615_v6, %v4937_v11 }
 0x1d5   : > { %v4852_v26 = vor.u32 %v5592_v63, %v4849_v20  ;;  %v4961_v6 = vld [vmem:[%s6387_s21 + $0x498] sm:$0xf0]  ;;  %v4967_v63 = vld [vmem:[%s6387_s21 + $0x488] sm:$0xf]  ;;  %v5625_v20 = vld [vmem:[%s6387_s21 + $0x49c] sm:$0xf0] }
 0x1d6   : > { %v2307_v41 = vadd.f32 %v2306_v10, %v2138_v44  ;;  %2176 = vmatmul.bf16.gmra.mxu0 %v4912_v34  ;;  %2663 = vmatmul.bf16.gmra.mxu3 %v4828_v35  ;;  %v4944_v34 = vor.u32 %v5619_v3, %v4943_v15 }
 0x1d7   : > { %2345 = vmatmul.bf16.gmra.mxu1 %v4916_v42 }
 0x1d8   : > { %2514 = vmatmul.bf16.gmra.mxu2 %v4920_v43 }
 0x1d9   : > { %v2624_v36 = vpop.f32.mrf.mxu3 }
 0x1da   : > { %v6896_v55 = vadd.f32 %v2624_v36, %v6812_v54 }
 0x1db   : > { %v2475_v49 = vpop.f32.mrf.mxu2  ;;  %v2139_v38 = vpop.f32.mrf.mxu0 }
 0x1dc   : > { %v6898_v56 = vadd.f32 %v2475_v49, %v2307_v41  ;;  %v2140_v57 = vadd.f32 %v6589_v5, %v2139_v38  ;;  %v2308_v60 = vpop.f32.mrf.mxu1  ;;  %v6920_v41 = vld [vmem:[#allocation6] ss:$0 sm:$0xff] }
 0x1de   : > { %v2309_v1 = vadd.f32 %v2308_v60, %v2140_v57  ;;  %v4959_v57 = vld [vmem:[%s6387_s21 + $0x480] sm:$0xf]  ;;  %v5624_v60 = vld [vmem:[%s6387_s21 + $0x494] sm:$0xf0] }
 0x1df   : > { %v4960_v3 = vor.u32 %v5624_v60, %v4959_v57  ;;  %v5630_v57 = vld [vmem:[%s6387_s21 + $0x4c4] sm:$0xf0]  ;;  %v5627_v60 = vld [vmem:[%s6387_s21 + $0x4b4] sm:$0xf] }
 0x1e1   : > { %v2626_v9 = vpop.f32.mrf.mxu3 }
 0x1e2   : > { %v6910_v54 = vadd.f32 %v2626_v9, %v6826_v17  ;;  %v4876_v9 = vor.u32 %v5598_v4, %v4873_v40  ;;  %v4897_v4 = vld [vmem:[%s6387_s21 + $0x410] sm:$0xf0]  ;;  %v4985_v40 = vld [vmem:[%s6387_s21 + $0x4c8] sm:$0xf0] }
 0x1e3   : > { %v2477_v21 = vpop.f32.mrf.mxu2  ;;  %v2142_v28 = vpop.f32.mrf.mxu0 }
 0x1e4   : > { %v6912_v27 = vadd.f32 %v2477_v21, %v2309_v1  ;;  %v2143_v35 = vadd.f32 %v6589_v5, %v2142_v28  ;;  %v2311_v37 = vpop.f32.mrf.mxu1  ;;  %v5621_v1 = vld [vmem:[%s6387_s21 + $0x484] sm:$0xf]  ;;  %v4968_v28 = vor.u32 %v5625_v20, %v4967_v63  ;;  %v5631_v63 = vld [vmem:[%s6387_s21 + $0x4cc] sm:$0xf0] }
 0x1e6   : > { %v2312_v42 = vadd.f32 %v2311_v37, %v2143_v35  ;;  %2181 = vmatmul.bf16.gmra.mxu0 %v4936_v22  ;;  %2668 = vmatmul.bf16.gmra.mxu3 %v4852_v26  ;;  %v4964_v26 = vor.u32 %v5621_v1, %v4961_v6  ;;  %v5604_v1 = vld [vmem:[%s6387_s21 + $0x3fc] sm:$0xf]  ;;  %v4991_v6 = vld [vmem:[%s6387_s21 + $0x4b8] sm:$0xf] }
 0x1e7   : > { %2350 = vmatmul.bf16.gmra.mxu1 %v4940_v46 }
 0x1e8   : > { %2519 = vmatmul.bf16.gmra.mxu2 %v4944_v34 }
 0x1e9   : > { %v2629_v17 = vpop.f32.mrf.mxu3 }
 0x1ea   : > { %v6916_v44 = vadd.f32 %v2629_v17, %v6832_v8 }
 0x1eb   : > { %v2480_v43 = vpop.f32.mrf.mxu2  ;;  %v2144_v10 = vpop.f32.mrf.mxu0 }
 0x1ec   : > { %v6918_v5 = vadd.f32 %v2480_v43, %v2312_v42  ;;  %v2145_v36 = vadd.f32 %v6920_v41, %v2144_v10  ;;  %v2313_v49 = vpop.f32.mrf.mxu1 }
 0x1ee   : > { %v2314_v38 = vadd.f32 %v2313_v49, %v2145_v36 }
 0x1f1   : > { %v2631_v11 = vpop.f32.mrf.mxu3 }
 0x1f2   : > { %v6932_v15 = vadd.f32 %v2631_v11, %v6846_v62 }
 0x1f3   : > { %v2482_v8 = vpop.f32.mrf.mxu2  ;;  %v2147_v22 = vpop.f32.mrf.mxu0 }
 0x1f4   : > { %v6934_v21 = vadd.f32 %v2482_v8, %v2314_v38  ;;  %v2148_v46 = vadd.f32 %v6920_v41, %v2147_v22  ;;  %v2316_v34 = vpop.f32.mrf.mxu1  ;;  %v4983_v38 = vld [vmem:[%s6387_s21 + $0x4b0] sm:$0xf] }
 0x1f5   : > { %v4984_v8 = vor.u32 %v5630_v57, %v4983_v38 }
 0x1f6   : > { %v2317_v35 = vadd.f32 %v2316_v34, %v2148_v46  ;;  %2186 = vmatmul.bf16.gmra.mxu0 %v4960_v3  ;;  %2673 = vmatmul.bf16.gmra.mxu3 %v4876_v9  ;;  %v4900_v3 = vor.u32 %v5604_v1, %v4897_v4  ;;  %v5007_v1 = vld [vmem:[%s6387_s21 + $0x4e0] sm:$0xf]  ;;  %v5636_v4 = vld [vmem:[%s6387_s21 + $0x4f4] sm:$0xf0] }
 0x1f7   : > { %2355 = vmatmul.bf16.gmra.mxu1 %v4964_v26  ;;  %v4988_v26 = vor.u32 %v5627_v60, %v4985_v40  ;;  %v5633_v40 = vld [vmem:[%s6387_s21 + $0x4e4] sm:$0xf] }
 0x1f8   : > { %2524 = vmatmul.bf16.gmra.mxu2 %v4968_v28  ;;  %v4992_v28 = vor.u32 %v5631_v63, %v4991_v6  ;;  %v5610_v6 = vld [vmem:[%s6387_s21 + $0x42c] sm:$0xf]  ;;  %v4921_v63 = vld [vmem:[%s6387_s21 + $0x440] sm:$0xf0] }
 0x1f9   : > { %v2634_v62 = vpop.f32.mrf.mxu3 }
 0x1fa   : > { %v6938_v42 = vadd.f32 %v2634_v62, %v6852_v13 }
 0x1fb   : > { %v2485_v37 = vpop.f32.mrf.mxu2  ;;  %v2149_v43 = vpop.f32.mrf.mxu0 }
 0x1fc   : > { %v6940_v17 = vadd.f32 %v2485_v37, %v2317_v35  ;;  %v2150_v10 = vadd.f32 %v6920_v41, %v2149_v43  ;;  %v2318_v36 = vpop.f32.mrf.mxu1 }
 0x1fe   : > { %v2319_v49 = vadd.f32 %v2318_v36, %v2150_v10 }
 0x201   : > { %v2636_v20 = vpop.f32.mrf.mxu3 }
 0x202   : > { %v6952_v13 = vadd.f32 %v2636_v20, %v6866_v45  ;;  %v5702_v45 = vld [vmem:[%s7897_s1 + $0x108] sm:$0xff]  ;;  %v5009_v20 = vld [vmem:[%s6387_s21 + $0x4f8] sm:$0xf0] }
 0x203   : > { %v2487_v11 = vpop.f32.mrf.mxu2  ;;  %v2152_v22 = vpop.f32.mrf.mxu0  ;;  %2740 = vmatpush.bf16.msrb.mxu0 %v5702_v45 }
 0x204   : > { %v6954_v9 = vadd.f32 %v2487_v11, %v2319_v49  ;;  %v2153_v46 = vadd.f32 %v6920_v41, %v2152_v22  ;;  %v2321_v34 = vpop.f32.mrf.mxu1  ;;  %v5710_v49 = vld [vmem:[%s7897_s1 + $0x148] sm:$0xff]  ;;  %v5637_v11 = vld [vmem:[%s6387_s21 + $0x4fc] sm:$0xf0] }
 0x205   : > { %2909 = vmatpush.bf16.msrb.mxu1 %v5710_v49 }
 0x206   : > { %v2322_v35 = vadd.f32 %v2321_v34, %v2153_v46  ;;  %2191 = vmatmul.bf16.gmra.mxu0 %v4984_v8  ;;  %2678 = vmatmul.bf16.gmra.mxu3 %v4900_v3 }
 0x207   : > { %2360 = vmatmul.bf16.gmra.mxu1 %v4988_v26  ;;  %v5008_v26 = vor.u32 %v5636_v4, %v5007_v1 }
 0x208   : > { %2529 = vmatmul.bf16.gmra.mxu2 %v4992_v28  ;;  %v4924_v28 = vor.u32 %v5610_v6, %v4921_v63  ;;  %v5031_v6 = vld [vmem:[%s6387_s21 + $0x510] sm:$0xf]  ;;  %v5642_v63 = vld [vmem:[%s6387_s21 + $0x524] sm:$0xf0] }
 0x209   : > { %v2639_v62 = vpop.f32.mrf.mxu3 }
 0x20a   : > { %v6961_v43 = vadd.f32 %v2639_v62, %v6872_v0  ;;  %v5015_v0 = vld [vmem:[%s6387_s21 + $0x4e8] sm:$0xf] }
 0x20b   : > { %v2490_v37 = vpop.f32.mrf.mxu2  ;;  %v2154_v36 = vpop.f32.mrf.mxu0  ;;  %v5016_v45 = vor.u32 %v5637_v11, %v5015_v0  ;;  %v5616_v0 = vld [vmem:[%s6387_s21 + $0x45c] sm:$0xf]  ;;  %v4945_v11 = vld [vmem:[%s6387_s21 + $0x470] sm:$0xf0] }
 0x20c   : > { %v6963_v10 = vadd.f32 %v2490_v37, %v2322_v35  ;;  %v2155_v38 = vadd.f32 %v6920_v41, %v2154_v36  ;;  %v2323_v57 = vpop.f32.mrf.mxu1  ;;  %v5012_v35 = vor.u32 %v5633_v40, %v5009_v20  ;;  %v5639_v20 = vld [vmem:[%s6387_s21 + $0x514] sm:$0xf] }
 0x20e   : > { %v2324_v60 = vadd.f32 %v2323_v57, %v2155_v38 }
 0x211   : > { %v2641_v8 = vpop.f32.mrf.mxu3 }
 0x212   : > { %v6978_v22 = vadd.f32 %v2641_v8, %v6892_v39  ;;  %v5033_v8 = vld [vmem:[%s6387_s21 + $0x528] sm:$0xf0] }
 0x213   : > { %v2492_v3 = vpop.f32.mrf.mxu2  ;;  %v2157_v34 = vpop.f32.mrf.mxu0 }
 0x214   : > { %v6980_v46 = vadd.f32 %v2492_v3, %v2324_v60  ;;  %v2158_v62 = vadd.f32 %v6920_v41, %v2157_v34  ;;  %v2326_v37 = vpop.f32.mrf.mxu1  ;;  %v5039_v3 = vld [vmem:[%s6387_s21 + $0x518] sm:$0xf] }
 0x216   : > { %v2327_v36 = vadd.f32 %v2326_v37, %v2158_v62  ;;  %2196 = vmatmul.bf16.gmra.mxu0 %v5008_v26  ;;  %2683 = vmatmul.bf16.gmra.mxu3 %v4924_v28  ;;  %v5643_v26 = vld [vmem:[%s6387_s21 + $0x52c] sm:$0xf0] }
 0x217   : > { %2365 = vmatmul.bf16.gmra.mxu1 %v5012_v35  ;;  %v5032_v35 = vor.u32 %v5642_v63, %v5031_v6 }
 0x218   : > { %2534 = vmatmul.bf16.gmra.mxu2 %v5016_v45  ;;  %v4948_v45 = vor.u32 %v5616_v0, %v4945_v11 }
 0x219   : > { %v2644_v39 = vpop.f32.mrf.mxu3 }
 0x21a   : > { %v6984_v38 = vadd.f32 %v2644_v39, %v6898_v56  ;;  %v5040_v39 = vor.u32 %v5643_v26, %v5039_v3  ;;  %v5648_v3 = vld [vmem:[%s6387_s21 + $0x554] sm:$0xf0]  ;;  %v5645_v26 = vld [vmem:[%s6387_s21 + $0x544] sm:$0xf] }
 0x21b   : > { %v2495_v49 = vpop.f32.mrf.mxu2  ;;  %v2159_v60 = vpop.f32.mrf.mxu0 }
 0x21c   : > { %v6986_v57 = vadd.f32 %v2495_v49, %v2327_v36  ;;  %v2160_v1 = vadd.f32 %v6920_v41, %v2159_v60  ;;  %v2328_v4 = vpop.f32.mrf.mxu1  ;;  %v5036_v36 = vor.u32 %v5639_v20, %v5033_v8  ;;  %v5055_v8 = vld [vmem:[%s6387_s21 + $0x540] sm:$0xf] }
 0x21e   : > { %v2329_v40 = vadd.f32 %v2328_v4, %v2160_v1 }
 0x221   : > { %v2646_v28 = vpop.f32.mrf.mxu3 }
 0x222   : > { %v6998_v56 = vadd.f32 %v2646_v28, %v6912_v27  ;;  %v5622_v28 = vld [vmem:[%s6387_s21 + $0x48c] sm:$0xf] }
 0x223   : > { %v2497_v34 = vpop.f32.mrf.mxu2  ;;  %v2162_v37 = vpop.f32.mrf.mxu0 }
 0x224   : > { %v7000_v62 = vadd.f32 %v2497_v34, %v2329_v40  ;;  %v2163_v49 = vadd.f32 %v6920_v41, %v2162_v37  ;;  %v2331_v60 = vpop.f32.mrf.mxu1  ;;  %v4969_v34 = vld [vmem:[%s6387_s21 + $0x4a0] sm:$0xf0]  ;;  %v5649_v37 = vld [vmem:[%s6387_s21 + $0x55c] sm:$0xf0] }
 0x226   : > { %v2332_v1 = vadd.f32 %v2331_v60, %v2163_v49  ;;  %2201 = vmatmul.bf16.gmra.mxu0 %v5032_v35  ;;  %2688 = vmatmul.bf16.gmra.mxu3 %v4948_v45  ;;  %v5057_v35 = vld [vmem:[%s6387_s21 + $0x558] sm:$0xf0]  ;;  %v5063_v45 = vld [vmem:[%s6387_s21 + $0x548] sm:$0xf]  ;;  %v5056_v49 = vor.u32 %v5648_v3, %v5055_v8  ;;  %v4972_v60 = vor.u32 %v5622_v28, %v4969_v34 }
 0x227   : > { %2370 = vmatmul.bf16.gmra.mxu1 %v5036_v36 }
 0x228   : > { %2539 = vmatmul.bf16.gmra.mxu2 %v5040_v39 }
 0x229   : > { %v2649_v27 = vpop.f32.mrf.mxu3 }
 0x22a   : > { %v7004_v40 = vadd.f32 %v2649_v27, %v6918_v5  ;;  %v5709_v27 = vld [vmem:[%s7897_s1 + $0x140] sm:$0xff] }
 0x22b   : > { %v2500_v4 = vpop.f32.mrf.mxu2  ;;  %v2164_v63 = vpop.f32.mrf.mxu0  ;;  %2910 = vmatpush.bf16.msrb.mxu1 %v5709_v27 }
 0x22c   : > { %v7006_v6 = vadd.f32 %v2500_v4, %v2332_v1  ;;  %v2165_v20 = vadd.f32 %v6920_v41, %v2164_v63  ;;  %v2333_v0 = vpop.f32.mrf.mxu1  ;;  %v5701_v1 = vld [vmem:[%s7897_s1 + $0x100] sm:$0xff] }
 0x22d   : > { %2741 = vmatpush.bf16.msrb.mxu0 %v5701_v1  ;;  %v5655_v1 = vld [vmem:[%s6387_s21 + $0x58c] sm:$0xf0] }
 0x22e   : > { %v2334_v11 = vadd.f32 %v2333_v0, %v2165_v20  ;;  %v5060_v20 = vor.u32 %v5645_v26, %v5057_v35  ;;  %v5064_v0 = vor.u32 %v5649_v37, %v5063_v45  ;;  %v5079_v45 = vld [vmem:[%s6387_s21 + $0x570] sm:$0xf]  ;;  %v5651_v37 = vld [vmem:[%s6387_s21 + $0x574] sm:$0xf] }
 0x231   : > { %v2651_v36 = vpop.f32.mrf.mxu3 }
 0x232   : > { %v7018_v5 = vadd.f32 %v2651_v36, %v6934_v21  ;;  %v5628_v36 = vld [vmem:[%s6387_s21 + $0x4bc] sm:$0xf] }
 0x233   : > { %v2502_v39 = vpop.f32.mrf.mxu2  ;;  %v2167_v63 = vpop.f32.mrf.mxu0 }
 0x234   : > { %v7026_v4 = vadd.f32 %v2502_v39, %v2334_v11  ;;  %v2168_v2 = vadd.f32 %v6920_v41, %v2167_v63  ;;  %v2336_v21 = vpop.f32.mrf.mxu1  ;;  %v4993_v39 = vld [vmem:[%s6387_s21 + $0x4d0] sm:$0xf0] }
 0x236   : > { %v7029_v8 = vadd.f32 %v2336_v21, %v2168_v2  ;;  %2206 = vmatmul.bf16.gmra.mxu0 %v5056_v49  ;;  %2693 = vmatmul.bf16.gmra.mxu3 %v4972_v60  ;;  %v5654_v2 = vld [vmem:[%s6387_s21 + $0x584] sm:$0xf0]  ;;  %v5081_v49 = vld [vmem:[%s6387_s21 + $0x588] sm:$0xf0]  ;;  %v5087_v60 = vld [vmem:[%s6387_s21 + $0x578] sm:$0xf] }
 0x237   : > { %2375 = vmatmul.bf16.gmra.mxu1 %v5060_v20  ;;  %v4996_v20 = vor.u32 %v5628_v36, %v4993_v39  ;;  %v5084_v21 = vor.u32 %v5651_v37, %v5081_v49  ;;  %v5111_v49 = vld [vmem:[%s6387_s21 + $0x5a8] sm:$0xf] }
 0x238   : > { %2544 = vmatmul.bf16.gmra.mxu2 %v5064_v0 }
 0x239   : > { %v2654_v11 = vpop.f32.mrf.mxu3 }
 0x23a   : > { %v7032_v3 = vadd.f32 %v2654_v11, %v6940_v17  ;;  %v5080_v17 = vor.u32 %v5654_v2, %v5079_v45  ;;  %v5088_v11 = vor.u32 %v5655_v1, %v5087_v60  ;;  %v5634_v60 = vld [vmem:[%s6387_s21 + $0x4ec] sm:$0xf]  ;;  %v5017_v1 = vld [vmem:[%s6387_s21 + $0x500] sm:$0xf0] }
 0x23b   : > { %v2169_v26 = vpop.f32.mrf.mxu0 }
 0x23c   : > { %v2170_v28 = vadd.f32 %v6920_v41, %v2169_v26  ;;  %v2338_v34 = vpop.f32.mrf.mxu1 }
 0x23e   : > { %v7035_v35 = vadd.f32 %v2338_v34, %v2170_v28 }
 0x241   : > { %v2656_v27 = vpop.f32.mrf.mxu3 }
 0x242   : > { %v7046_v63 = vadd.f32 %v2656_v27, %v6954_v9  ;;  %v4399_v27 = vld [vmem:[%s6387_s21 + $0x10] sm:$0xf] }
 0x243   : > { %v2172_v0 = vpop.f32.mrf.mxu0 }
 0x244   : > { %v2173_v26 = vadd.f32 %v6920_v41, %v2172_v0  ;;  %v2341_v28 = vpop.f32.mrf.mxu1  ;;  %v5661_v0 = vld [vmem:[%s6387_s21 + $0x5bc] sm:$0xf0] }
 0x246   : > { %v7049_v34 = vadd.f32 %v2341_v28, %v2173_v26  ;;  %2211 = vmatmul.bf16.gmra.mxu0 %v5080_v17  ;;  %2698 = vmatmul.bf16.gmra.mxu3 %v4996_v20  ;;  %v5482_v17 = vld [vmem:[%s6387_s21 + $0x24] sm:$0xf0]  ;;  %v5479_v20 = vld [vmem:[%s6387_s21 + $0x14] sm:$0xf]  ;;  %v4401_v26 = vld [vmem:[%s6387_s21 + $0x28] sm:$0xf0] }
 0x247   : > { %2380 = vmatmul.bf16.gmra.mxu1 %v5084_v21  ;;  %v4400_v28 = vor.u32 %v5482_v17, %v4399_v27 }
 0x248   : > { %2549 = vmatmul.bf16.gmra.mxu2 %v5088_v11 }
 0x249   : > { %v2659_v9 = vpop.f32.mrf.mxu3 }
 0x24a   : > { %v7052_v45 = vadd.f32 %v2659_v9, %v6963_v10  ;;  %v5020_v10 = vor.u32 %v5634_v60, %v5017_v1 }
 0x24b   : > { %v2174_v2 = vpop.f32.mrf.mxu0 }
 0x24c   : > { %v2175_v37 = vadd.f32 %v6920_v41, %v2174_v2  ;;  %v2343_v36 = vpop.f32.mrf.mxu1  ;;  %v5112_v2 = vor.u32 %v5661_v0, %v5111_v49  ;;  %v5135_v0 = vld [vmem:[%s6387_s21 + $0x5d8] sm:$0xf] }
 0x24e   : > { %v7055_v39 = vadd.f32 %v2343_v36, %v2175_v37  ;;  %v4404_v37 = vor.u32 %v5479_v20, %v4401_v26  ;;  %v5041_v20 = vld [vmem:[%s6387_s21 + $0x530] sm:$0xf0]  ;;  %v4423_v26 = vld [vmem:[%s6387_s21 + $0x40] sm:$0xf] }
 0x251   : > { %v2661_v21 = vpop.f32.mrf.mxu3 }
 0x252   : > { %v7066_v11 = vadd.f32 %v2661_v21, %v6980_v46  ;;  %v5488_v21 = vld [vmem:[%s6387_s21 + $0x54] sm:$0xf0] }
 0x253   : > { %v2177_v9 = vpop.f32.mrf.mxu0 }
 0x254   : > { %v2178_v36 = vadd.f32 %v6920_v41, %v2177_v9  ;;  %v2346_v47 = vpop.f32.mrf.mxu1  ;;  %v4425_v9 = vld [vmem:[%s6387_s21 + $0x58] sm:$0xf0] }
 0x256   : > { %v7069_v33 = vadd.f32 %v2346_v47, %v2178_v36  ;;  %2703 = vmatmul.bf16.gmra.mxu3 %v5020_v10  ;;  %2742 = vmatmul.bf16.vlgmr.msrb.gmra.mxu0 %v4400_v28  ;;  %v5640_v47 = vld [vmem:[%s6387_s21 + $0x51c] sm:$0xf]  ;;  %v5667_v10 = vld [vmem:[%s6387_s21 + $0x5ec] sm:$0xf0]  ;;  %v5485_v28 = vld [vmem:[%s6387_s21 + $0x44] sm:$0xf]  ;;  %v4424_v36 = vor.u32 %v5488_v21, %v4423_v26 }
 0x257   : > { %2911 = vmatmul.bf16.vlgmr.msrb.gmra.mxu1 %v4404_v37 }
 0x258   : > { %2554 = vmatmul.bf16.gmra.mxu2 %v5112_v2 }
 0x259   : > { %v2664_v46 = vpop.f32.mrf.mxu3 }
 0x25a   : > { %v7072_v49 = vadd.f32 %v2664_v46, %v6986_v57  ;;  %v5044_v57 = vor.u32 %v5640_v47, %v5041_v20 }
 0x25b   : > { %v2179_v60 = vpop.f32.mrf.mxu0 }
 0x25c   : > { %v2180_v1 = vadd.f32 %v6920_v41, %v2179_v60  ;;  %v2348_v27 = vpop.f32.mrf.mxu1  ;;  %v5136_v60 = vor.u32 %v5667_v10, %v5135_v0  ;;  %v5646_v10 = vld [vmem:[%s6387_s21 + $0x54c] sm:$0xf] }
 0x25e   : > { %v7075_v17 = vadd.f32 %v2348_v27, %v2180_v1  ;;  %v4428_v1 = vor.u32 %v5485_v28, %v4425_v9  ;;  %v5065_v28 = vld [vmem:[%s6387_s21 + $0x560] sm:$0xf0]  ;;  %v4447_v9 = vld [vmem:[%s6387_s21 + $0x70] sm:$0xf] }
 0x260   : > { %7931 = vst [vmem:[#allocation35_spill] sm:$0xff] %v7075_v17 }
 0x261   : > { %v2666_v2 = vpop.f32.mrf.mxu3 }
 0x262   : > { %v7086_v37 = vadd.f32 %v2666_v2, %v7000_v62  ;;  %v5491_v2 = vld [vmem:[%s6387_s21 + $0x74] sm:$0xf] }
 0x263   : > { %v2182_v46 = vpop.f32.mrf.mxu0 }
 0x264   : > { %v2183_v27 = vadd.f32 %v6920_v41, %v2182_v46  ;;  %v2351_v14 = vpop.f32.mrf.mxu1  ;;  %v4449_v46 = vld [vmem:[%s6387_s21 + $0x88] sm:$0xf0] }
 0x266   : > { %v7089_v17 = vadd.f32 %v2351_v14, %v2183_v27  ;;  %2708 = vmatmul.bf16.gmra.mxu3 %v5044_v57  ;;  %2747 = vmatmul.bf16.gmra.mxu0 %v4424_v36  ;;  %v5494_v14 = vld [vmem:[%s6387_s21 + $0x84] sm:$0xf0]  ;;  %v4452_v27 = vor.u32 %v5491_v2, %v4449_v46  ;;  %v5497_v2 = vld [vmem:[%s6387_s21 + $0xa4] sm:$0xf]  ;;  %v4473_v46 = vld [vmem:[%s6387_s21 + $0xb8] sm:$0xf0] }
 0x267   : > { %2916 = vmatmul.bf16.gmra.mxu1 %v4428_v1 }
 0x268   : > { %2559 = vmatmul.bf16.gmra.mxu2 %v5136_v60  ;;  %v4448_v60 = vor.u32 %v5494_v14, %v4447_v9  ;;  %v5089_v9 = vld [vmem:[%s6387_s21 + $0x590] sm:$0xf0]  ;;  %v4471_v14 = vld [vmem:[%s6387_s21 + $0xa0] sm:$0xf] }
 0x269   : > { %v2669_v62 = vpop.f32.mrf.mxu3 }
 0x26a   : > { %v7092_v47 = vadd.f32 %v2669_v62, %v7006_v6  ;;  %v5068_v6 = vor.u32 %v5646_v10, %v5065_v28  ;;  %v5652_v28 = vld [vmem:[%s6387_s21 + $0x57c] sm:$0xf] }
 0x26b   : > { %v2184_v0 = vpop.f32.mrf.mxu0 }
 0x26c   : > { %v2185_v20 = vadd.f32 %v6920_v41, %v2184_v0  ;;  %v2353_v26 = vpop.f32.mrf.mxu1 }
 0x26e   : > { %v7095_v21 = vadd.f32 %v2353_v26, %v2185_v20 }
 0x270   : > { %7932 = vst [vmem:[#allocation36_spill] sm:$0xff] %v7095_v21  ;;  %v5500_v21 = vld [vmem:[%s6387_s21 + $0xb4] sm:$0xf0] }
 0x271   : > { %v2671_v57 = vpop.f32.mrf.mxu3 }
 0x272   : > { %v7104_v36 = vadd.f32 %v2671_v57, %v7026_v4 }
 0x273   : > { %v2187_v1 = vpop.f32.mrf.mxu0 }
 0x274   : > { %v2188_v62 = vadd.f32 %v6920_v41, %v2187_v1  ;;  %v2356_v0 = vpop.f32.mrf.mxu1  ;;  %v5092_v1 = vor.u32 %v5652_v28, %v5089_v9  ;;  %v5113_v9 = vld [vmem:[%s6387_s21 + $0x5c0] sm:$0xf0] }
 0x276   : > { %v7107_v20 = vadd.f32 %v2356_v0, %v2188_v62  ;;  %2713 = vmatmul.bf16.gmra.mxu3 %v5068_v6  ;;  %2752 = vmatmul.bf16.gmra.mxu0 %v4448_v60  ;;  %v4472_v62 = vor.u32 %v5500_v21, %v4471_v14  ;;  %v4476_v60 = vor.u32 %v5497_v2, %v4473_v46  ;;  %v5658_v21 = vld [vmem:[%s6387_s21 + $0x5ac] sm:$0xf]  ;;  %v4495_v14 = vld [vmem:[%s6387_s21 + $0xd0] sm:$0xf]  ;;  %v5503_v2 = vld [vmem:[%s6387_s21 + $0xd4] sm:$0xf] }
 0x277   : > { %2921 = vmatmul.bf16.gmra.mxu1 %v4452_v27  ;;  %v4497_v46 = vld [vmem:[%s6387_s21 + $0xe8] sm:$0xf0] }
 0x278   : > { %7933 = vst [vmem:[#allocation37_spill] sm:$0xff] %v7107_v20  ;;  %v5506_v20 = vld [vmem:[%s6387_s21 + $0xe4] sm:$0xf0] }
 0x27b   : > { %v2189_v26 = vpop.f32.mrf.mxu0 }
 0x27c   : > { %v2190_v4 = vadd.f32 %v6920_v41, %v2189_v26  ;;  %v2358_v57 = vpop.f32.mrf.mxu1 }
 0x27e   : > { %v7110_v10 = vadd.f32 %v2358_v57, %v2190_v4 }
 0x280   : > { %7934 = vst [vmem:[#allocation38_spill] sm:$0xff] %v7110_v10 }
 0x283   : > { %v2192_v6 = vpop.f32.mrf.mxu0 }
 0x284   : > { %v2193_v27 = vadd.f32 %v6920_v41, %v2192_v6  ;;  %v2361_v0 = vpop.f32.mrf.mxu1  ;;  %v5116_v6 = vor.u32 %v5658_v21, %v5113_v9  ;;  %v5137_v9 = vld [vmem:[%s6387_s21 + $0x5f0] sm:$0xf0] }
 0x286   : > { %v7119_v26 = vadd.f32 %v2361_v0, %v2193_v27  ;;  %2718 = vmatmul.bf16.gmra.mxu3 %v5092_v1  ;;  %2757 = vmatmul.bf16.gmra.mxu0 %v4472_v62  ;;  %v4496_v27 = vor.u32 %v5506_v20, %v4495_v14  ;;  %v4500_v62 = vor.u32 %v5503_v2, %v4497_v46  ;;  %v5664_v20 = vld [vmem:[%s6387_s21 + $0x5dc] sm:$0xf]  ;;  %v4519_v14 = vld [vmem:[%s6387_s21 + $0x100] sm:$0xf]  ;;  %v5509_v2 = vld [vmem:[%s6387_s21 + $0x104] sm:$0xf] }
 0x287   : > { %2926 = vmatmul.bf16.gmra.mxu1 %v4476_v60  ;;  %v4521_v46 = vld [vmem:[%s6387_s21 + $0x118] sm:$0xf0] }
 0x288   : > { %7935 = vst [vmem:[#allocation39_spill] sm:$0xff] %v7119_v26  ;;  %v5512_v26 = vld [vmem:[%s6387_s21 + $0x114] sm:$0xf0] }
 0x28b   : > { %v2194_v4 = vpop.f32.mrf.mxu0 }
 0x28c   : > { %v2195_v57 = vadd.f32 %v6920_v41, %v2194_v4  ;;  %v2363_v10 = vpop.f32.mrf.mxu1 }
 0x28e   : > { %v7122_v28 = vadd.f32 %v2363_v10, %v2195_v57 }
 0x290   : > { %7936 = vst [vmem:[#allocation40_spill] sm:$0xff] %v7122_v28 }
 0x293   : > { %v2197_v1 = vpop.f32.mrf.mxu0 }
 0x294   : > { %v2198_v60 = vadd.f32 %v6920_v41, %v2197_v1  ;;  %v2366_v10 = vpop.f32.mrf.mxu1  ;;  %v5140_v1 = vor.u32 %v5664_v20, %v5137_v9  ;;  %v4543_v20 = vld [vmem:[%s6387_s21 + $0x130] sm:$0xf]  ;;  %v5518_v9 = vld [vmem:[%s6387_s21 + $0x144] sm:$0xf0] }
 0x296   : > { %v7131_v0 = vadd.f32 %v2366_v10, %v2198_v60  ;;  %2723 = vmatmul.bf16.gmra.mxu3 %v5116_v6  ;;  %2762 = vmatmul.bf16.gmra.mxu0 %v4496_v27  ;;  %v4520_v60 = vor.u32 %v5512_v26, %v4519_v14  ;;  %v4524_v27 = vor.u32 %v5509_v2, %v4521_v46  ;;  %v5515_v26 = vld [vmem:[%s6387_s21 + $0x134] sm:$0xf]  ;;  %v4545_v14 = vld [vmem:[%s6387_s21 + $0x148] sm:$0xf0] }
 0x297   : > { %2931 = vmatmul.bf16.gmra.mxu1 %v4500_v62  ;;  %v4544_v2 = vor.u32 %v5518_v9, %v4543_v20  ;;  %v4567_v20 = vld [vmem:[%s6387_s21 + $0x160] sm:$0xf]  ;;  %v5524_v9 = vld [vmem:[%s6387_s21 + $0x174] sm:$0xf0] }
 0x298   : > { %7937 = vst [vmem:[#allocation41_spill] sm:$0xff] %v7131_v0 }
 0x29b   : > { %v2199_v4 = vpop.f32.mrf.mxu0 }
 0x29c   : > { %v2200_v57 = vadd.f32 %v6920_v41, %v2199_v4  ;;  %v2368_v28 = vpop.f32.mrf.mxu1 }
 0x29e   : > { %v7134_v21 = vadd.f32 %v2368_v28, %v2200_v57 }
 0x2a0   : > { %7938 = vst [vmem:[#allocation42_spill] sm:$0xff] %v7134_v21 }
 0x2a3   : > { %v2202_v6 = vpop.f32.mrf.mxu0 }
 0x2a4   : > { %v2203_v62 = vadd.f32 %v6920_v41, %v2202_v6  ;;  %v2371_v10 = vpop.f32.mrf.mxu1  ;;  %v4548_v6 = vor.u32 %v5515_v26, %v4545_v14  ;;  %v5521_v26 = vld [vmem:[%s6387_s21 + $0x164] sm:$0xf]  ;;  %v4569_v14 = vld [vmem:[%s6387_s21 + $0x178] sm:$0xf0] }
 0x2a6   : > { %v7143_v4 = vadd.f32 %v2371_v10, %v2203_v62  ;;  %2728 = vmatmul.bf16.gmra.mxu3 %v5140_v1  ;;  %2767 = vmatmul.bf16.gmra.mxu0 %v4520_v60  ;;  %v3207_v62 = vld [vmem:[#allocation9 + $0x18] sm:$0xff] }
 0x2a7   : > { %2936 = vmatmul.bf16.gmra.mxu1 %v4524_v27  ;;  %3317 = vmatpush.msrb.mxu2 %v3207_v62 }
 0x2a8   : > { %5733 = vmatpush.msrb.mxu3 %v3207_v62 }
 0x2ab   : > { %v2204_v28 = vpop.f32.mrf.mxu0 }
 0x2ac   : > { %v2205_v57 = vadd.f32 %v6920_v41, %v2204_v28  ;;  %v2373_v21 = vpop.f32.mrf.mxu1 }
 0x2ae   : > { %v7146_v0 = vadd.f32 %v2373_v21, %v2205_v57 }
 0x2b0   : > { %7939 = vst [vmem:[#allocation43_spill] sm:$0xff] %v7146_v0  ;;  %v5530_v0 = vld [vmem:[%s6387_s21 + $0x1a4] sm:$0xf0] }
 0x2b3   : > { %v2207_v46 = vpop.f32.mrf.mxu0 }
 0x2b4   : > { %v2208_v1 = vadd.f32 %v6920_v41, %v2207_v46  ;;  %v2376_v60 = vpop.f32.mrf.mxu1  ;;  %v4568_v46 = vor.u32 %v5524_v9, %v4567_v20  ;;  %v5527_v20 = vld [vmem:[%s6387_s21 + $0x194] sm:$0xf]  ;;  %v4593_v9 = vld [vmem:[%s6387_s21 + $0x1a8] sm:$0xf0] }
 0x2b6   : > { %v7153_v27 = vadd.f32 %v2376_v60, %v2208_v1  ;;  %2772 = vmatmul.bf16.gmra.mxu0 %v4544_v2 }
 0x2b7   : > { %2941 = vmatmul.bf16.gmra.mxu1 %v4548_v6  ;;  %v4572_v6 = vor.u32 %v5521_v26, %v4569_v14 }
 0x2b8   : > { %7940 = vst [vmem:[#allocation44_spill] sm:$0xff] %v7153_v27  ;;  %v4591_v27 = vld [vmem:[%s6387_s21 + $0x190] sm:$0xf] }
 0x2b9   : > { %v4592_v26 = vor.u32 %v5530_v0, %v4591_v27  ;;  %v5533_v0 = vld [vmem:[%s6387_s21 + $0x1c4] sm:$0xf]  ;;  %v4617_v27 = vld [vmem:[%s6387_s21 + $0x1d8] sm:$0xf0] }
 0x2bb   : > { %v2209_v21 = vpop.f32.mrf.mxu0 }
 0x2bc   : > { %v2210_v10 = vadd.f32 %v6920_v41, %v2209_v21  ;;  %v2378_v28 = vpop.f32.mrf.mxu1 }
 0x2be   : > { %v7156_v57 = vadd.f32 %v2378_v28, %v2210_v10 }
 0x2c0   : > { %7941 = vst [vmem:[#allocation45_spill] sm:$0xff] %v7156_v57 }
 0x2c3   : > { %v2212_v2 = vpop.f32.mrf.mxu0 }
 0x2c4   : > { %v2213_v1 = vadd.f32 %v6920_v41, %v2212_v2  ;;  %v2381_v60 = vpop.f32.mrf.mxu1  ;;  %v4596_v2 = vor.u32 %v5527_v20, %v4593_v9  ;;  %v4620_v9 = vor.u32 %v5533_v0, %v4617_v27 }
 0x2c6   : > { %v7163_v21 = vadd.f32 %v2381_v60, %v2213_v1  ;;  %2777 = vmatmul.bf16.gmra.mxu0 %v4568_v46 }
 0x2c7   : > { %2946 = vmatmul.bf16.gmra.mxu1 %v4572_v6 }
 0x2cb   : > { %v2214_v62 = vpop.f32.mrf.mxu0 }
 0x2cc   : > { %v2215_v10 = vadd.f32 %v6920_v41, %v2214_v62  ;;  %v2383_v28 = vpop.f32.mrf.mxu1 }
 0x2ce   : > { %v7166_v57 = vadd.f32 %v2383_v28, %v2215_v10  ;;  %v4615_v28 = vld [vmem:[%s6387_s21 + $0x1c0] sm:$0xf] }
 0x2d0   : > { %7942 = vst [vmem:[#allocation46_spill] sm:$0xff] %v7166_v57  ;;  %v5536_v57 = vld [vmem:[%s6387_s21 + $0x1d4] sm:$0xf0] }
 0x2d3   : > { %v2743_v14 = vpop.f32.mrf.mxu0 }
 0x2d4   : > { %v2744_v46 = vadd.f32 %v2743_v14, %v6678_v18  ;;  %v2912_v6 = vpop.f32.mrf.mxu1  ;;  %v4616_v18 = vor.u32 %v5536_v57, %v4615_v28  ;;  %v5539_v57 = vld [vmem:[%s6387_s21 + $0x1f4] sm:$0xf]  ;;  %v4641_v28 = vld [vmem:[%s6387_s21 + $0x208] sm:$0xf0] }
 0x2d5   : > { %v4644_v27 = vor.u32 %v5539_v57, %v4641_v28 }
 0x2d6   : > { %v7173_v1 = vadd.f32 %v2912_v6, %v2744_v46  ;;  %2782 = vmatmul.bf16.gmra.mxu0 %v4592_v26 }
 0x2d7   : > { %2951 = vmatmul.bf16.gmra.mxu1 %v4596_v2 }
 0x2db   : > { %v2745_v41 = vpop.f32.mrf.mxu0 }
 0x2dc   : > { %v2746_v60 = vadd.f32 %v2745_v41, %v6692_v24  ;;  %v2914_v62 = vpop.f32.mrf.mxu1 }
 0x2de   : > { %v7176_v10 = vadd.f32 %v2914_v62, %v2746_v60  ;;  %v4639_v60 = vld [vmem:[%s6387_s21 + $0x1f0] sm:$0xf]  ;;  %v5542_v62 = vld [vmem:[%s6387_s21 + $0x204] sm:$0xf0] }
 0x2e3   : > { %v2748_v20 = vpop.f32.mrf.mxu0 }
 0x2e4   : > { %v2749_v26 = vadd.f32 %v2748_v20, %v6698_v52  ;;  %v2917_v14 = vpop.f32.mrf.mxu1  ;;  %v4640_v52 = vor.u32 %v5542_v62, %v4639_v60  ;;  %v5545_v60 = vld [vmem:[%s6387_s21 + $0x224] sm:$0xf]  ;;  %v4665_v62 = vld [vmem:[%s6387_s21 + $0x238] sm:$0xf0] }
 0x2e5   : > { %v4668_v28 = vor.u32 %v5545_v60, %v4665_v62 }
 0x2e6   : > { %v7183_v2 = vadd.f32 %v2917_v14, %v2749_v26  ;;  %2787 = vmatmul.bf16.gmra.mxu0 %v4616_v18 }
 0x2e7   : > { %2956 = vmatmul.bf16.gmra.mxu1 %v4620_v9 }
 0x2eb   : > { %v2750_v24 = vpop.f32.mrf.mxu0 }
 0x2ec   : > { %v2751_v46 = vadd.f32 %v2750_v24, %v6712_v50  ;;  %v2919_v6 = vpop.f32.mrf.mxu1 }
 0x2ee   : > { %v7186_v41 = vadd.f32 %v2919_v6, %v2751_v46  ;;  %v4663_v46 = vld [vmem:[%s6387_s21 + $0x220] sm:$0xf]  ;;  %v5548_v6 = vld [vmem:[%s6387_s21 + $0x234] sm:$0xf0] }
 0x2f3   : > { %v2753_v0 = vpop.f32.mrf.mxu0 }
 0x2f4   : > { %v2754_v18 = vadd.f32 %v2753_v0, %v6724_v23  ;;  %v2922_v20 = vpop.f32.mrf.mxu1  ;;  %v4664_v23 = vor.u32 %v5548_v6, %v4663_v46  ;;  %v5551_v46 = vld [vmem:[%s6387_s21 + $0x254] sm:$0xf]  ;;  %v4689_v6 = vld [vmem:[%s6387_s21 + $0x268] sm:$0xf0] }
 0x2f5   : > { %v4692_v62 = vor.u32 %v5551_v46, %v4689_v6 }
 0x2f6   : > { %v7193_v9 = vadd.f32 %v2922_v20, %v2754_v18  ;;  %2792 = vmatmul.bf16.gmra.mxu0 %v4640_v52 }
 0x2f7   : > { %2961 = vmatmul.bf16.gmra.mxu1 %v4644_v27 }
 0x2fb   : > { %v2755_v50 = vpop.f32.mrf.mxu0 }
 0x2fc   : > { %v2756_v26 = vadd.f32 %v2755_v50, %v6738_v16  ;;  %v2924_v14 = vpop.f32.mrf.mxu1 }
 0x2fe   : > { %v7196_v24 = vadd.f32 %v2924_v14, %v2756_v26  ;;  %v4687_v26 = vld [vmem:[%s6387_s21 + $0x250] sm:$0xf]  ;;  %v5554_v14 = vld [vmem:[%s6387_s21 + $0x264] sm:$0xf0] }
 0x303   : > { %v2758_v57 = vpop.f32.mrf.mxu0 }
 0x304   : > { %v2759_v52 = vadd.f32 %v2758_v57, %v6744_v58  ;;  %v2927_v0 = vpop.f32.mrf.mxu1  ;;  %v4688_v58 = vor.u32 %v5554_v14, %v4687_v26  ;;  %v5557_v26 = vld [vmem:[%s6387_s21 + $0x284] sm:$0xf]  ;;  %v4713_v14 = vld [vmem:[%s6387_s21 + $0x298] sm:$0xf0] }
 0x305   : > { %v4716_v6 = vor.u32 %v5557_v26, %v4713_v14 }
 0x306   : > { %v7203_v27 = vadd.f32 %v2927_v0, %v2759_v52  ;;  %2797 = vmatmul.bf16.gmra.mxu0 %v4664_v23 }
 0x307   : > { %2966 = vmatmul.bf16.gmra.mxu1 %v4668_v28 }
 0x30b   : > { %v2760_v16 = vpop.f32.mrf.mxu0 }
 0x30c   : > { %v2761_v18 = vadd.f32 %v2760_v16, %v6758_v51  ;;  %v2929_v20 = vpop.f32.mrf.mxu1 }
 0x30e   : > { %v7206_v50 = vadd.f32 %v2929_v20, %v2761_v18  ;;  %v4711_v18 = vld [vmem:[%s6387_s21 + $0x280] sm:$0xf]  ;;  %v5560_v20 = vld [vmem:[%s6387_s21 + $0x294] sm:$0xf0] }
 0x313   : > { %v2763_v60 = vpop.f32.mrf.mxu0 }
 0x314   : > { %v2764_v23 = vadd.f32 %v2763_v60, %v6764_v31  ;;  %v2932_v57 = vpop.f32.mrf.mxu1  ;;  %v4712_v31 = vor.u32 %v5560_v20, %v4711_v18 }
 0x316   : > { %v7213_v28 = vadd.f32 %v2932_v57, %v2764_v23  ;;  %2802 = vmatmul.bf16.gmra.mxu0 %v4688_v58 }
 0x317   : > { %2971 = vmatmul.bf16.gmra.mxu1 %v4692_v62 }
 0x318   : > { %7943 = vst [vmem:[#allocation47_spill] sm:$0xff] %v7213_v28  ;;  %v4737_v28 = vld [vmem:[%s6387_s21 + $0x2c8] sm:$0xf0] }
 0x31b   : > { %v2765_v51 = vpop.f32.mrf.mxu0 }
 0x31c   : > { %v2766_v52 = vadd.f32 %v2765_v51, %v6778_v19  ;;  %v2934_v0 = vpop.f32.mrf.mxu1 }
 0x31e   : > { %v7216_v16 = vadd.f32 %v2934_v0, %v2766_v52  ;;  %v4735_v52 = vld [vmem:[%s6387_s21 + $0x2b0] sm:$0xf]  ;;  %v5566_v0 = vld [vmem:[%s6387_s21 + $0x2c4] sm:$0xf0] }
 0x31f   : > { %v4736_v18 = vor.u32 %v5566_v0, %v4735_v52 }
 0x320   : > { %7944 = vst [vmem:[#allocation48_spill] sm:$0xff] %v7216_v16  ;;  %v5563_v16 = vld [vmem:[%s6387_s21 + $0x2b4] sm:$0xf] }
 0x323   : > { %v2768_v46 = vpop.f32.mrf.mxu0 }
 0x324   : > { %v2769_v58 = vadd.f32 %v2768_v46, %v6784_v7  ;;  %v2937_v60 = vpop.f32.mrf.mxu1  ;;  %v4740_v7 = vor.u32 %v5563_v16, %v4737_v28  ;;  %v5572_v28 = vld [vmem:[%s6387_s21 + $0x2f4] sm:$0xf0]  ;;  %v5569_v16 = vld [vmem:[%s6387_s21 + $0x2e4] sm:$0xf] }
 0x326   : > { %v7223_v62 = vadd.f32 %v2937_v60, %v2769_v58  ;;  %2807 = vmatmul.bf16.gmra.mxu0 %v4712_v31 }
 0x327   : > { %2976 = vmatmul.bf16.gmra.mxu1 %v4716_v6 }
 0x32b   : > { %v2770_v19 = vpop.f32.mrf.mxu0 }
 0x32c   : > { %v2771_v23 = vadd.f32 %v2770_v19, %v6801_v30  ;;  %v2939_v57 = vpop.f32.mrf.mxu1  ;;  %v3206_v30 = vld [vmem:[#allocation9 + $0x10] sm:$0xff]  ;;  %v4759_v19 = vld [vmem:[%s6387_s21 + $0x2e0] sm:$0xf] }
 0x32d   : > { %3318 = vmatpush.msrb.mxu2 %v3206_v30  ;;  %5734 = vmatpush.msrb.mxu3 %v3206_v30  ;;  %v4783_v30 = vld [vmem:[%s6387_s21 + $0x310] sm:$0xf] }
 0x32e   : > { %v7226_v51 = vadd.f32 %v2939_v57, %v2771_v23  ;;  %v4760_v23 = vor.u32 %v5572_v28, %v4759_v19 }
 0x333   : > { %v2773_v20 = vpop.f32.mrf.mxu0 }
 0x334   : > { %v2774_v26 = vadd.f32 %v2773_v20, %v6810_v53  ;;  %v2942_v14 = vpop.f32.mrf.mxu1  ;;  %v4761_v53 = vld [vmem:[%s6387_s21 + $0x2f8] sm:$0xf0] }
 0x335   : > { %v4764_v52 = vor.u32 %v5569_v16, %v4761_v53 }
 0x336   : > { %v7233_v31 = vadd.f32 %v2942_v14, %v2774_v26  ;;  %2812 = vmatmul.bf16.gmra.mxu0 %v4736_v18 }
 0x337   : > { %2981 = vmatmul.bf16.gmra.mxu1 %v4740_v7 }
 0x33b   : > { %v2775_v46 = vpop.f32.mrf.mxu0 }
 0x33c   : > { %v2776_v6 = vadd.f32 %v2775_v46, %v6824_v25  ;;  %v2944_v58 = vpop.f32.mrf.mxu1  ;;  %v5578_v46 = vld [vmem:[%s6387_s21 + $0x324] sm:$0xf0] }
 0x33e   : > { %v7236_v60 = vadd.f32 %v2944_v58, %v2776_v6  ;;  %v5575_v6 = vld [vmem:[%s6387_s21 + $0x314] sm:$0xf]  ;;  %v4785_v58 = vld [vmem:[%s6387_s21 + $0x328] sm:$0xf0] }
 0x33f   : > { %v4788_v28 = vor.u32 %v5575_v6, %v4785_v58 }
 0x343   : > { %v2778_v57 = vpop.f32.mrf.mxu0 }
 0x344   : > { %v2779_v0 = vadd.f32 %v2778_v57, %v6830_v29  ;;  %v2947_v18 = vpop.f32.mrf.mxu1  ;;  %v4784_v29 = vor.u32 %v5578_v46, %v4783_v30 }
 0x346   : > { %v7243_v20 = vadd.f32 %v2947_v18, %v2779_v0  ;;  %2817 = vmatmul.bf16.gmra.mxu0 %v4760_v23  ;;  %v4807_v18 = vld [vmem:[%s6387_s21 + $0x340] sm:$0xf] }
 0x347   : > { %2986 = vmatmul.bf16.gmra.mxu1 %v4764_v52 }
 0x34b   : > { %v2780_v25 = vpop.f32.mrf.mxu0 }
 0x34c   : > { %v2781_v7 = vadd.f32 %v2780_v25, %v6844_v59  ;;  %v2949_v26 = vpop.f32.mrf.mxu1  ;;  %v5584_v25 = vld [vmem:[%s6387_s21 + $0x354] sm:$0xf0] }
 0x34e   : > { %v7246_v14 = vadd.f32 %v2949_v26, %v2781_v7  ;;  %v5581_v7 = vld [vmem:[%s6387_s21 + $0x344] sm:$0xf]  ;;  %v4809_v26 = vld [vmem:[%s6387_s21 + $0x358] sm:$0xf0] }
 0x34f   : > { %v4812_v46 = vor.u32 %v5581_v7, %v4809_v26 }
 0x353   : > { %v2783_v19 = vpop.f32.mrf.mxu0 }
 0x354   : > { %v2784_v16 = vadd.f32 %v2783_v19, %v6850_v12  ;;  %v2952_v53 = vpop.f32.mrf.mxu1  ;;  %v4808_v12 = vor.u32 %v5584_v25, %v4807_v18 }
 0x356   : > { %v7253_v23 = vadd.f32 %v2952_v53, %v2784_v16  ;;  %2822 = vmatmul.bf16.gmra.mxu0 %v4784_v29  ;;  %v4831_v53 = vld [vmem:[%s6387_s21 + $0x370] sm:$0xf] }
 0x357   : > { %2991 = vmatmul.bf16.gmra.mxu1 %v4788_v28 }
 0x35b   : > { %v2785_v59 = vpop.f32.mrf.mxu0 }
 0x35c   : > { %v2786_v57 = vadd.f32 %v2785_v59, %v6864_v32  ;;  %v2954_v52 = vpop.f32.mrf.mxu1  ;;  %v5590_v59 = vld [vmem:[%s6387_s21 + $0x384] sm:$0xf0] }
 0x35e   : > { %v7256_v0 = vadd.f32 %v2954_v52, %v2786_v57  ;;  %v5587_v57 = vld [vmem:[%s6387_s21 + $0x374] sm:$0xf]  ;;  %v4833_v52 = vld [vmem:[%s6387_s21 + $0x388] sm:$0xf0] }
 0x35f   : > { %v4836_v25 = vor.u32 %v5587_v57, %v4833_v52 }
 0x363   : > { %v2788_v30 = vpop.f32.mrf.mxu0 }
 0x364   : > { %v2789_v6 = vadd.f32 %v2788_v30, %v6870_v61  ;;  %v2957_v58 = vpop.f32.mrf.mxu1  ;;  %v4832_v61 = vor.u32 %v5590_v59, %v4831_v53 }
 0x366   : > { %v7263_v29 = vadd.f32 %v2957_v58, %v2789_v6  ;;  %2827 = vmatmul.bf16.gmra.mxu0 %v4808_v12  ;;  %v4855_v58 = vld [vmem:[%s6387_s21 + $0x3a0] sm:$0xf] }
 0x367   : > { %2996 = vmatmul.bf16.gmra.mxu1 %v4812_v46 }
 0x36b   : > { %v2790_v32 = vpop.f32.mrf.mxu0 }
 0x36c   : > { %v2791_v19 = vadd.f32 %v2790_v32, %v6890_v48  ;;  %v2959_v28 = vpop.f32.mrf.mxu1  ;;  %v5596_v32 = vld [vmem:[%s6387_s21 + $0x3b4] sm:$0xf0] }
 0x36e   : > { %v7266_v16 = vadd.f32 %v2959_v28, %v2791_v19  ;;  %v5593_v19 = vld [vmem:[%s6387_s21 + $0x3a4] sm:$0xf]  ;;  %v4857_v28 = vld [vmem:[%s6387_s21 + $0x3b8] sm:$0xf0] }
 0x36f   : > { %v4860_v59 = vor.u32 %v5593_v19, %v4857_v28 }
 0x373   : > { %v2793_v18 = vpop.f32.mrf.mxu0 }
 0x374   : > { %v2794_v7 = vadd.f32 %v2793_v18, %v6896_v55  ;;  %v2962_v26 = vpop.f32.mrf.mxu1  ;;  %v4856_v55 = vor.u32 %v5596_v32, %v4855_v58 }
 0x376   : > { %v7273_v12 = vadd.f32 %v2962_v26, %v2794_v7  ;;  %2832 = vmatmul.bf16.gmra.mxu0 %v4832_v61  ;;  %v4879_v26 = vld [vmem:[%s6387_s21 + $0x3d0] sm:$0xf] }
 0x377   : > { %3001 = vmatmul.bf16.gmra.mxu1 %v4836_v25 }
 0x37b   : > { %v2795_v48 = vpop.f32.mrf.mxu0 }
 0x37c   : > { %v2796_v30 = vadd.f32 %v2795_v48, %v6910_v54  ;;  %v2964_v46 = vpop.f32.mrf.mxu1  ;;  %v5602_v48 = vld [vmem:[%s6387_s21 + $0x3e4] sm:$0xf0] }
 0x37e   : > { %v7276_v6 = vadd.f32 %v2964_v46, %v2796_v30  ;;  %v5599_v30 = vld [vmem:[%s6387_s21 + $0x3d4] sm:$0xf]  ;;  %v4881_v46 = vld [vmem:[%s6387_s21 + $0x3e8] sm:$0xf0] }
 0x37f   : > { %v4884_v32 = vor.u32 %v5599_v30, %v4881_v46 }
 0x383   : > { %v2798_v53 = vpop.f32.mrf.mxu0 }
 0x384   : > { %v2799_v57 = vadd.f32 %v2798_v53, %v6916_v44  ;;  %v2967_v52 = vpop.f32.mrf.mxu1  ;;  %v4880_v44 = vor.u32 %v5602_v48, %v4879_v26 }
 0x386   : > { %v7283_v61 = vadd.f32 %v2967_v52, %v2799_v57  ;;  %2837 = vmatmul.bf16.gmra.mxu0 %v4856_v55  ;;  %v4903_v52 = vld [vmem:[%s6387_s21 + $0x400] sm:$0xf] }
 0x387   : > { %3006 = vmatmul.bf16.gmra.mxu1 %v4860_v59 }
 0x38b   : > { %v2800_v54 = vpop.f32.mrf.mxu0 }
 0x38c   : > { %v2801_v18 = vadd.f32 %v2800_v54, %v6932_v15  ;;  %v2969_v25 = vpop.f32.mrf.mxu1  ;;  %v5608_v54 = vld [vmem:[%s6387_s21 + $0x414] sm:$0xf0] }
 0x38d   : > { %v4904_v26 = vor.u32 %v5608_v54, %v4903_v52  ;;  %v4929_v52 = vld [vmem:[%s6387_s21 + $0x448] sm:$0xf0] }
 0x38e   : > { %v7286_v7 = vadd.f32 %v2969_v25, %v2801_v18  ;;  %v5605_v18 = vld [vmem:[%s6387_s21 + $0x404] sm:$0xf]  ;;  %v4905_v25 = vld [vmem:[%s6387_s21 + $0x418] sm:$0xf0] }
 0x38f   : > { %v4908_v48 = vor.u32 %v5605_v18, %v4905_v25 }
 0x393   : > { %v2803_v58 = vpop.f32.mrf.mxu0 }
 0x394   : > { %v2804_v19 = vadd.f32 %v2803_v58, %v6938_v42  ;;  %v2972_v28 = vpop.f32.mrf.mxu1 }
 0x396   : > { %v7293_v55 = vadd.f32 %v2972_v28, %v2804_v19  ;;  %2842 = vmatmul.bf16.gmra.mxu0 %v4880_v44 }
 0x397   : > { %3011 = vmatmul.bf16.gmra.mxu1 %v4884_v32 }
 0x39b   : > { %v2805_v15 = vpop.f32.mrf.mxu0 }
 0x39c   : > { %v2806_v53 = vadd.f32 %v2805_v15, %v6952_v13  ;;  %v2974_v59 = vpop.f32.mrf.mxu1  ;;  %v7305_v13 = vpop.f32.mrf.mxu2  ;;  %v4927_v15 = vld [vmem:[%s6387_s21 + $0x430] sm:$0xf] }
 0x39e   : > { %v7296_v57 = vadd.f32 %v2974_v59, %v2806_v53  ;;  %v5614_v53 = vld [vmem:[%s6387_s21 + $0x444] sm:$0xf0]  ;;  %v5611_v59 = vld [vmem:[%s6387_s21 + $0x434] sm:$0xf] }
 0x39f   : > { %v4928_v54 = vor.u32 %v5614_v53, %v4927_v15  ;;  %v4951_v15 = vld [vmem:[%s6387_s21 + $0x460] sm:$0xf]  ;;  %v5620_v53 = vld [vmem:[%s6387_s21 + $0x474] sm:$0xf0] }
 0x3a0   : > { %7945 = vst [vmem:[#allocation49_spill] sm:$0xff] %v7296_v57 }
 0x3a3   : > { %v2808_v42 = vpop.f32.mrf.mxu0 }
 0x3a4   : > { %v2809_v30 = vadd.f32 %v2808_v42, %v6961_v43  ;;  %v2977_v46 = vpop.f32.mrf.mxu1  ;;  %v4932_v43 = vor.u32 %v5611_v59, %v4929_v52  ;;  %v7314_v25 = vpop.f32.mrf.mxu2  ;;  %v5617_v59 = vld [vmem:[%s6387_s21 + $0x464] sm:$0xf]  ;;  %v4953_v52 = vld [vmem:[%s6387_s21 + $0x478] sm:$0xf0] }
 0x3a6   : > { %v7303_v44 = vadd.f32 %v2977_v46, %v2809_v30  ;;  %2847 = vmatmul.bf16.gmra.mxu0 %v4904_v26  ;;  %v3204_v46 = vld [vmem:[#allocation9] sm:$0xff] }
 0x3a7   : > { %3016 = vmatmul.bf16.gmra.mxu1 %v4908_v48 }
 0x3a8   : > { %7946 = vst [vmem:[#allocation50_spill] sm:$0xff] %v7303_v44 }
 0x3ab   : > { %v2810_v58 = vpop.f32.mrf.mxu0 }
 0x3ac   : > { %v2811_v32 = vadd.f32 %v2810_v58, %v6978_v22  ;;  %v2979_v19 = vpop.f32.mrf.mxu1  ;;  %v3205_v22 = vld [vmem:[#allocation9 + $0x8] sm:$0xff] }
 0x3ad   : > { %3319 = vmatpush.msrb.mxu2 %v3205_v22  ;;  %5735 = vmatpush.msrb.mxu3 %v3205_v22 }
 0x3ae   : > { %v7308_v28 = vadd.f32 %v2979_v19, %v2811_v32 }
 0x3af   : > { %3320 = vmatpush.msrb.mxu2 %v3204_v46  ;;  %5736 = vmatpush.msrb.mxu3 %v3204_v46 }
 0x3b0   : > { %7947 = vst [vmem:[#allocation51_spill] sm:$0xff] %v7308_v28 }
 0x3b3   : > { %v2813_v18 = vpop.f32.mrf.mxu0 }
 0x3b4   : > { %v2814_v26 = vadd.f32 %v2813_v18, %v6984_v38  ;;  %v2982_v42 = vpop.f32.mrf.mxu1  ;;  %v7320_v38 = vpop.f32.mrf.mxu2 }
 0x3b6   : > { %v7317_v48 = vadd.f32 %v2982_v42, %v2814_v26  ;;  %2852 = vmatmul.bf16.gmra.mxu0 %v4928_v54  ;;  %v4952_v54 = vor.u32 %v5620_v53, %v4951_v15  ;;  %v5626_v15 = vld [vmem:[%s6387_s21 + $0x4a4] sm:$0xf0]  ;;  %v5623_v53 = vld [vmem:[%s6387_s21 + $0x494] sm:$0xf] }
 0x3b7   : > { %3021 = vmatmul.bf16.gmra.mxu1 %v4932_v43  ;;  %v4956_v43 = vor.u32 %v5617_v59, %v4953_v52 }
 0x3b8   : > { %7948 = vst [vmem:[#allocation52_spill] sm:$0xff] %v7317_v48  ;;  %v4977_v48 = vld [vmem:[%s6387_s21 + $0x4a8] sm:$0xf0] }
 0x3bb   : > { %v2815_v30 = vpop.f32.mrf.mxu0 }
 0x3bc   : > { %v2816_v58 = vadd.f32 %v2815_v30, %v6998_v56  ;;  %v2984_v32 = vpop.f32.mrf.mxu1  ;;  %v7331_v22 = vpop.f32.mrf.mxu2 }
 0x3be   : > { %v7322_v19 = vadd.f32 %v2984_v32, %v2816_v58 }
 0x3c0   : > { %7949 = vst [vmem:[#allocation53_spill] sm:$0xff] %v7322_v19  ;;  %v4975_v19 = vld [vmem:[%s6387_s21 + $0x490] sm:$0xf] }
 0x3c3   : > { %v2818_v18 = vpop.f32.mrf.mxu0 }
 0x3c4   : > { %v2819_v56 = vadd.f32 %v2818_v18, %v7004_v40  ;;  %v2987_v26 = vpop.f32.mrf.mxu1  ;;  %v7340_v59 = vpop.f32.mrf.mxu2  ;;  %v4976_v40 = vor.u32 %v5626_v15, %v4975_v19  ;;  %v4980_v18 = vor.u32 %v5623_v53, %v4977_v48  ;;  %v4999_v15 = vld [vmem:[%s6387_s21 + $0x4c0] sm:$0xf] }
 0x3c6   : > { %v7329_v42 = vadd.f32 %v2987_v26, %v2819_v56  ;;  %2857 = vmatmul.bf16.gmra.mxu0 %v4952_v54 }
 0x3c7   : > { %3026 = vmatmul.bf16.gmra.mxu1 %v4956_v43 }
 0x3c8   : > { %7950 = vst [vmem:[#allocation54_spill] sm:$0xff] %v7329_v42 }
 0x3cb   : > { %v2820_v30 = vpop.f32.mrf.mxu0 }
 0x3cc   : > { %v2821_v46 = vadd.f32 %v2820_v30, %v7018_v5  ;;  %v2989_v58 = vpop.f32.mrf.mxu1 }
 0x3ce   : > { %v7334_v32 = vadd.f32 %v2989_v58, %v2821_v46  ;;  %v7343_v46 = vpop.f32.mrf.mxu2 }
 0x3d0   : > { %7951 = vst [vmem:[#allocation55_spill] sm:$0xff] %v7334_v32 }
 0x3d3   : > { %v2823_v52 = vpop.f32.mrf.mxu0 }
 0x3d4   : > { %v2824_v54 = vadd.f32 %v2823_v52, %v7032_v3  ;;  %v2992_v43 = vpop.f32.mrf.mxu1  ;;  %v5632_v3 = vld [vmem:[%s6387_s21 + $0x4d4] sm:$0xf0]  ;;  %v5629_v52 = vld [vmem:[%s6387_s21 + $0x4c4] sm:$0xf] }
 0x3d6   : > { %v2993_v56 = vadd.f32 %v2992_v43, %v2824_v54  ;;  %2862 = vmatmul.bf16.gmra.mxu0 %v4976_v40  ;;  %v5001_v54 = vld [vmem:[%s6387_s21 + $0x4d8] sm:$0xf0]  ;;  %v7351_v43 = vpop.f32.mrf.mxu3 }
 0x3d7   : > { %3031 = vmatmul.bf16.gmra.mxu1 %v4980_v18  ;;  %v5000_v18 = vor.u32 %v5632_v3, %v4999_v15 }
 0x3d8   : > { %v3104_v5 = vmax.f32 %v2993_v56, 0.0 }
 0x3da   : > { %v3168_v26 = vmin.f32 %v3104_v5, 1.0  ;;  %v5004_v5 = vor.u32 %v5629_v52, %v5001_v54  ;;  %v5023_v52 = vld [vmem:[%s6387_s21 + $0x4f0] sm:$0xf]  ;;  %v5638_v54 = vld [vmem:[%s6387_s21 + $0x504] sm:$0xf0] }
 0x3db   : > { %v2825_v30 = vpop.f32.mrf.mxu0 }
 0x3dc   : > { %v2826_v19 = vadd.f32 %v2825_v30, %v7046_v63  ;;  %v2994_v58 = vpop.f32.mrf.mxu1  ;;  %5341 = vmatmul.msk.f32.vlgmr.msrb.gmra.mxu2 %vm3208_vm0, %v3168_v26  ;;  %v7355_v26 = vpop.f32.mrf.mxu2 }
 0x3de   : > { %v2995_v48 = vadd.f32 %v2994_v58, %v2826_v19 }
 0x3e0   : > { %v3105_v53 = vmax.f32 %v2995_v48, 0.0  ;;  %v7357_v48 = vpop.f32.mrf.mxu3 }
 0x3e2   : > { %v3169_v40 = vmin.f32 %v3105_v53, 1.0 }
 0x3e3   : > { %v2828_v56 = vpop.f32.mrf.mxu0 }
 0x3e4   : > { %v2829_v32 = vadd.f32 %v2828_v56, %v7052_v45  ;;  %v2997_v63 = vpop.f32.mrf.mxu1  ;;  %5342 = vmatmul.msk.f32.gmra.mxu2 %vm3208_vm0, %v3169_v40  ;;  %v7363_v40 = vpop.f32.mrf.mxu2 }
 0x3e6   : > { %v2998_v30 = vadd.f32 %v2997_v63, %v2829_v32  ;;  %2867 = vmatmul.bf16.gmra.mxu0 %v5000_v18  ;;  %v5635_v32 = vld [vmem:[%s6387_s21 + $0x4f4] sm:$0xf]  ;;  %v5025_v63 = vld [vmem:[%s6387_s21 + $0x508] sm:$0xf0] }
 0x3e7   : > { %3036 = vmatmul.bf16.gmra.mxu1 %v5004_v5  ;;  %v5024_v5 = vor.u32 %v5638_v54, %v5023_v52 }
 0x3e8   : > { %v3106_v19 = vmax.f32 %v2998_v30, 0.0 }
 0x3ea   : > { %v3170_v58 = vmin.f32 %v3106_v19, 1.0  ;;  %v5028_v19 = vor.u32 %v5635_v32, %v5025_v63  ;;  %v5047_v32 = vld [vmem:[%s6387_s21 + $0x520] sm:$0xf]  ;;  %v5644_v63 = vld [vmem:[%s6387_s21 + $0x534] sm:$0xf0] }
 0x3eb   : > { %v2830_v15 = vpop.f32.mrf.mxu0 }
 0x3ec   : > { %v2831_v3 = vadd.f32 %v2830_v15, %v7066_v11  ;;  %v2999_v53 = vpop.f32.mrf.mxu1  ;;  %5343 = vmatmul.msk.f32.gmra.mxu2 %vm3208_vm0, %v3170_v58  ;;  %v7369_v11 = vpop.f32.mrf.mxu3 }
 0x3ee   : > { %v3000_v45 = vadd.f32 %v2999_v53, %v2831_v3  ;;  %v7371_v3 = vpop.f32.mrf.mxu2 }
 0x3f0   : > { %v3107_v56 = vmax.f32 %v3000_v45, 0.0 }
 0x3f2   : > { %v3171_v18 = vmin.f32 %v3107_v56, 1.0 }
 0x3f3   : > { %v2833_v30 = vpop.f32.mrf.mxu0 }
 0x3f4   : > { %v2834_v42 = vadd.f32 %v2833_v30, %v7072_v49  ;;  %v3002_v28 = vpop.f32.mrf.mxu1  ;;  %5344 = vmatmul.msk.f32.gmra.mxu2 %vm3208_vm0, %v3171_v18  ;;  %v7375_v56 = vpop.f32.mrf.mxu3  ;;  %v5048_v30 = vor.u32 %v5644_v63, %v5047_v32 }
 0x3f6   : > { %v3003_v58 = vadd.f32 %v3002_v28, %v2834_v42  ;;  %2872 = vmatmul.bf16.gmra.mxu0 %v5024_v5  ;;  %v5641_v28 = vld [vmem:[%s6387_s21 + $0x524] sm:$0xf]  ;;  %v5049_v42 = vld [vmem:[%s6387_s21 + $0x538] sm:$0xf0]  ;;  %v7381_v44 = vpop.f32.mrf.mxu2 }
 0x3f7   : > { %3041 = vmatmul.bf16.gmra.mxu1 %v5028_v19 }
 0x3f8   : > { %v3108_v15 = vmax.f32 %v3003_v58, 0.0  ;;  %v5052_v58 = vor.u32 %v5641_v28, %v5049_v42  ;;  %v5071_v28 = vld [vmem:[%s6387_s21 + $0x550] sm:$0xf]  ;;  %v5650_v42 = vld [vmem:[%s6387_s21 + $0x564] sm:$0xf0] }
 0x3fa   : > { %v3172_v53 = vmin.f32 %v3108_v15, 1.0 }
 0x3fb   : > { %v2835_v45 = vpop.f32.mrf.mxu0 }
 0x3fc   : > { %v2836_v52 = vadd.f32 %v2835_v45, %v7086_v37  ;;  %v3004_v49 = vpop.f32.mrf.mxu1  ;;  %5345 = vmatmul.msk.f32.gmra.mxu2 %vm3208_vm0, %v3172_v53 }
 0x3fe   : > { %v3005_v54 = vadd.f32 %v3004_v49, %v2836_v52  ;;  %v7385_v52 = vpop.f32.mrf.mxu3 }
 0x400   : > { %v3109_v18 = vmax.f32 %v3005_v54, 0.0 }
 0x402   : > { %v3173_v5 = vmin.f32 %v3109_v18, 1.0 }
 0x403   : > { %v2838_v19 = vpop.f32.mrf.mxu0 }
 0x404   : > { %v2839_v37 = vadd.f32 %v2838_v19, %v7092_v47  ;;  %v3007_v15 = vpop.f32.mrf.mxu1  ;;  %5346 = vmatmul.msk.f32.gmra.mxu2 %vm3208_vm0, %v3173_v5  ;;  %v7389_v47 = vpop.f32.mrf.mxu2  ;;  %v2506_v5 = vadd.f32 %v7305_v13, %v7029_v8  ;;  %v5647_v19 = vld [vmem:[%s6387_s21 + $0x554] sm:$0xf]  ;;  %v2508_v8 = vadd.f32 %v7314_v25, %v7035_v35  ;;  %v2511_v35 = vadd.f32 %v7320_v38, %v7049_v34 }
 0x405   : > { %v2513_v38 = vadd.f32 %v7331_v22, %v7055_v39  ;;  %v5121_v39 = vld [vmem:[%s6387_s21 + $0x5c8] sm:$0xf0] }
 0x406   : > { %v3008_v53 = vadd.f32 %v3007_v15, %v2839_v37  ;;  %2877 = vmatmul.bf16.gmra.mxu0 %v5048_v30  ;;  %v2675_v37 = vadd.f32 %v7351_v43, %v2506_v5 }
 0x407   : > { %3046 = vmatmul.bf16.gmra.mxu1 %v5052_v58  ;;  %v5073_v58 = vld [vmem:[%s6387_s21 + $0x568] sm:$0xf0] }
 0x408   : > { %v3110_v45 = vmax.f32 %v3008_v53, 0.0  ;;  %v5072_v53 = vor.u32 %v5650_v42, %v5071_v28 }
 0x40a   : > { %v3174_v49 = vmin.f32 %v3110_v45, 1.0  ;;  %v7398_v45 = vpop.f32.mrf.mxu3 }
 0x40b   : > { %v2840_v54 = vpop.f32.mrf.mxu0 }
 0x40c   : > { %v2841_v32 = vadd.f32 %v2840_v54, %v7104_v36  ;;  %v3009_v63 = vpop.f32.mrf.mxu1  ;;  %5347 = vmatmul.msk.f32.gmra.mxu2 %vm3208_vm0, %v3174_v49  ;;  %v5076_v54 = vor.u32 %v5647_v19, %v5073_v58  ;;  %v7403_v13 = vpop.f32.mrf.mxu2  ;;  %v5095_v19 = vld [vmem:[%s6387_s21 + $0x580] sm:$0xf]  ;;  %v5656_v58 = vld [vmem:[%s6387_s21 + $0x594] sm:$0xf0] }
 0x40e   : > { %v3010_v18 = vadd.f32 %v3009_v63, %v2841_v32  ;;  %v2677_v63 = vadd.f32 %v7357_v48, %v2508_v8 }
 0x410   : > { %v3111_v30 = vmax.f32 %v3010_v18, 0.0 }
 0x412   : > { %v3175_v15 = vmin.f32 %v3111_v30, 1.0  ;;  %v7407_v30 = vpop.f32.mrf.mxu3 }
 0x413   : > { %v2843_v36 = vpop.f32.mrf.mxu0 }
 0x414   : > { %v2844_v49 = vadd.f32 %v2843_v36, %v2675_v37  ;;  %v3012_v57 = vpop.f32.mrf.mxu1  ;;  %5348 = vmatmul.msk.f32.gmra.mxu2 %vm3208_vm0, %v3175_v15  ;;  %v5653_v37 = vld [vmem:[%s6387_s21 + $0x584] sm:$0xf]  ;;  %v5097_v15 = vld [vmem:[%s6387_s21 + $0x598] sm:$0xf0]  ;;  %v7416_v48 = vpop.f32.mrf.mxu2 }
 0x416   : > { %v3013_v32 = vadd.f32 %v3012_v57, %v2844_v49  ;;  %2882 = vmatmul.bf16.gmra.mxu0 %v5072_v53  ;;  %v2680_v53 = vadd.f32 %v7369_v11, %v2511_v35  ;;  %v5119_v35 = vld [vmem:[%s6387_s21 + $0x5b0] sm:$0xf] }
 0x417   : > { %3051 = vmatmul.bf16.gmra.mxu1 %v5076_v54  ;;  %v5096_v54 = vor.u32 %v5656_v58, %v5095_v19 }
 0x418   : > { %v3112_v43 = vmax.f32 %v3013_v32, 0.0  ;;  %v5100_v32 = vor.u32 %v5653_v37, %v5097_v15  ;;  %v2516_v37 = vadd.f32 %v7340_v59, %v7069_v33  ;;  %v7952_v33 = vld [vmem:[#allocation35_spill] sm:$0xff] }
 0x419   : > { %v2518_v59 = vadd.f32 %v7343_v46, %v7952_v33 }
 0x41a   : > { %v3176_v18 = vmin.f32 %v3112_v43, 1.0  ;;  %v2691_v34 = vpop.f32.mrf.mxu3 }
 0x41b   : > { %v2845_v28 = vpop.f32.mrf.mxu0 }
 0x41c   : > { %v2846_v42 = vadd.f32 %v2845_v28, %v2677_v63  ;;  %v3014_v5 = vpop.f32.mrf.mxu1  ;;  %5349 = vmatmul.msk.f32.gmra.mxu2 %vm3208_vm0, %v3176_v18  ;;  %v2682_v18 = vadd.f32 %v7375_v56, %v2513_v38  ;;  %v2685_v56 = vadd.f32 %v7385_v52, %v2516_v37  ;;  %v2521_v37 = vadd.f32 %v7355_v26, %v7089_v17  ;;  %v7953_v17 = vld [vmem:[#allocation36_spill] sm:$0xff] }
 0x41d   : > { %v2523_v26 = vadd.f32 %v7363_v40, %v7953_v17 }
 0x41e   : > { %v3015_v57 = vadd.f32 %v3014_v5, %v2846_v42  ;;  %v7422_v5 = vpop.f32.mrf.mxu2 }
 0x420   : > { %v3113_v25 = vmax.f32 %v3015_v57, 0.0 }
 0x422   : > { %v3177_v36 = vmin.f32 %v3113_v25, 1.0  ;;  %v5662_v25 = vld [vmem:[%s6387_s21 + $0x5c4] sm:$0xf0]  ;;  %v2694_v22 = vpop.f32.mrf.mxu3 }
 0x423   : > { %v2848_v49 = vpop.f32.mrf.mxu0 }
 0x424   : > { %v2849_v8 = vadd.f32 %v2848_v49, %v2680_v53  ;;  %v3017_v43 = vpop.f32.mrf.mxu1  ;;  %5350 = vmatmul.msk.f32.gmra.mxu2 %vm3208_vm0, %v3177_v36  ;;  %v5659_v53 = vld [vmem:[%s6387_s21 + $0x5b4] sm:$0xf] }
 0x426   : > { %v3018_v63 = vadd.f32 %v3017_v43, %v2849_v8  ;;  %2887 = vmatmul.bf16.gmra.mxu0 %v5096_v54  ;;  %v5120_v54 = vor.u32 %v5662_v25, %v5119_v35  ;;  %v5143_v35 = vld [vmem:[%s6387_s21 + $0x5e0] sm:$0xf]  ;;  %v5668_v25 = vld [vmem:[%s6387_s21 + $0x5f4] sm:$0xf0] }
 0x427   : > { %3056 = vmatmul.bf16.gmra.mxu1 %v5100_v32  ;;  %v5124_v32 = vor.u32 %v5659_v53, %v5121_v39  ;;  %v5665_v53 = vld [vmem:[%s6387_s21 + $0x5e4] sm:$0xf]  ;;  %v5145_v39 = vld [vmem:[%s6387_s21 + $0x5f8] sm:$0xf0]  ;;  %s4380_s21 = sshll.u32 %s6383_s14, 1 }
 0x428   : > { %v3114_v11 = vmax.f32 %v3018_v63, 0.0  ;;  %v7433_v63 = vpop.f32.mrf.mxu2  ;;  %s515_s9 = scalar_lea.vmem [#allocation17], %s4380_s21 }
 0x429   : > { %s4217_s22 = sshll.u32 %s515_s9, 4  ;;  %s4218_s22 = int_to_ptr.vmem [resolvable:$true] %s4217_s22 }
 0x42a   : > { %v3178_v28 = vmin.f32 %v3114_v11, 1.0  ;;  %v2687_v11 = vadd.f32 %v7398_v45, %v2518_v59  ;;  %v2690_v45 = vadd.f32 %v7407_v30, %v2521_v37  ;;  %v2692_v59 = vadd.f32 %v2691_v34, %v2523_v26 }
 0x42b   : > { %v2850_v42 = vpop.f32.mrf.mxu0 }
 0x42c   : > { %v2851_v57 = vadd.f32 %v2850_v42, %v2682_v18  ;;  %v3019_v19 = vpop.f32.mrf.mxu1  ;;  %5351 = vmatmul.msk.f32.gmra.mxu2 %vm3208_vm0, %v3178_v28  ;;  %v2696_v28 = vpop.f32.mrf.mxu3 }
 0x42e   : > { %v3020_v58 = vadd.f32 %v3019_v19, %v2851_v57 }
 0x430   : > { %v3115_v15 = vmax.f32 %v3020_v58, 0.0 }
 0x432   : > { %v3179_v36 = vmin.f32 %v3115_v15, 1.0  ;;  %v7443_v15 = vpop.f32.mrf.mxu2 }
 0x433   : > { %v2853_v49 = vpop.f32.mrf.mxu0 }
 0x434   : > { %v2854_v8 = vadd.f32 %v2853_v49, %v2685_v56  ;;  %v3022_v43 = vpop.f32.mrf.mxu1  ;;  %5352 = vmatmul.msk.f32.gmra.mxu2 %vm3208_vm0, %v3179_v36  ;;  %v5144_v36 = vor.u32 %v5668_v25, %v5143_v35  ;;  %v5148_v49 = vor.u32 %v5665_v53, %v5145_v39 }
 0x436   : > { %v3023_v38 = vadd.f32 %v3022_v43, %v2854_v8  ;;  %2892 = vmatmul.bf16.gmra.mxu0 %v5120_v54  ;;  %v2699_v43 = vpop.f32.mrf.mxu3 }
 0x437   : > { %3061 = vmatmul.bf16.gmra.mxu1 %v5124_v32 }
 0x438   : > { %v3116_v52 = vmax.f32 %v3023_v38, 0.0 }
 0x43a   : > { %v3180_v18 = vmin.f32 %v3116_v52, 1.0  ;;  %v7451_v52 = vpop.f32.mrf.mxu2 }
 0x43b   : > { %v2855_v42 = vpop.f32.mrf.mxu0 }
 0x43c   : > { %v2856_v57 = vadd.f32 %v2855_v42, %v2687_v11  ;;  %v3024_v19 = vpop.f32.mrf.mxu1  ;;  %5353 = vmatmul.msk.f32.gmra.mxu2 %vm3208_vm0, %v3180_v18 }
 0x43e   : > { %v3025_v58 = vadd.f32 %v3024_v19, %v2856_v57  ;;  %v2701_v19 = vpop.f32.mrf.mxu3 }
 0x440   : > { %v3117_v46 = vmax.f32 %v3025_v58, 0.0  ;;  %v7954_v58 = vld [vmem:[#allocation37_spill] sm:$0xff] }
 0x441   : > { %v2526_v35 = vadd.f32 %v7371_v3, %v7954_v58 }
 0x442   : > { %v3181_v56 = vmin.f32 %v3117_v46, 1.0  ;;  %v7456_v40 = vpop.f32.mrf.mxu2 }
 0x443   : > { %v2858_v54 = vpop.f32.mrf.mxu0  ;;  %v2695_v37 = vadd.f32 %v2694_v22, %v2526_v35  ;;  %v7957_v35 = vld [vmem:[#allocation40_spill] sm:$0xff] }
 0x444   : > { %v2859_v32 = vadd.f32 %v2858_v54, %v2690_v45  ;;  %v3027_v8 = vpop.f32.mrf.mxu1  ;;  %5354 = vmatmul.msk.f32.gmra.mxu2 %vm3208_vm0, %v3181_v56  ;;  %v7955_v56 = vld [vmem:[#allocation38_spill] sm:$0xff] }
 0x446   : > { %v3028_v38 = vadd.f32 %v3027_v8, %v2859_v32  ;;  %2897 = vmatmul.bf16.gmra.mxu0 %v5144_v36  ;;  %v2528_v36 = vadd.f32 %v7381_v44, %v7955_v56 }
 0x447   : > { %3066 = vmatmul.bf16.gmra.mxu1 %v5148_v49  ;;  %v2704_v49 = vpop.f32.mrf.mxu3 }
 0x448   : > { %v3118_v33 = vmax.f32 %v3028_v38, 0.0  ;;  %v2697_v32 = vadd.f32 %v2696_v28, %v2528_v36  ;;  %v7958_v36 = vld [vmem:[#allocation41_spill] sm:$0xff] }
 0x44a   : > { %v3182_v30 = vmin.f32 %v3118_v33, 1.0  ;;  %v7462_v22 = vpop.f32.mrf.mxu2  ;;  %v7956_v33 = vld [vmem:[#allocation39_spill] sm:$0xff] }
 0x44b   : > { %v2860_v11 = vpop.f32.mrf.mxu0 }
 0x44c   : > { %v2861_v18 = vadd.f32 %v2860_v11, %v2692_v59  ;;  %v3029_v42 = vpop.f32.mrf.mxu1  ;;  %5355 = vmatmul.msk.f32.gmra.mxu2 %vm3208_vm0, %v3182_v30  ;;  %v2531_v59 = vadd.f32 %v7389_v47, %v7956_v33 }
 0x44e   : > { %v3030_v57 = vadd.f32 %v3029_v42, %v2861_v18  ;;  %v2700_v11 = vadd.f32 %v2699_v43, %v2531_v59  ;;  %v7959_v59 = vld [vmem:[#allocation42_spill] sm:$0xff] }
 0x44f   : > { %v2706_v42 = vpop.f32.mrf.mxu3 }
 0x450   : > { %v3119_v25 = vmax.f32 %v3030_v57, 0.0 }
 0x452   : > { %v3183_v46 = vmin.f32 %v3119_v25, 1.0  ;;  %v2533_v25 = vadd.f32 %v7403_v13, %v7957_v35  ;;  %v2541_v35 = vadd.f32 %v7433_v63, %v7143_v4 }
 0x453   : > { %v2863_v53 = vpop.f32.mrf.mxu0 }
 0x454   : > { %v2864_v34 = vadd.f32 %v2863_v53, %v2695_v37  ;;  %v3032_v39 = vpop.f32.mrf.mxu1  ;;  %5356 = vmatmul.msk.f32.gmra.mxu2 %vm3208_vm0, %v3183_v46  ;;  %v7469_v37 = vpop.f32.mrf.mxu2  ;;  %v2702_v53 = vadd.f32 %v2701_v19, %v2533_v25 }
 0x456   : > { %v3033_v45 = vadd.f32 %v3032_v39, %v2864_v34 }
 0x457   : > { %v2709_v43 = vpop.f32.mrf.mxu3 }
 0x458   : > { %v3120_v54 = vmax.f32 %v3033_v45, 0.0 }
 0x45a   : > { %v3184_v8 = vmin.f32 %v3120_v54, 1.0  ;;  %v2536_v54 = vadd.f32 %v7416_v48, %v7958_v36 }
 0x45b   : > { %v2865_v38 = vpop.f32.mrf.mxu0 }
 0x45c   : > { %v2866_v3 = vadd.f32 %v2865_v38, %v2697_v32  ;;  %v3034_v17 = vpop.f32.mrf.mxu1  ;;  %5357 = vmatmul.msk.f32.gmra.mxu2 %vm3208_vm0, %v3184_v8  ;;  %v7474_v8 = vpop.f32.mrf.mxu2  ;;  %v2705_v38 = vadd.f32 %v2704_v49, %v2536_v54 }
 0x45e   : > { %v3035_v26 = vadd.f32 %v3034_v17, %v2866_v3 }
 0x45f   : > { %v2711_v33 = vpop.f32.mrf.mxu3 }
 0x460   : > { %v3121_v30 = vmax.f32 %v3035_v26, 0.0 }
 0x462   : > { %v3185_v18 = vmin.f32 %v3121_v30, 1.0  ;;  %v2538_v30 = vadd.f32 %v7422_v5, %v7959_v59 }
 0x463   : > { %v2868_v44 = vpop.f32.mrf.mxu0 }
 0x464   : > { %v2869_v57 = vadd.f32 %v2868_v44, %v2700_v11  ;;  %v3037_v58 = vpop.f32.mrf.mxu1  ;;  %5358 = vmatmul.msk.f32.gmra.mxu2 %vm3208_vm0, %v3185_v18  ;;  %v2707_v18 = vadd.f32 %v2706_v42, %v2538_v30  ;;  %v7479_v48 = vpop.f32.mrf.mxu2 }
 0x466   : > { %v3038_v28 = vadd.f32 %v3037_v58, %v2869_v57 }
 0x468   : > { %v3122_v46 = vmax.f32 %v3038_v28, 0.0 }
 0x46a   : > { %v3186_v34 = vmin.f32 %v3122_v46, 1.0  ;;  %v2714_v46 = vpop.f32.mrf.mxu3 }
 0x46b   : > { %v2870_v39 = vpop.f32.mrf.mxu0 }
 0x46c   : > { %v2871_v47 = vadd.f32 %v2870_v39, %v2702_v53  ;;  %v3039_v45 = vpop.f32.mrf.mxu1  ;;  %5359 = vmatmul.msk.f32.gmra.mxu2 %vm3208_vm0, %v3186_v34  ;;  %v2710_v53 = vadd.f32 %v2709_v43, %v2541_v35  ;;  %v7485_v42 = vpop.f32.mrf.mxu2 }
 0x46e   : > { %v3040_v56 = vadd.f32 %v3039_v45, %v2871_v47 }
 0x470   : > { %v3123_v32 = vmax.f32 %v3040_v56, 0.0  ;;  %v7960_v56 = vld [vmem:[#allocation43_spill] sm:$0xff] }
 0x471   : > { %v2543_v36 = vadd.f32 %v7443_v15, %v7960_v56 }
 0x472   : > { %v3187_v13 = vmin.f32 %v3123_v32, 1.0 }
 0x473   : > { %v2873_v3 = vpop.f32.mrf.mxu0  ;;  %v2712_v32 = vadd.f32 %v2711_v33, %v2543_v36 }
 0x474   : > { %v2874_v17 = vadd.f32 %v2873_v3, %v2705_v38  ;;  %v3042_v26 = vpop.f32.mrf.mxu1  ;;  %5360 = vmatmul.msk.f32.gmra.mxu2 %vm3208_vm0, %v3187_v13  ;;  %v2716_v13 = vpop.f32.mrf.mxu3 }
 0x476   : > { %v3043_v19 = vadd.f32 %v3042_v26, %v2874_v17  ;;  %v7961_v17 = vld [vmem:[#allocation44_spill] sm:$0xff] }
 0x477   : > { %v2546_v26 = vadd.f32 %v7451_v52, %v7961_v17 }
 0x478   : > { %v3124_v11 = vmax.f32 %v3043_v19, 0.0  ;;  %v7492_v19 = vpop.f32.mrf.mxu2 }
 0x479   : > { %v2715_v30 = vadd.f32 %v2714_v46, %v2546_v26 }
 0x47a   : > { %v3188_v44 = vmin.f32 %v3124_v11, 1.0 }
 0x47b   : > { %v2875_v57 = vpop.f32.mrf.mxu0 }
 0x47c   : > { %v2876_v58 = vadd.f32 %v2875_v57, %v2707_v18  ;;  %v3044_v28 = vpop.f32.mrf.mxu1  ;;  %5361 = vmatmul.msk.f32.gmra.mxu2 %vm3208_vm0, %v3188_v44  ;;  %v2719_v33 = vpop.f32.mrf.mxu3 }
 0x47e   : > { %v3045_v49 = vadd.f32 %v3044_v28, %v2876_v58  ;;  %v7962_v58 = vld [vmem:[#allocation45_spill] sm:$0xff] }
 0x47f   : > { %v2548_v28 = vadd.f32 %v7456_v40, %v7962_v58 }
 0x480   : > { %v3125_v25 = vmax.f32 %v3045_v49, 0.0  ;;  %v7497_v49 = vpop.f32.mrf.mxu2 }
 0x482   : > { %v3189_v34 = vmin.f32 %v3125_v25, 1.0  ;;  %v2717_v25 = vadd.f32 %v2716_v13, %v2548_v28 }
 0x483   : > { %v2878_v39 = vpop.f32.mrf.mxu0 }
 0x484   : > { %v2879_v5 = vadd.f32 %v2878_v39, %v2710_v53  ;;  %v3047_v47 = vpop.f32.mrf.mxu1  ;;  %5362 = vmatmul.msk.f32.gmra.mxu2 %vm3208_vm0, %v3189_v34 }
 0x486   : > { %v3048_v45 = vadd.f32 %v3047_v47, %v2879_v5  ;;  %v2721_v5 = vpop.f32.mrf.mxu3  ;;  %v2551_v47 = vadd.f32 %v7462_v22, %v7163_v21 }
 0x488   : > { %v3126_v54 = vmax.f32 %v3048_v45, 0.0  ;;  %v2720_v56 = vadd.f32 %v2719_v33, %v2551_v47  ;;  %v7502_v36 = vpop.f32.mrf.mxu2 }
 0x48a   : > { %v3190_v38 = vmin.f32 %v3126_v54, 1.0 }
 0x48b   : > { %v2880_v4 = vpop.f32.mrf.mxu0 }
 0x48c   : > { %v2881_v63 = vadd.f32 %v2880_v4, %v2712_v32  ;;  %v3049_v3 = vpop.f32.mrf.mxu1  ;;  %5363 = vmatmul.msk.f32.gmra.mxu2 %vm3208_vm0, %v3190_v38  ;;  %v7963_v4 = vld [vmem:[#allocation46_spill] sm:$0xff] }
 0x48e   : > { %v3050_v43 = vadd.f32 %v3049_v3, %v2881_v63  ;;  %v2553_v63 = vadd.f32 %v7469_v37, %v7963_v4  ;;  %v7966_v4 = vld [vmem:[#allocation33_spill] sm:$0xff] }
 0x490   : > { %v3127_v59 = vmax.f32 %v3050_v43, 0.0  ;;  %v2724_v43 = vpop.f32.mrf.mxu3  ;;  %v2722_v17 = vadd.f32 %v2721_v5, %v2553_v63  ;;  %v7507_v21 = vpop.f32.mrf.mxu2  ;;  %v2561_v63 = vadd.f32 %v7485_v42, %v7966_v4 }
 0x492   : > { %v3191_v11 = vmin.f32 %v3127_v59, 1.0 }
 0x493   : > { %v2883_v18 = vpop.f32.mrf.mxu0 }
 0x494   : > { %v2884_v15 = vadd.f32 %v2883_v18, %v2715_v30  ;;  %v3052_v44 = vpop.f32.mrf.mxu1  ;;  %5364 = vmatmul.msk.f32.gmra.mxu2 %vm3208_vm0, %v3191_v11  ;;  %v7964_v18 = vld [vmem:[#allocation31_spill] sm:$0xff] }
 0x496   : > { %v3053_v57 = vadd.f32 %v3052_v44, %v2884_v15  ;;  %v2556_v15 = vadd.f32 %v7474_v8, %v7964_v18 }
 0x498   : > { %v3128_v35 = vmax.f32 %v3053_v57, 0.0  ;;  %v2725_v33 = vadd.f32 %v2724_v43, %v2556_v15  ;;  %v2726_v58 = vpop.f32.mrf.mxu3 }
 0x49a   : > { %v3192_v52 = vmin.f32 %v3128_v35, 1.0 }
 0x49b   : > { %v2885_v53 = vpop.f32.mrf.mxu0 }
 0x49c   : > { %v2886_v34 = vadd.f32 %v2885_v53, %v2717_v25  ;;  %v3054_v39 = vpop.f32.mrf.mxu1  ;;  %5365 = vmatmul.msk.f32.gmra.mxu2 %vm3208_vm0, %v3192_v52  ;;  %v3203_v25 = vld [vmem:[#allocation8 + $0x18] sm:$0xff]  ;;  %v3202_v53 = vld [vmem:[#allocation8 + $0x10] sm:$0xff] }
 0x49d   : > { %3526 = vmatpush.msra.mxu3 %v3203_v25  ;;  %v3072_v25 = vmax.f32 %v7173_v1, 0.0  ;;  %v3076_v1 = vmax.f32 %v7193_v9, 0.0 }
 0x49e   : > { %v3055_v46 = vadd.f32 %v3054_v39, %v2886_v34  ;;  %v3201_v34 = vld [vmem:[#allocation8 + $0x8] sm:$0xff]  ;;  %v3730_v39 = vld [vmem:[#allocation12 + $0x18] sm:$0xff] }
 0x49f   : > { %3527 = vmatpush.msra.mxu3 %v3202_v53  ;;  %3843 = vmatpush.msra.mxu2 %v3730_v39 }
 0x4a0   : > { %v3129_v45 = vmax.f32 %v3055_v46, 0.0  ;;  %v7965_v46 = vld [vmem:[#allocation32_spill] sm:$0xff] }
 0x4a1   : > { %v2558_v5 = vadd.f32 %v7479_v48, %v7965_v46  ;;  %3528 = vmatpush.msra.mxu3 %v3201_v34  ;;  %v3074_v34 = vmax.f32 %v7183_v2, 0.0  ;;  %v3075_v46 = vmax.f32 %v7186_v41, 0.0 }
 0x4a2   : > { %v3193_v40 = vmin.f32 %v3129_v45, 1.0 }
 0x4a3   : > { %v2888_v54 = vpop.f32.mrf.mxu0  ;;  %v2727_v8 = vadd.f32 %v2726_v58, %v2558_v5  ;;  %v3138_v39 = vmin.f32 %v3074_v34, 1.0  ;;  %v3729_v5 = vld [vmem:[#allocation12 + $0x10] sm:$0xff]  ;;  %v7588_v34 = vld [vmem:[#allocation11] ss:$0 sm:$0xff] }
 0x4a4   : > { %v2889_v32 = vadd.f32 %v2888_v54, %v2720_v56  ;;  %v3057_v38 = vpop.f32.mrf.mxu1  ;;  %5366 = vmatmul.msk.f32.gmra.mxu2 %vm3208_vm0, %v3193_v40  ;;  %v3200_v56 = vld [vmem:[#allocation8] sm:$0xff] }
 0x4a5   : > { %3529 = vmatpush.msra.mxu3 %v3200_v56  ;;  %3844 = vmatpush.msra.mxu2 %v3729_v5  ;;  %v3078_v56 = vmax.f32 %v7203_v27, 0.0  ;;  %v7969_v27 = vld [vmem:[#allocation48_spill] sm:$0xff] }
 0x4a6   : > { %v3058_v13 = vadd.f32 %v3057_v38, %v2889_v32  ;;  %v2729_v38 = vpop.f32.mrf.mxu3 }
 0x4a7   : > { %v2730_v48 = vadd.f32 %v2729_v38, %v2561_v63  ;;  %v7968_v38 = vld [vmem:[#allocation47_spill] sm:$0xff]  ;;  %v3081_v63 = vmax.f32 %v7969_v27, 0.0 }
 0x4a8   : > { %v3130_v3 = vmax.f32 %v3058_v13, 0.0 }
 0x4aa   : > { %v3194_v26 = vmin.f32 %v3130_v3, 1.0 }
 0x4ab   : > { %v2890_v59 = vpop.f32.mrf.mxu0 }
 0x4ac   : > { %v2891_v22 = vadd.f32 %v2890_v59, %v2722_v17  ;;  %v3059_v30 = vpop.f32.mrf.mxu1  ;;  %5367 = vmatmul.msk.f32.gmra.mxu2 %vm3208_vm0, %v3194_v26 }
 0x4ae   : > { %v3060_v11 = vadd.f32 %v3059_v30, %v2891_v22  ;;  %v2731_v30 = vpop.f32.mrf.mxu3 }
 0x4b0   : > { %v3131_v44 = vmax.f32 %v3060_v11, 0.0  ;;  %v7967_v11 = vld [vmem:[#allocation34_spill] sm:$0xff] }
 0x4b1   : > { %v2563_v18 = vadd.f32 %v7492_v19, %v7967_v11  ;;  %v3073_v19 = vmax.f32 %v7176_v10, 0.0  ;;  %v7533_v10 = vpop.f32.mrf.mxu2 }
 0x4b2   : > { %v3195_v57 = vmin.f32 %v3131_v44, 1.0 }
 0x4b3   : > { %v2893_v37 = vpop.f32.mrf.mxu0  ;;  %v2732_v44 = vadd.f32 %v2731_v30, %v2563_v18  ;;  %v3137_v53 = vmin.f32 %v3073_v19, 1.0  ;;  %v3084_v30 = vmax.f32 %v7233_v31, 0.0  ;;  %v3727_v31 = vld [vmem:[#allocation12] sm:$0xff] }
 0x4b4   : > { %v2894_v28 = vadd.f32 %v2893_v37, %v2725_v33  ;;  %v3062_v35 = vpop.f32.mrf.mxu1  ;;  %5368 = vmatmul.msk.f32.vlgmr.msrb.gmra.mxu3 %vm3208_vm0, %v3195_v57 }
 0x4b6   : > { %v3063_v52 = vadd.f32 %v3062_v35, %v2894_v28 }
 0x4b8   : > { %v3132_v47 = vmax.f32 %v3063_v52, 0.0  ;;  %v3136_v52 = vmin.f32 %v3072_v25, 1.0  ;;  %v3088_v25 = vmax.f32 %v7253_v23, 0.0 }
 0x4b9   : > { %v7538_v41 = vpop.f32.mrf.mxu2 }
 0x4ba   : > { %v3196_v45 = vmin.f32 %v3132_v47, 1.0  ;;  %v3139_v47 = vmin.f32 %v3075_v46, 1.0  ;;  %v3152_v19 = vmin.f32 %v3088_v25, 1.0 }
 0x4bb   : > { %v2895_v40 = vpop.f32.mrf.mxu0 }
 0x4bc   : > { %v2896_v54 = vadd.f32 %v2895_v40, %v2727_v8  ;;  %v3064_v32 = vpop.f32.mrf.mxu1  ;;  %5369 = vmatmul.msk.f32.gmra.mxu3 %vm3208_vm0, %v3196_v45  ;;  %v3140_v8 = vmin.f32 %v3076_v1, 1.0  ;;  %v3077_v45 = vmax.f32 %v7196_v24, 0.0  ;;  %v3142_v40 = vmin.f32 %v3078_v56, 1.0 }
 0x4bd   : > { %v3090_v1 = vmax.f32 %v7263_v29, 0.0 }
 0x4be   : > { %v3065_v13 = vadd.f32 %v3064_v32, %v2896_v54  ;;  %v3141_v2 = vmin.f32 %v3077_v45, 1.0  ;;  %v3079_v54 = vmax.f32 %v7206_v50, 0.0  ;;  %v3082_v50 = vmax.f32 %v7223_v62, 0.0 }
 0x4bf   : > { %v3085_v62 = vmax.f32 %v7236_v60, 0.0  ;;  %v3087_v60 = vmax.f32 %v7246_v14, 0.0 }
 0x4c0   : > { %v3133_v3 = vmax.f32 %v3065_v13, 0.0  ;;  %v3143_v32 = vmin.f32 %v3079_v54, 1.0  ;;  %v3080_v13 = vmax.f32 %v7968_v38, 0.0  ;;  %v3091_v54 = vmax.f32 %v7266_v16, 0.0 }
 0x4c1   : > { %v7542_v9 = vpop.f32.mrf.mxu2 }
 0x4c2   : > { %v3197_v43 = vmin.f32 %v3133_v3, 1.0  ;;  %v3144_v24 = vmin.f32 %v3080_v13, 1.0  ;;  %v3145_v3 = vmin.f32 %v3081_v63, 1.0  ;;  %v3155_v13 = vmin.f32 %v3091_v54, 1.0 }
 0x4c3   : > { %v2898_v17 = vpop.f32.mrf.mxu0  ;;  %v3092_v63 = vmax.f32 %v7273_v12, 0.0 }
 0x4c4   : > { %v2899_v26 = vadd.f32 %v2898_v17, %v2730_v48  ;;  %v3067_v59 = vpop.f32.mrf.mxu1  ;;  %5370 = vmatmul.msk.f32.gmra.mxu3 %vm3208_vm0, %v3197_v43  ;;  %v3728_v48 = vld [vmem:[#allocation12 + $0x8] sm:$0xff]  ;;  %v3146_v17 = vmin.f32 %v3082_v50, 1.0 }
 0x4c5   : > { %3845 = vmatpush.msra.mxu2 %v3728_v48  ;;  %v3156_v50 = vmin.f32 %v3092_v63, 1.0 }
 0x4c6   : > { %v3068_v22 = vadd.f32 %v3067_v59, %v2899_v26  ;;  %v3083_v26 = vmax.f32 %v7226_v51, 0.0 }
 0x4c7   : > { %3846 = vmatpush.msra.mxu2 %v3727_v31 }
 0x4c8   : > { %v3134_v15 = vmax.f32 %v3068_v22, 0.0  ;;  %v3147_v22 = vmin.f32 %v3083_v26, 1.0  ;;  %v3093_v26 = vmax.f32 %v7276_v6, 0.0 }
 0x4c9   : > { %v7546_v4 = vpop.f32.mrf.mxu2 }
 0x4ca   : > { %v3198_v33 = vmin.f32 %v3134_v15, 1.0  ;;  %v3148_v15 = vmin.f32 %v3084_v30, 1.0 }
 0x4cb   : > { %v2900_v57 = vpop.f32.mrf.mxu0 }
 0x4cc   : > { %v2901_v58 = vadd.f32 %v2900_v57, %v2732_v44  ;;  %5371 = vmatmul.msk.f32.gmra.mxu3 %vm3208_vm0, %v3198_v33  ;;  %v3069_v42 = vpop.f32.mrf.mxu1  ;;  %v3149_v33 = vmin.f32 %v3085_v62, 1.0  ;;  %v3086_v57 = vmax.f32 %v7243_v20, 0.0  ;;  %v3157_v62 = vmin.f32 %v3093_v26, 1.0 }
 0x4ce   : > { %v3070_v37 = vadd.f32 %v3069_v42, %v2901_v58  ;;  %v3150_v42 = vmin.f32 %v3086_v57, 1.0  ;;  %v3094_v57 = vmax.f32 %v7283_v61, 0.0 }
 0x4d0   : > { %v3135_v28 = vmax.f32 %v3070_v37, 0.0 }
 0x4d1   : > { %v7551_v43 = vpop.f32.mrf.mxu2 }
 0x4d2   : > { %v3199_v35 = vmin.f32 %v3135_v28, 1.0 }
 0x4d4   : > { %5372 = vmatmul.msk.f32.gmra.mxu3 %vm3208_vm0, %v3199_v35  ;;  %v3151_v35 = vmin.f32 %v3087_v60, 1.0 }
 0x4d9   : > { %v7556_v59 = vpop.f32.mrf.mxu2 }
 0x4dc   : > { %5373 = vmatmul.msk.f32.vlgmr.msra.gmra.mxu3 %vm3208_vm0, %v3136_v52 }
 0x4e1   : > { %v7562_v18 = vpop.f32.mrf.mxu2 }
 0x4e4   : > { %5374 = vmatmul.msk.f32.gmra.mxu3 %vm3208_vm0, %v3137_v53  ;;  %v3089_v53 = vmax.f32 %v7256_v0, 0.0  ;;  %v3154_v0 = vmin.f32 %v3090_v1, 1.0 }
 0x4e6   : > { %v3153_v5 = vmin.f32 %v3089_v53, 1.0 }
 0x4e9   : > { %v7568_v51 = vpop.f32.mrf.mxu2 }
 0x4ec   : > { %5375 = vmatmul.msk.f32.gmra.mxu3 %vm3208_vm0, %v3138_v39 }
 0x4f1   : > { %v7575_v37 = vpop.f32.mrf.mxu2 }
 0x4f4   : > { %5376 = vmatmul.msk.f32.gmra.mxu3 %vm3208_vm0, %v3139_v47 }
 0x4f9   : > { %v7582_v52 = vpop.f32.mrf.mxu2 }
 0x4fc   : > { %5377 = vmatmul.msk.f32.gmra.mxu3 %vm3208_vm0, %v3140_v8 }
 0x501   : > { %v7591_v46 = vpop.f32.mrf.mxu2 }
 0x504   : > { %5378 = vmatmul.msk.f32.gmra.mxu3 %vm3208_vm0, %v3141_v2 }
 0x50c   : > { %5379 = vmatmul.msk.f32.gmra.mxu3 %vm3208_vm0, %v3142_v40 }
 0x514   : > { %5380 = vmatmul.msk.f32.gmra.mxu3 %vm3208_vm0, %v3143_v32 }
 0x51c   : > { %5381 = vmatmul.msk.f32.gmra.mxu3 %vm3208_vm0, %v3144_v24 }
 0x524   : > { %5382 = vmatmul.msk.f32.gmra.mxu3 %vm3208_vm0, %v3145_v3 }
 0x52c   : > { %5383 = vmatmul.msk.f32.gmra.mxu3 %vm3208_vm0, %v3146_v17 }
 0x534   : > { %5384 = vmatmul.msk.f32.gmra.mxu3 %vm3208_vm0, %v3147_v22 }
 0x537   : > { %v7560_v11 = vpop.f32.mrf.mxu3 }
 0x53c   : > { %5385 = vmatmul.msk.f32.gmra.mxu3 %vm3208_vm0, %v3148_v15 }
 0x53f   : > { %v7566_v44 = vpop.f32.mrf.mxu3 }
 0x544   : > { %5386 = vmatmul.msk.f32.gmra.mxu3 %vm3208_vm0, %v3149_v33 }
 0x547   : > { %v7572_v58 = vpop.f32.mrf.mxu3 }
 0x54c   : > { %5387 = vmatmul.msk.f32.gmra.mxu3 %vm3208_vm0, %v3150_v42 }
 0x54f   : > { %v7578_v28 = vpop.f32.mrf.mxu3 }
 0x554   : > { %5388 = vmatmul.msk.f32.gmra.mxu3 %vm3208_vm0, %v3151_v35  ;;  %v3158_v35 = vmin.f32 %v3094_v57, 1.0 }
 0x557   : > { %v7584_v20 = vpop.f32.mrf.mxu3 }
 0x55c   : > { %5389 = vmatmul.msk.f32.gmra.mxu3 %vm3208_vm0, %v3152_v19  ;;  %v3095_v19 = vmax.f32 %v7286_v7, 0.0 }
 0x55f   : > { %v3531_v39 = vpop.f32.mrf.mxu3 }
 0x560   : > { %v3532_v14 = vadd.f32 %v3531_v39, %v7497_v49  ;;  %v7599_v49 = vpop.f32.mrf.mxu2 }
 0x562   : > { %v3631_v47 = vadd.f32 %v7588_v34, %v3532_v14  ;;  %v3159_v14 = vmin.f32 %v3095_v19, 1.0  ;;  %v7974_v19 = vld [vmem:[#allocation53_spill] sm:$0xff] }
 0x564   : > { %v3663_v23 = vmax.f32 %v3631_v47, 0.0  ;;  %5390 = vmatmul.msk.f32.gmra.mxu3 %vm3208_vm0, %v3153_v5 }
 0x566   : > { %v3695_v8 = vmin.f32 %v3663_v23, 1.0  ;;  %v3096_v23 = vmax.f32 %v7293_v55, 0.0 }
 0x567   : > { %v3534_v45 = vpop.f32.mrf.mxu3 }
 0x568   : > { %v3535_v2 = vadd.f32 %v3534_v45, %v7502_v36  ;;  %5405 = vmatmul.msk.f32.vlgmr.msra.gmra.mxu2 %vm3208_vm0, %v3695_v8  ;;  %v7607_v27 = vpop.f32.mrf.mxu2  ;;  %v3160_v45 = vmin.f32 %v3096_v23, 1.0 }
 0x56a   : > { %v3632_v56 = vadd.f32 %v7588_v34, %v3535_v2 }
 0x56c   : > { %v3664_v40 = vmax.f32 %v3632_v56, 0.0  ;;  %5391 = vmatmul.msk.f32.gmra.mxu3 %vm3208_vm0, %v3154_v0  ;;  %v7970_v56 = vld [vmem:[#allocation49_spill] sm:$0xff] }
 0x56e   : > { %v3696_v32 = vmin.f32 %v3664_v40, 1.0  ;;  %v3097_v40 = vmax.f32 %v7970_v56, 0.0 }
 0x56f   : > { %v3537_v38 = vpop.f32.mrf.mxu3 }
 0x570   : > { %v3538_v29 = vadd.f32 %v3537_v38, %v7507_v21  ;;  %5406 = vmatmul.msk.f32.gmra.mxu2 %vm3208_vm0, %v3696_v32  ;;  %v7615_v30 = vpop.f32.mrf.mxu2  ;;  %v3161_v38 = vmin.f32 %v3097_v40, 1.0  ;;  %v7976_v40 = vld [vmem:[#allocation55_spill] sm:$0xff] }
 0x572   : > { %v3633_v36 = vadd.f32 %v7588_v34, %v3538_v29 }
 0x574   : > { %v3665_v24 = vmax.f32 %v3633_v36, 0.0  ;;  %5392 = vmatmul.msk.f32.gmra.mxu3 %vm3208_vm0, %v3155_v13  ;;  %v7971_v13 = vld [vmem:[#allocation50_spill] sm:$0xff] }
 0x575   : > { %v3098_v36 = vmax.f32 %v7971_v13, 0.0 }
 0x576   : > { %v3697_v3 = vmin.f32 %v3665_v24, 1.0 }
 0x577   : > { %v3540_v48 = vpop.f32.mrf.mxu3 }
 0x578   : > { %v3541_v16 = vadd.f32 %v3540_v48, %v7533_v10  ;;  %5407 = vmatmul.msk.f32.gmra.mxu2 %vm3208_vm0, %v3697_v3  ;;  %v7624_v60 = vpop.f32.mrf.mxu2 }
 0x57a   : > { %v3634_v21 = vadd.f32 %v7588_v34, %v3541_v16  ;;  %v3162_v16 = vmin.f32 %v3098_v36, 1.0 }
 0x57c   : > { %v3666_v17 = vmax.f32 %v3634_v21, 0.0  ;;  %5393 = vmatmul.msk.f32.gmra.mxu3 %vm3208_vm0, %v3156_v50  ;;  %v7972_v21 = vld [vmem:[#allocation51_spill] sm:$0xff] }
 0x57e   : > { %v3698_v22 = vmin.f32 %v3666_v17, 1.0  ;;  %v3099_v17 = vmax.f32 %v7972_v21, 0.0 }
 0x57f   : > { %v3543_v15 = vpop.f32.mrf.mxu3 }
 0x580   : > { %v3544_v12 = vadd.f32 %v3543_v15, %v7538_v41  ;;  %5408 = vmatmul.msk.f32.gmra.mxu2 %vm3208_vm0, %v3698_v22  ;;  %v7632_v5 = vpop.f32.mrf.mxu2 }
 0x582   : > { %v3635_v10 = vadd.f32 %v7588_v34, %v3544_v12 }
 0x584   : > { %v3667_v33 = vmax.f32 %v3635_v10, 0.0  ;;  %5394 = vmatmul.msk.f32.gmra.mxu3 %vm3208_vm0, %v3157_v62  ;;  %v3163_v62 = vmin.f32 %v3099_v17, 1.0 }
 0x586   : > { %v3699_v31 = vmin.f32 %v3667_v33, 1.0  ;;  %v7973_v33 = vld [vmem:[#allocation52_spill] sm:$0xff] }
 0x587   : > { %v3546_v42 = vpop.f32.mrf.mxu3  ;;  %v3100_v57 = vmax.f32 %v7973_v33, 0.0 }
 0x588   : > { %v3547_v6 = vadd.f32 %v3546_v42, %v7542_v9  ;;  %5409 = vmatmul.msk.f32.gmra.mxu2 %vm3208_vm0, %v3699_v31  ;;  %v7640_v0 = vpop.f32.mrf.mxu2 }
 0x58a   : > { %v3636_v41 = vadd.f32 %v7588_v34, %v3547_v6 }
 0x58c   : > { %v3668_v25 = vmax.f32 %v3636_v41, 0.0  ;;  %5395 = vmatmul.msk.f32.gmra.mxu3 %vm3208_vm0, %v3158_v35  ;;  %v3164_v35 = vmin.f32 %v3100_v57, 1.0 }
 0x58e   : > { %v3700_v53 = vmin.f32 %v3668_v25, 1.0 }
 0x58f   : > { %v3549_v39 = vpop.f32.mrf.mxu3 }
 0x590   : > { %v3550_v61 = vadd.f32 %v3549_v39, %v7546_v4  ;;  %5410 = vmatmul.msk.f32.gmra.mxu2 %vm3208_vm0, %v3700_v53  ;;  %v7648_v63 = vpop.f32.mrf.mxu2  ;;  %v3101_v53 = vmax.f32 %v7974_v19, 0.0 }
 0x592   : > { %v3637_v9 = vadd.f32 %v7588_v34, %v3550_v61 }
 0x594   : > { %v3669_v47 = vmax.f32 %v3637_v9, 0.0  ;;  %5396 = vmatmul.msk.f32.gmra.mxu3 %vm3208_vm0, %v3159_v14  ;;  %v3165_v9 = vmin.f32 %v3101_v53, 1.0 }
 0x596   : > { %v3701_v1 = vmin.f32 %v3669_v47, 1.0 }
 0x597   : > { %v3552_v8 = vpop.f32.mrf.mxu3 }
 0x598   : > { %v3553_v7 = vadd.f32 %v3552_v8, %v7551_v43  ;;  %5411 = vmatmul.msk.f32.gmra.mxu2 %vm3208_vm0, %v3701_v1  ;;  %v7657_v12 = vpop.f32.mrf.mxu2  ;;  %v7975_v1 = vld [vmem:[#allocation54_spill] sm:$0xff] }
 0x599   : > { %v3102_v8 = vmax.f32 %v7975_v1, 0.0 }
 0x59a   : > { %v3638_v4 = vadd.f32 %v7588_v34, %v3553_v7 }
 0x59c   : > { %v3670_v2 = vmax.f32 %v3638_v4, 0.0  ;;  %5397 = vmatmul.msk.f32.gmra.mxu3 %vm3208_vm0, %v3160_v45 }
 0x59e   : > { %v3702_v54 = vmin.f32 %v3670_v2, 1.0  ;;  %v3166_v2 = vmin.f32 %v3102_v8, 1.0 }
 0x59f   : > { %v3555_v32 = vpop.f32.mrf.mxu3 }
 0x5a0   : > { %v3556_v55 = vadd.f32 %v3555_v32, %v7556_v59  ;;  %5412 = vmatmul.msk.f32.gmra.mxu2 %vm3208_vm0, %v3702_v54  ;;  %v7665_v41 = vpop.f32.mrf.mxu2  ;;  %v3103_v54 = vmax.f32 %v7976_v40, 0.0 }
 0x5a2   : > { %v3639_v43 = vadd.f32 %v7588_v34, %v3556_v55 }
 0x5a4   : > { %v3671_v29 = vmax.f32 %v3639_v43, 0.0  ;;  %5398 = vmatmul.msk.f32.gmra.mxu3 %vm3208_vm0, %v3161_v38 }
 0x5a6   : > { %v3703_v24 = vmin.f32 %v3671_v29, 1.0  ;;  %v3167_v29 = vmin.f32 %v3103_v54, 1.0 }
 0x5a7   : > { %v3558_v3 = vpop.f32.mrf.mxu3 }
 0x5a8   : > { %v3559_v48 = vadd.f32 %v3558_v3, %v7562_v18  ;;  %5413 = vmatmul.msk.f32.gmra.mxu2 %vm3208_vm0, %v3703_v24  ;;  %v7673_v23 = vpop.f32.mrf.mxu2 }
 0x5aa   : > { %v3640_v59 = vadd.f32 %v7588_v34, %v3559_v48 }
 0x5ac   : > { %v3672_v50 = vmax.f32 %v3640_v59, 0.0  ;;  %5399 = vmatmul.msk.f32.gmra.mxu3 %vm3208_vm0, %v3162_v16 }
 0x5ae   : > { %v3704_v26 = vmin.f32 %v3672_v50, 1.0 }
 0x5af   : > { %v3561_v22 = vpop.f32.mrf.mxu3 }
 0x5b0   : > { %v3562_v15 = vadd.f32 %v3561_v22, %v7568_v51  ;;  %5414 = vmatmul.msk.f32.gmra.mxu2 %vm3208_vm0, %v3704_v26  ;;  %v7681_v55 = vpop.f32.mrf.mxu2 }
 0x5b2   : > { %v3641_v18 = vadd.f32 %v7588_v34, %v3562_v15 }
 0x5b4   : > { %v3673_v10 = vmax.f32 %v3641_v18, 0.0  ;;  %5400 = vmatmul.msk.f32.gmra.mxu3 %vm3208_vm0, %v3163_v62 }
 0x5b6   : > { %v3705_v31 = vmin.f32 %v3673_v10, 1.0 }
 0x5b7   : > { %v3564_v42 = vpop.f32.mrf.mxu3 }
 0x5b8   : > { %v3565_v6 = vadd.f32 %v3564_v42, %v7575_v37  ;;  %5415 = vmatmul.msk.f32.gmra.mxu2 %vm3208_vm0, %v3705_v31  ;;  %v7689_v48 = vpop.f32.mrf.mxu2 }
 0x5ba   : > { %v3642_v51 = vadd.f32 %v7588_v34, %v3565_v6 }
 0x5bc   : > { %v3674_v25 = vmax.f32 %v3642_v51, 0.0  ;;  %5401 = vmatmul.msk.f32.gmra.mxu3 %vm3208_vm0, %v3164_v35 }
 0x5be   : > { %v3706_v39 = vmin.f32 %v3674_v25, 1.0 }
 0x5bf   : > { %v3567_v61 = vpop.f32.mrf.mxu3 }
 0x5c0   : > { %v3568_v14 = vadd.f32 %v3567_v61, %v7582_v52  ;;  %5416 = vmatmul.msk.f32.gmra.mxu2 %vm3208_vm0, %v3706_v39  ;;  %v7695_v26 = vpop.f32.mrf.mxu2 }
 0x5c2   : > { %v3643_v37 = vadd.f32 %v7588_v34, %v3568_v14 }
 0x5c4   : > { %v3675_v47 = vmax.f32 %v3643_v37, 0.0  ;;  %5402 = vmatmul.msk.f32.gmra.mxu3 %vm3208_vm0, %v3165_v9 }
 0x5c6   : > { %v3707_v7 = vmin.f32 %v3675_v47, 1.0 }
 0x5c7   : > { %v3570_v45 = vpop.f32.mrf.mxu3 }
 0x5c8   : > { %v3571_v4 = vadd.f32 %v3570_v45, %v7591_v46  ;;  %5417 = vmatmul.msk.f32.gmra.mxu2 %vm3208_vm0, %v3707_v7 }
 0x5ca   : > { %v3644_v52 = vadd.f32 %v7588_v34, %v3571_v4 }
 0x5cc   : > { %v3676_v56 = vmax.f32 %v3644_v52, 0.0  ;;  %5403 = vmatmul.msk.f32.gmra.mxu3 %vm3208_vm0, %v3166_v2 }
 0x5ce   : > { %v3708_v32 = vmin.f32 %v3676_v56, 1.0 }
 0x5cf   : > { %v3573_v38 = vpop.f32.mrf.mxu3 }
 0x5d0   : > { %v3574_v43 = vadd.f32 %v3573_v38, %v7599_v49  ;;  %5418 = vmatmul.msk.f32.gmra.mxu2 %vm3208_vm0, %v3708_v32 }
 0x5d2   : > { %v3645_v46 = vadd.f32 %v7588_v34, %v3574_v43 }
 0x5d4   : > { %v3677_v13 = vmax.f32 %v3645_v46, 0.0  ;;  %5404 = vmatmul.msk.f32.gmra.mxu3 %vm3208_vm0, %v3167_v29 }
 0x5d6   : > { %v3709_v36 = vmin.f32 %v3677_v13, 1.0 }
 0x5d7   : > { %v3576_v24 = vpop.f32.mrf.mxu3 }
 0x5d8   : > { %v3577_v3 = vadd.f32 %v3576_v24, %v7607_v27  ;;  %5419 = vmatmul.msk.f32.gmra.mxu2 %vm3208_vm0, %v3709_v36 }
 0x5da   : > { %v3646_v16 = vadd.f32 %v7588_v34, %v3577_v3 }
 0x5dc   : > { %v3678_v59 = vmax.f32 %v3646_v16, 0.0 }
 0x5de   : > { %v3710_v49 = vmin.f32 %v3678_v59, 1.0 }
 0x5df   : > { %v3579_v50 = vpop.f32.mrf.mxu3 }
 0x5e0   : > { %v3580_v21 = vadd.f32 %v3579_v50, %v7615_v30  ;;  %5420 = vmatmul.msk.f32.gmra.mxu2 %vm3208_vm0, %v3710_v49 }
 0x5e2   : > { %v3647_v17 = vadd.f32 %v7588_v34, %v3580_v21 }
 0x5e4   : > { %v3679_v22 = vmax.f32 %v3647_v17, 0.0 }
 0x5e6   : > { %v3711_v15 = vmin.f32 %v3679_v22, 1.0 }
 0x5e7   : > { %v3582_v27 = vpop.f32.mrf.mxu3 }
 0x5e8   : > { %v3583_v62 = vadd.f32 %v3582_v27, %v7624_v60  ;;  %5421 = vmatmul.msk.f32.gmra.mxu2 %vm3208_vm0, %v3711_v15 }
 0x5ea   : > { %v3648_v18 = vadd.f32 %v7588_v34, %v3583_v62 }
 0x5eb   : > { %v7700_v10 = vpop.f32.mrf.mxu2 }
 0x5ec   : > { %v3680_v33 = vmax.f32 %v3648_v18, 0.0 }
 0x5ee   : > { %v3712_v57 = vmin.f32 %v3680_v33, 1.0 }
 0x5ef   : > { %v3585_v30 = vpop.f32.mrf.mxu3 }
 0x5f0   : > { %v3586_v31 = vadd.f32 %v3585_v30, %v7632_v5  ;;  %5422 = vmatmul.msk.f32.gmra.mxu2 %vm3208_vm0, %v3712_v57 }
 0x5f2   : > { %v3649_v42 = vadd.f32 %v7588_v34, %v3586_v31 }
 0x5f3   : > { %v7705_v6 = vpop.f32.mrf.mxu2 }
 0x5f4   : > { %v3681_v35 = vmax.f32 %v3649_v42, 0.0 }
 0x5f6   : > { %v3713_v51 = vmin.f32 %v3681_v35, 1.0 }
 0x5f7   : > { %v3588_v60 = vpop.f32.mrf.mxu3 }
 0x5f8   : > { %v3589_v25 = vadd.f32 %v3588_v60, %v7640_v0  ;;  %5423 = vmatmul.msk.f32.gmra.mxu2 %vm3208_vm0, %v3713_v51 }
 0x5fa   : > { %v3650_v19 = vadd.f32 %v7588_v34, %v3589_v25 }
 0x5fb   : > { %v7710_v53 = vpop.f32.mrf.mxu2 }
 0x5fc   : > { %v3682_v39 = vmax.f32 %v3650_v19, 0.0 }
 0x5fe   : > { %v3714_v61 = vmin.f32 %v3682_v39, 1.0 }
 0x5ff   : > { %v3591_v5 = vpop.f32.mrf.mxu3 }
 0x600   : > { %v3592_v14 = vadd.f32 %v3591_v5, %v7648_v63  ;;  %5424 = vmatmul.msk.f32.gmra.mxu2 %vm3208_vm0, %v3714_v61 }
 0x602   : > { %v3651_v9 = vadd.f32 %v7588_v34, %v3592_v14 }
 0x603   : > { %v7715_v37 = vpop.f32.mrf.mxu2 }
 0x604   : > { %v3683_v47 = vmax.f32 %v3651_v9, 0.0 }
 0x606   : > { %v3715_v1 = vmin.f32 %v3683_v47, 1.0 }
 0x607   : > { %v3594_v0 = vpop.f32.mrf.mxu3 }
 0x608   : > { %v3595_v8 = vadd.f32 %v3594_v0, %v7657_v12  ;;  %5425 = vmatmul.msk.f32.gmra.mxu2 %vm3208_vm0, %v3715_v1 }
 0x60a   : > { %v3652_v7 = vadd.f32 %v7588_v34, %v3595_v8 }
 0x60b   : > { %v7720_v45 = vpop.f32.mrf.mxu2 }
 0x60c   : > { %v3684_v4 = vmax.f32 %v3652_v7, 0.0 }
 0x60e   : > { %v3716_v2 = vmin.f32 %v3684_v4, 1.0 }
 0x60f   : > { %v3597_v63 = vpop.f32.mrf.mxu3 }
 0x610   : > { %v3598_v52 = vadd.f32 %v3597_v63, %v7665_v41  ;;  %5426 = vmatmul.msk.f32.gmra.mxu2 %vm3208_vm0, %v3716_v2 }
 0x612   : > { %v3653_v56 = vadd.f32 %v7588_v34, %v3598_v52 }
 0x613   : > { %v7725_v40 = vpop.f32.mrf.mxu2 }
 0x614   : > { %v3685_v54 = vmax.f32 %v3653_v56, 0.0 }
 0x616   : > { %v3717_v32 = vmin.f32 %v3685_v54, 1.0 }
 0x617   : > { %v3600_v12 = vpop.f32.mrf.mxu3 }
 0x618   : > { %v3601_v38 = vadd.f32 %v3600_v12, %v7673_v23  ;;  %5427 = vmatmul.msk.f32.gmra.mxu2 %vm3208_vm0, %v3717_v32 }
 0x61a   : > { %v3654_v43 = vadd.f32 %v7588_v34, %v3601_v38 }
 0x61b   : > { %v7730_v29 = vpop.f32.mrf.mxu2 }
 0x61c   : > { %v3686_v46 = vmax.f32 %v3654_v43, 0.0 }
 0x61e   : > { %v3718_v13 = vmin.f32 %v3686_v46, 1.0 }
 0x61f   : > { %v3603_v41 = vpop.f32.mrf.mxu3 }
 0x620   : > { %v3604_v36 = vadd.f32 %v3603_v41, %v7681_v55  ;;  %5428 = vmatmul.msk.f32.gmra.mxu2 %vm3208_vm0, %v3718_v13 }
 0x622   : > { %v3655_v24 = vadd.f32 %v7588_v34, %v3604_v36 }
 0x623   : > { %v7735_v3 = vpop.f32.mrf.mxu2 }
 0x624   : > { %v3687_v16 = vmax.f32 %v3655_v24, 0.0 }
 0x626   : > { %v3719_v59 = vmin.f32 %v3687_v16, 1.0 }
 0x627   : > { %v3606_v23 = vpop.f32.mrf.mxu3 }
 0x628   : > { %v3607_v49 = vadd.f32 %v3606_v23, %v7689_v48  ;;  %5429 = vmatmul.msk.f32.gmra.mxu2 %vm3208_vm0, %v3719_v59 }
 0x62a   : > { %v3656_v50 = vadd.f32 %v7588_v34, %v3607_v49 }
 0x62b   : > { %v7740_v21 = vpop.f32.mrf.mxu2 }
 0x62c   : > { %v3688_v17 = vmax.f32 %v3656_v50, 0.0 }
 0x62e   : > { %v3720_v22 = vmin.f32 %v3688_v17, 1.0 }
 0x62f   : > { %v3609_v55 = vpop.f32.mrf.mxu3 }
 0x630   : > { %v3610_v15 = vadd.f32 %v3609_v55, %v7695_v26  ;;  %5430 = vmatmul.msk.f32.gmra.mxu2 %vm3208_vm0, %v3720_v22 }
 0x632   : > { %v3657_v27 = vadd.f32 %v7588_v34, %v3610_v15 }
 0x633   : > { %v3875_v62 = vpop.f32.mrf.mxu2 }
 0x634   : > { %v3689_v18 = vmax.f32 %v3657_v27, 0.0 }
 0x636   : > { %v3721_v33 = vmin.f32 %v3689_v18, 1.0 }
 0x637   : > { %v3612_v57 = vpop.f32.mrf.mxu3 }
 0x638   : > { %v3613_v48 = vadd.f32 %v3612_v57, %v7560_v11  ;;  %5431 = vmatmul.msk.f32.gmra.mxu2 %vm3208_vm0, %v3721_v33 }
 0x63a   : > { %v3658_v30 = vadd.f32 %v7588_v34, %v3613_v48 }
 0x63b   : > { %v3878_v31 = vpop.f32.mrf.mxu2 }
 0x63c   : > { %v3690_v42 = vmax.f32 %v3658_v30, 0.0 }
 0x63e   : > { %v3722_v35 = vmin.f32 %v3690_v42, 1.0 }
 0x63f   : > { %v3615_v51 = vpop.f32.mrf.mxu3 }
 0x640   : > { %v3616_v26 = vadd.f32 %v3615_v51, %v7566_v44  ;;  %5432 = vmatmul.msk.f32.gmra.mxu2 %vm3208_vm0, %v3722_v35 }
 0x642   : > { %v3659_v60 = vadd.f32 %v7588_v34, %v3616_v26 }
 0x643   : > { %v3881_v25 = vpop.f32.mrf.mxu2 }
 0x644   : > { %v3691_v19 = vmax.f32 %v3659_v60, 0.0 }
 0x646   : > { %v3723_v39 = vmin.f32 %v3691_v19, 1.0 }
 0x647   : > { %v3618_v61 = vpop.f32.mrf.mxu3 }
 0x648   : > { %v3619_v11 = vadd.f32 %v3618_v61, %v7572_v58  ;;  %5433 = vmatmul.msk.f32.gmra.mxu2 %vm3208_vm0, %v3723_v39 }
 0x64a   : > { %v3660_v5 = vadd.f32 %v7588_v34, %v3619_v11 }
 0x64b   : > { %v3884_v14 = vpop.f32.mrf.mxu2 }
 0x64c   : > { %v3692_v9 = vmax.f32 %v3660_v5, 0.0 }
 0x64e   : > { %v3724_v47 = vmin.f32 %v3692_v9, 1.0 }
 0x64f   : > { %v3621_v1 = vpop.f32.mrf.mxu3 }
 0x650   : > { %v3622_v44 = vadd.f32 %v3621_v1, %v7578_v28  ;;  %5434 = vmatmul.msk.f32.gmra.mxu2 %vm3208_vm0, %v3724_v47  ;;  %v7761_v28 = vld [vmem:[#allocation14] ss:$0 sm:$0xff] }
 0x651   : > { %v3885_v41 = vadd.f32 %v7761_v28, %v3884_v14  ;;  %v3882_v16 = vadd.f32 %v7761_v28, %v3881_v25  ;;  %v3879_v50 = vadd.f32 %v7761_v28, %v3878_v31  ;;  %v3876_v55 = vadd.f32 %v7761_v28, %v3875_v62 }
 0x652   : > { %v3661_v0 = vadd.f32 %v7588_v34, %v3622_v44  ;;  %v3873_v33 = vadd.f32 %v7761_v28, %v7740_v21  ;;  %v3870_v30 = vadd.f32 %v7761_v28, %v7735_v3  ;;  %v3867_v35 = vadd.f32 %v7761_v28, %v7730_v29 }
 0x653   : > { %v3887_v8 = vpop.f32.mrf.mxu2  ;;  %v3956_v59 = vmax.f32 %v3885_v41, 0.0  ;;  %v3955_v17 = vmax.f32 %v3882_v16, 0.0  ;;  %v3954_v15 = vmax.f32 %v3879_v50, 0.0  ;;  %v3953_v57 = vmax.f32 %v3876_v55, 0.0 }
 0x654   : > { %v3693_v7 = vmax.f32 %v3661_v0, 0.0  ;;  %v3888_v46 = vadd.f32 %v7761_v28, %v3887_v8  ;;  %v3952_v31 = vmax.f32 %v3873_v33, 0.0  ;;  %v3951_v51 = vmax.f32 %v3870_v30, 0.0 }
 0x655   : > { %v3988_v22 = vmin.f32 %v3956_v59, 1.0  ;;  %v3987_v27 = vmin.f32 %v3955_v17, 1.0  ;;  %v3986_v48 = vmin.f32 %v3954_v15, 1.0  ;;  %v3985_v42 = vmin.f32 %v3953_v57, 1.0  ;;  %v4008_v15 = vld [vmem:[#allocation15] sm:$0x1] }
 0x656   : > { %v3725_v4 = vmin.f32 %v3693_v7, 1.0  ;;  %v3957_v36 = vmax.f32 %v3888_v46, 0.0  ;;  %v3984_v26 = vmin.f32 %v3952_v31, 1.0  ;;  %v3864_v21 = vadd.f32 %v7761_v28, %v7725_v40 }
 0x657   : > { %v3624_v2 = vpop.f32.mrf.mxu3  ;;  %v3950_v60 = vmax.f32 %v3867_v35, 0.0  ;;  %v3983_v25 = vmin.f32 %v3951_v51, 1.0  ;;  %v3861_v19 = vadd.f32 %v7761_v28, %v7720_v45  ;;  %v3858_v29 = vadd.f32 %v7761_v28, %v7715_v37 }
 0x658   : > { %v3625_v58 = vadd.f32 %v3624_v2, %v7584_v20  ;;  %5435 = vmatmul.msk.f32.gmra.mxu2 %vm3208_vm0, %v3725_v4  ;;  %v3989_v23 = vmin.f32 %v3957_v36, 1.0  ;;  %v3949_v39 = vmax.f32 %v3864_v21, 0.0  ;;  %v3855_v14 = vadd.f32 %v7761_v28, %v7710_v53  ;;  %v4009_v21 = vld [vmem:[#allocation2] sm:$0x1] }
 0x659   : > { %v3982_v61 = vmin.f32 %v3950_v60, 1.0  ;;  %v3948_v11 = vmax.f32 %v3861_v19, 0.0  ;;  %v3947_v9 = vmax.f32 %v3858_v29, 0.0  ;;  %v3852_v45 = vadd.f32 %v7761_v28, %v7705_v6 }
 0x65a   : > { %v3662_v63 = vadd.f32 %v7588_v34, %v3625_v58  ;;  %v3981_v5 = vmin.f32 %v3949_v39, 1.0  ;;  %v3946_v1 = vmax.f32 %v3855_v14, 0.0  ;;  %v3849_v0 = vadd.f32 %v7761_v28, %v7700_v10 }
 0x65b   : > { %v3890_v52 = vpop.f32.mrf.mxu2  ;;  %v3980_v47 = vmin.f32 %v3948_v11, 1.0  ;;  %v3979_v44 = vmin.f32 %v3947_v9, 1.0  ;;  %v3945_v8 = vmax.f32 %v3852_v45, 0.0 }
 0x65c   : > { %v3694_v56 = vmax.f32 %v3662_v63, 0.0  ;;  %v3891_v12 = vadd.f32 %v7761_v28, %v3890_v52  ;;  %v3978_v7 = vmin.f32 %v3946_v1, 1.0  ;;  %v3944_v53 = vmax.f32 %v3849_v0, 0.0 }
 0x65d   : > { %v3977_v4 = vmin.f32 %v3945_v8, 1.0 }
 0x65e   : > { %v3726_v54 = vmin.f32 %v3694_v56, 1.0  ;;  %v3958_v20 = vmax.f32 %v3891_v12, 0.0  ;;  %v3976_v58 = vmin.f32 %v3944_v53, 1.0 }
 0x660   : > { %5436 = vmatmul.msk.f32.gmra.mxu2 %vm3208_vm0, %v3726_v54  ;;  %v3990_v24 = vmin.f32 %v3958_v20, 1.0 }
 0x663   : > { %v3893_v32 = vpop.f32.mrf.mxu2 }
 0x664   : > { %v3894_v38 = vadd.f32 %v7761_v28, %v3893_v32 }
 0x666   : > { %v3959_v43 = vmax.f32 %v3894_v38, 0.0 }
 0x668   : > { %v3991_v13 = vmin.f32 %v3959_v43, 1.0 }
 0x66a   : > { %5437 = vmatpush.xpose.msk.msrb.mxu3 %vm3208_vm0, %v3991_v13 }
 0x66b   : > { %v7767_v34 = vpop.f32.mrf.mxu2 }
 0x66e   : > { %5438 = vmatpush.xpose.msk.msrb.mxu3 %vm3208_vm0, %v3990_v24 }
 0x672   : > { %5439 = vmatpush.xpose.msk.msrb.mxu3 %vm3208_vm0, %v3989_v23 }
 0x673   : > { %v7773_v49 = vpop.f32.mrf.mxu2 }
 0x676   : > { %5440 = vmatpush.xpose.msk.msrb.mxu3 %vm3208_vm0, %v3988_v22 }
 0x67a   : > { %5441 = vmatpush.xpose.msk.msrb.mxu3 %vm3208_vm0, %v3987_v27 }
 0x67b   : > { %v7779_v18 = vpop.f32.mrf.mxu2 }
 0x67e   : > { %5442 = vmatpush.xpose.msk.msrb.mxu3 %vm3208_vm0, %v3986_v48 }
 0x682   : > { %5443 = vmatpush.xpose.msk.msrb.mxu3 %vm3208_vm0, %v3985_v42 }
 0x683   : > { %v7787_v62 = vpop.f32.mrf.mxu2 }
 0x684   : > { %v3906_v9 = vadd.f32 %v7761_v28, %v7787_v62  ;;  %v3897_v62 = vadd.f32 %v7761_v28, %v7767_v34 }
 0x686   : > { %5444 = vmatpush.xpose.msk.msrb.mxu3 %vm3208_vm0, %v3984_v26  ;;  %v6190_v26 = vmov 0   ;;  %v3963_v1 = vmax.f32 %v3906_v9, 0.0  ;;  %v3960_v53 = vmax.f32 %v3897_v62, 0.0 }
 0x687   : > { %5868 = vset.pattern.permute.xlu0 %v6190_v26 }
 0x688   : > { %4012 = vperm.xlu0 %5868, %v4009_v21   ;;  %v3995_v0 = vmin.f32 %v3963_v1, 1.0 }
 0x68a   : > { %5445 = vmatpush.xpose.msk.msrb.mxu3 %vm3208_vm0, %v3983_v25 }
 0x68b   : > { %v7795_v3 = vpop.f32.mrf.mxu2 }
 0x68c   : > { %v3909_v11 = vadd.f32 %v7761_v28, %v7795_v3  ;;  %v3900_v3 = vadd.f32 %v7761_v28, %v7773_v49 }
 0x68e   : > { %5446 = vmatpush.xpose.msk.msrb.mxu3 %vm3208_vm0, %v3982_v61  ;;  %v3961_v8 = vmax.f32 %v3900_v3, 0.0 }
 0x692   : > { %5447 = vmatpush.xpose.msk.msrb.mxu3 %vm3208_vm0, %v3981_v5 }
 0x693   : > { %v7803_v40 = vpop.f32.mrf.mxu2 }
 0x694   : > { %v3912_v39 = vadd.f32 %v7761_v28, %v7803_v40  ;;  %v3903_v40 = vadd.f32 %v7761_v28, %v7779_v18  ;;  %v3993_v18 = vmin.f32 %v3961_v8, 1.0 }
 0x696   : > { %5448 = vmatpush.xpose.msk.msrb.mxu3 %vm3208_vm0, %v3980_v47  ;;  %v3965_v5 = vmax.f32 %v3912_v39, 0.0  ;;  %v3964_v47 = vmax.f32 %v3909_v11, 0.0 }
 0x698   : > { %v3997_v45 = vmin.f32 %v3965_v5, 1.0 }
 0x69a   : > { %5449 = vmatpush.xpose.msk.msrb.mxu3 %vm3208_vm0, %v3979_v44  ;;  %v3996_v44 = vmin.f32 %v3964_v47, 1.0 }
 0x69b   : > { %v3914_v37 = vpop.f32.mrf.mxu2 }
 0x69c   : > { %v3915_v60 = vadd.f32 %v7761_v28, %v3914_v37  ;;  %v3962_v37 = vmax.f32 %v3903_v40, 0.0 }
 0x69e   : > { %5450 = vmatpush.xpose.msk.msrb.mxu3 %vm3208_vm0, %v3978_v7  ;;  %v3966_v61 = vmax.f32 %v3915_v60, 0.0  ;;  %v3994_v7 = vmin.f32 %v3962_v37, 1.0 }
 0x6a0   : > { %v3998_v14 = vmin.f32 %v3966_v61, 1.0 }
 0x6a2   : > { %5451 = vmatpush.xpose.msk.msrb.mxu3 %vm3208_vm0, %v3977_v4  ;;  %v3992_v4 = vmin.f32 %v3960_v53, 1.0 }
 0x6a3   : > { %v3917_v2 = vpop.f32.mrf.mxu2 }
 0x6a4   : > { %v3918_v42 = vadd.f32 %v7761_v28, %v3917_v2 }
 0x6a6   : > { %5452 = vmatpush.xpose.msk.msrb.mxu3 %vm3208_vm0, %v3976_v58  ;;  %v3967_v25 = vmax.f32 %v3918_v42, 0.0 }
 0x6a8   : > { %v3999_v29 = vmin.f32 %v3967_v25, 1.0 }
 0x6a9   : > { %5453 = vmatmul.msk.f32.vlgmr.msrb.gmra.mxu3 %vm3208_vm0, %v4008_v15 }
 0x6ab   : > { %v3920_v6 = vpop.f32.mrf.mxu2 }
 0x6ac   : > { %v3921_v48 = vadd.f32 %v7761_v28, %v3920_v6 }
 0x6ae   : > { %v3968_v35 = vmax.f32 %v3921_v48, 0.0 }
 0x6b0   : > { %v4000_v19 = vmin.f32 %v3968_v35, 1.0 }
 0x6b3   : > { %v3923_v63 = vpop.f32.mrf.mxu2 }
 0x6b4   : > { %v3924_v27 = vadd.f32 %v7761_v28, %v3923_v63 }
 0x6b6   : > { %v3969_v30 = vmax.f32 %v3924_v27, 0.0 }
 0x6b8   : > { %v4001_v51 = vmin.f32 %v3969_v30, 1.0 }
 0x6bb   : > { %v3926_v52 = vpop.f32.mrf.mxu2 }
 0x6bc   : > { %v3927_v17 = vadd.f32 %v7761_v28, %v3926_v52 }
 0x6be   : > { %v3970_v33 = vmax.f32 %v3927_v17, 0.0 }
 0x6c0   : > { %v4002_v31 = vmin.f32 %v3970_v33, 1.0 }
 0x6c3   : > { %v3929_v56 = vpop.f32.mrf.mxu2 }
 0x6c4   : > { %v3930_v59 = vadd.f32 %v7761_v28, %v3929_v56 }
 0x6c6   : > { %v3971_v22 = vmax.f32 %v3930_v59, 0.0 }
 0x6c8   : > { %v4003_v57 = vmin.f32 %v3971_v22, 1.0 }
 0x6cb   : > { %v3932_v54 = vpop.f32.mrf.mxu2 }
 0x6cc   : > { %v3933_v36 = vadd.f32 %v7761_v28, %v3932_v54 }
 0x6ce   : > { %v3972_v23 = vmax.f32 %v3933_v36, 0.0 }
 0x6d0   : > { %v4004_v55 = vmin.f32 %v3972_v23, 1.0 }
 0x6d3   : > { %v3935_v32 = vpop.f32.mrf.mxu2 }
 0x6d4   : > { %v3936_v20 = vadd.f32 %v7761_v28, %v3935_v32 }
 0x6d6   : > { %v3973_v24 = vmax.f32 %v3936_v20, 0.0 }
 0x6d8   : > { %v4005_v50 = vmin.f32 %v3973_v24, 1.0 }
 0x6db   : > { %v3938_v12 = vpop.f32.mrf.mxu2 }
 0x6dc   : > { %v3939_v38 = vadd.f32 %v7761_v28, %v3938_v12 }
 0x6de   : > { %v3974_v13 = vmax.f32 %v3939_v38, 0.0 }
 0x6e0   : > { %v4006_v16 = vmin.f32 %v3974_v13, 1.0 }
 0x6e3   : > { %v3941_v10 = vpop.f32.mrf.mxu2 }
 0x6e4   : > { %v3942_v43 = vadd.f32 %v7761_v28, %v3941_v10 }
 0x6e6   : > { %v3975_v46 = vmax.f32 %v3942_v43, 0.0 }
 0x6e8   : > { %v4007_v41 = vmin.f32 %v3975_v46, 1.0 }
 0x6ea   : > { %5454 = vmatpush.xpose.msk.msra.mxu3 %vm3208_vm0, %v4007_v41 }
 0x6ee   : > { %5455 = vmatpush.xpose.msk.msra.mxu3 %vm3208_vm0, %v4006_v16 }
 0x6f2   : > { %5456 = vmatpush.xpose.msk.msra.mxu3 %vm3208_vm0, %v4005_v50 }
 0x6f6   : > { %5457 = vmatpush.xpose.msk.msra.mxu3 %vm3208_vm0, %v4004_v55  ;;  %v4199_v55 = vlaneseq }
 0x6f8   : > { %vm4201_vm10 = vcmp.lt.s32.totalorder %v4199_v55, 256 }
 0x6fa   : > { %5458 = vmatpush.xpose.msk.msra.mxu3 %vm3208_vm0, %v4003_v57  ;;  %v4013_v49 = vpop.permute.xlu0 %4012 }
 0x6fb   : > { %v4015_v2 = vperm.slane %v4013_v49, 0 }
 0x6fe   : > { %5459 = vmatpush.xpose.msk.msra.mxu3 %vm3208_vm0, %v4002_v31 }
 0x702   : > { %5460 = vmatpush.xpose.msk.msra.mxu3 %vm3208_vm0, %v4001_v51 }
 0x706   : > { %5461 = vmatpush.xpose.msk.msra.mxu3 %vm3208_vm0, %v4000_v19 }
 0x70a   : > { %5462 = vmatpush.xpose.msk.msra.mxu3 %vm3208_vm0, %v3999_v29 }
 0x70e   : > { %5463 = vmatpush.xpose.msk.msra.mxu3 %vm3208_vm0, %v3998_v14 }
 0x712   : > { %5464 = vmatpush.xpose.msk.msra.mxu3 %vm3208_vm0, %v3997_v45 }
 0x716   : > { %5465 = vmatpush.xpose.msk.msra.mxu3 %vm3208_vm0, %v3996_v44 }
 0x71a   : > { %5466 = vmatpush.xpose.msk.msra.mxu3 %vm3208_vm0, %v3995_v0 }
 0x71e   : > { %5467 = vmatpush.xpose.msk.msra.mxu3 %vm3208_vm0, %v3994_v7 }
 0x722   : > { %5468 = vmatpush.xpose.msk.msra.mxu3 %vm3208_vm0, %v3993_v18 }
 0x726   : > { %5469 = vmatpush.xpose.msk.msra.mxu3 %vm3208_vm0, %v3992_v4 }
 0x729   : > { %5470 = vmatmul.msk.f32.vlgmr.msra.gmra.mxu3 %vm3208_vm0, %v4008_v15 }
 0x72c   : > { %v4132_v58 = vpop.f32.mrf.mxu3 }
 0x72d   : > { %v4133_v6 = vadd.f32 %v4132_v58, %v4015_v2 }
 0x72f   : > { %v5471_v63 = vmul.f32 -1.442695, %v4133_v6 }
 0x731   : > { %5872 = vpow2.f32 %v5471_v63 }
 0x737   : > { %v5873_v28 = vpop.eup %5872 }
 0x738   : > { %v4161_v34 = vadd.f32 1.0, %v5873_v28 }
 0x73a   : > { %5874 = vrcp.f32 %v4161_v34  ;;  %vm4168_vm1 = vweird.f32 %v4161_v34  ;;  %v4174_v16 = vand.u32 2147483648, %v4161_v34  ;;  %v4172_v50 = vand.u32 2147483647, %v4161_v34 }
 0x73c   : > { %v4175_v27 = vor.u32 1.1754944e-38, %v4174_v16  ;;  %vm4173_vm8 = vcmp.eq.f32.partialorder %v4172_v50, 8.507059e+37 }
 0x740   : > { %v5875_v32 = vpop.eup %5874 }
 0x741   : > { %v4164_v10 = vmul.f32 %v5875_v32, %v4161_v34  ;;  %vm4169_vm2 = vweird.f32 %v5875_v32 }
 0x742   : > { %vm7858_vm4 = vmor %vm4168_vm1, %vm4169_vm2 }
 0x743   : > { %v4165_v43 = vsub.f32 1.0, %v4164_v10 }
 0x745   : > { %v4166_v20 = vmul.f32 %v5875_v32, %v4165_v43 }
 0x747   : > { %v4167_v24 = vadd.f32 %v5875_v32, %v4166_v20 }
 0x749   : > { %v4171_v33 = vsel %vm7858_vm4, %v5875_v32, %v4167_v24 }
 0x74a   : > { %v4176_v31 = vsel %vm4173_vm8, %v4175_v27, %v4171_v33 }
 0x7ac   : > { %v4152_v52 = vpop.f32.mrf.mxu3 }
 0x7ad   : > { %v4153_v56 = vadd.f32 %v4152_v52, %v4015_v2 }
 0x7af   : > { %v5472_v54 = vmul.f32 -1.442695, %v4153_v56 }
 0x7b1   : > { %5876 = vpow2.f32 %v5472_v54 }
 0x7b7   : > { %v5877_v12 = vpop.eup %5876 }
 0x7b8   : > { %v4162_v38 = vadd.f32 1.0, %v5877_v12 }
 0x7ba   : > { %5878 = vrcp.f32 %v4162_v38  ;;  %v4189_v36 = vand.u32 2147483648, %v4162_v38  ;;  %v4187_v23 = vand.u32 2147483647, %v4162_v38  ;;  %vm4183_vm5 = vweird.f32 %v4162_v38 }
 0x7bc   : > { %v4190_v15 = vor.u32 1.1754944e-38, %v4189_v36  ;;  %vm4188_vm7 = vcmp.eq.f32.partialorder %v4187_v23, 8.507059e+37 }
 0x7c0   : > { %v5879_v46 = vpop.eup %5878 }
 0x7c1   : > { %v4179_v13 = vmul.f32 %v5879_v46, %v4162_v38  ;;  %vm4184_vm3 = vweird.f32 %v5879_v46 }
 0x7c2   : > { %vm4185_vm6 = vmor %vm4183_vm5, %vm4184_vm3 }
 0x7c3   : > { %v4180_v41 = vsub.f32 1.0, %v4179_v13 }
 0x7c5   : > { %v4181_v59 = vmul.f32 %v5879_v46, %v4180_v41 }
 0x7c7   : > { %v4182_v22 = vadd.f32 %v5879_v46, %v4181_v59 }
 0x7c9   : > { %v4186_v57 = vsel %vm4185_vm6, %v5879_v46, %v4182_v22 }
 0x7ca   : > { %v4191_v48 = vsel %vm4188_vm7, %v4190_v15, %v4186_v57 }
 0x7cb   : > { %v4195_v30 = vrot.slane %v4191_v48, 7 }
 0x7cd   : > { %v4197_v42 = vsel %vm4196_vm9, %v4176_v31, %v4195_v30 }
 0x7ce   : > { %4203 = vst.msk [vmem:[%s515_s9] sm:$0x3] %vm4201_vm10, %v4197_v42 }
 0x7cf   : > { %6118 = shalt.err (!%p6115_p9)
}
 0x7d0   : > { %5777 = dma.vmem_to_hbm [thread:$0]  (%p6301_p11), %s4218_s22, 32, %s4220_s19, %s4205_s24  }
 0x7d1 PF: > { %s7979_s14 = sld [smem:[#allocation27_spill]]  ;;  %p5802_p10 = pnand %p4366_p2, %p6305_p12 }
 0x7d3   : > { %p5803_p13 = pneg %p5802_p10 }
 0x7d7   : > { %s4231_s6 = sand.u32 1, %s7979_s14  }
 0x7d8   : > { %s4232_s20 = scalar_lea.sflag [#allocation5], %s4231_s6 }
 0x7d9   : > { %6156 = dma.done.wait (%p5803_p13), %s4232_s20, 32  }
 0x7da   : > { %6158 = vsyncadd (%p5803_p13), %s4232_s20, 4294967264  ;;  %s7981_s18 = sld [smem:[#allocation28_spill]]  ;;  %s7983_s15 = smov %s6165_s16 }
 0x7db   : > { %s7982_s21 = sld [smem:[#allocation29_spill]]  ;;  %s7984_s16 = smov %s6169_s17 }
 0x7e0   : > { %p29_p1 = scmp.ge.s32.totalorder %s7981_s18, 4  }
 0x7e1   : > { %s7985_s17 = smov %s7982_s21 }
 0x7e2   :  { %31 = sbr.rel (!%p29_p1) target bundleno = 13 (0xd), region = 138 }
 0x7e7   :  { %4238 = vsyncpa [#allocation4], 1 }
 0x7e8   :  { %4240 = vsyncpa [#allocation4 + $0x1], 1 }
 0x7e9   :  { %4241 = vsyncpa [#allocation7], 1 }
 0x7ea   :  { %4242 = vsyncpa [#allocation10], 1 }
 0x7eb   :  { %4243 = vsyncpa [#allocation13], 1 }
 0x7ec   :  { %4244 = vsyncpa [#allocation16], 1 }
 0x7ed   :  { %4245 = vsyncpa [#allocation5], 1 }
 0x7ee   :  { %4247 = vsyncpa [#allocation5 + $0x1], 1 }

</bundles_post_ra>
